<compile_context>
chip_gen: v7x
topology: tpu7x:2x2x1
jax: 0.10.0
libtpu: 0.0.40
codegen_flags: <defaults>
</compile_context>

<pallas_src>
import jax
import jax.numpy as jnp
from jax.experimental import pallas as pl
from jax.experimental.pallas import tpu as pltpu


def _rup(x, m):
    return (x + m - 1) // m * m


# ----------------------- VMEM budgeting (generation aware) -----------------------

def _vmem_caps():
    """(tile-picking budget, vmem_limit cap) chosen per TPU generation."""
    cap = 128 << 20
    try:
        cap = int(pltpu.get_tpu_info().vmem_capacity_bytes)
    except Exception:
        cap = 64 << 20                      # conservative fallback
    if cap <= (64 << 20):                   # v7x-class: 64 MiB VMEM per TensorCore
        return 14 << 20, 32 << 20
    return 48 << 20, 96 << 20               # v5e / v6e: 128 MiB VMEM


def _vmem_estimate_bytes(tile_bs, branch_shapes, c_pad, single_buffer_weights=True):
    """Per-grid-step VMEM usage: pipelined blocks + live f32 temporaries."""
    wbuf = 1 if single_buffer_weights else 2
    total = 2 * tile_bs * c_pad * 4                         # double-buffered f32 out block
    for K, cin_pad, couts, cl_pad in branch_shapes:
        total += 2 * K * tile_bs * cin_pad * 2              # double-buffered bf16 feats block
        widest = _rup(max(couts + [1]), 128)
        total += 2 * tile_bs * widest * 4                   # live f32 intermediate (+ cast copy)
        total += tile_bs * cl_pad * 4                       # running-max accumulator
        last = cin_pad
        for j, co in enumerate(couts):
            co_eff = cl_pad if j == len(couts) - 1 else co
            total += wbuf * (_rup(last, 16) * _rup(co_eff, 128) * 2   # bf16 weights
                             + 8 * _rup(co_eff, 128) * 4)            # f32 bias (sublane padded)
            last = co
    return total


def _pick_tile_bs(BS, branch_shapes, c_pad, vmem_budget, min_tiles=4, max_tile=2048):
    """Largest multiple-of-8 tile within the VMEM budget that still leaves at
    least `min_tiles` grid steps (>= 2 per v7x TensorCore) when BS allows."""
    tile = max(8, min(max_tile, (BS // min_tiles) // 8 * 8))
    while tile > 8 and _vmem_estimate_bytes(tile, branch_shapes, c_pad) > vmem_budget:
        tile -= 8
    return tile


# ----------------------- Pallas kernel: fused multi-branch MLP + K-max -----------------------

def _make_fused_kernel(Ks, layer_counts, col_offsets, col_widths):
    """One grid step = one tile of `tile_bs` centroids, all radius branches.

    Per branch the refs are: feats [K, tile_bs, cin_pad] bf16 (neighbor-major),
    then per layer W [cin, cout] bf16 and b [1, cout] f32 (BatchNorm folded).
    The MLP runs per neighbor slab with a running element-wise max, and each
    branch's K-maxed result is stored straight into its lane-aligned
    (multiple-of-128) column slice of the single lane-dense output block.
    """
    def kernel(*refs):
        out_ref = refs[-1]
        idx = 0
        for bi, (K, nl) in enumerate(zip(Ks, layer_counts)):
            feats_ref = refs[idx]
            wb_refs = refs[idx + 1: idx + 1 + 2 * nl]
            idx += 1 + 2 * nl
            # Hoist the (small) weight / bias loads out of the neighbor loop.
            wbs = [(wb_refs[2 * j][...], wb_refs[2 * j + 1][...]) for j in range(nl)]
            acc = None
            for k in range(K):
                h = feats_ref[k]                                   # [tile_bs, cin_pad] bf16
                for j, (w, b) in enumerate(wbs):
                    h = jnp.dot(h, w, preferred_element_type=jnp.float32) + b
                    h = jnp.maximum(h, 0.0)                        # ReLU in f32
                    if j + 1 < nl:
                        h = h.astype(jnp.bfloat16)                 # bf16 MXU operands, f32 accumulate
                acc = h if acc is None else jnp.maximum(acc, h)    # running max over neighbors
            out_ref[:, col_offsets[bi]:col_offsets[bi] + col_widths[bi]] = acc
    return kernel


def msg_mlp_max_pallas(branch_feats, branch_params, tile_bs=None):
    """branch_feats: list of [K_i, BS, Cin_i] (neighbor-major); branch_params:
    per branch list of (W [cin,cout], b [cout]) with BN folded.

    Returns [BS, sum_i Cout_i] f32: per-(centroid, neighbor) MLP, max over
    neighbors, concatenated over branches (== torch conv/bn/relu + max + cat).
    """
    BS = int(branch_feats[0].shape[1])
    Ks = [int(f.shape[0]) for f in branch_feats]
    cins = [int(f.shape[2]) for f in branch_feats]
    cin_pads = [_rup(c, 128) for c in cins]
    layer_counts = [len(p) for p in branch_params]
    couts = [[int(w.shape[1]) for (w, _) in p] for p in branch_params]
    cout_last = [c[-1] for c in couts]
    cout_last_pad = [_rup(c, 128) for c in cout_last]
    col_offsets = [0]
    for w in cout_last_pad[:-1]:
        col_offsets.append(col_offsets[-1] + w)
    c_pad = sum(cout_last_pad)
    branch_shapes = list(zip(Ks, cin_pads, couts, cout_last_pad))

    vmem_budget, vmem_cap = _vmem_caps()
    if tile_bs is None:
        tile_bs = _pick_tile_bs(BS, branch_shapes, c_pad, vmem_budget)
    tile_bs = max(8, (tile_bs // 8) * 8)
    n_tiles = pl.cdiv(BS, tile_bs)
    BS_pad = n_tiles * tile_bs

    # ---- argument assembly (spec descriptors kept so buffering can be toggled) ----
    args, spec_descs = [], []
    for f, params, K, cin, cin_pad, cl_pad in zip(
            branch_feats, branch_params, Ks, cins, cin_pads, cout_last_pad):
        fb = f.astype(jnp.bfloat16)                               # cast BEFORE padding
        fb = jnp.pad(fb, ((0, 0), (0, BS_pad - BS), (0, cin_pad - cin)))
        args.append(fb)
        spec_descs.append(("feats", (K, tile_bs, cin_pad)))
        nl = len(params)
        for j, (w, b) in enumerate(params):
            wj = w.astype(jnp.bfloat16)
            bj = b.reshape(1, -1).astype(jnp.float32)
            if j == 0 and cin_pad > cin:                          # zero rows for padded cin
                wj = jnp.pad(wj, ((0, cin_pad - cin), (0, 0)))
            if j == nl - 1 and cl_pad > wj.shape[1]:              # zero cols -> lane-aligned out
                wj = jnp.pad(wj, ((0, 0), (0, cl_pad - wj.shape[1])))
                bj = jnp.pad(bj, ((0, 0), (0, cl_pad - bj.shape[1])))
            args.append(wj)
            spec_descs.append(("const", wj.shape))
            args.append(bj)
            spec_descs.append(("const", bj.shape))

    est = _vmem_estimate_bytes(tile_bs, branch_shapes, c_pad)
    vmem_limit = int(min(max(2 * est, 32 << 20), vmem_cap))

    kernel = _make_fused_kernel(Ks, layer_counts, col_offsets, cout_last_pad)
    out_shape = jax.ShapeDtypeStruct((BS_pad, c_pad), jnp.float32)
    out_spec = pl.BlockSpec((tile_bs, c_pad), lambda r: (r, 0))
    cparams = pltpu.CompilerParams(dimension_semantics=("parallel",),
                                   vmem_limit_bytes=vmem_limit)

    def _build_specs(single_buffer_weights):
        specs = []
        for kind, shp in spec_descs:
            if kind == "feats":
                specs.append(pl.BlockSpec(shp, lambda r: (0, r, 0)))
            elif single_buffer_weights:
                specs.append(pl.BlockSpec(shp, lambda r: (0, 0),
                                          pipeline_mode=pl.Buffered(1)))
            else:
                specs.append(pl.BlockSpec(shp, lambda r: (0, 0)))
        return specs

    def _run(single_buffer_weights):
        return pl.pallas_call(
            kernel,
            out_shape=out_shape,
            grid=(n_tiles,),
            in_specs=_build_specs(single_buffer_weights),
            out_specs=out_spec,
            compiler_params=cparams,
        )(*args)

    try:
        out = _run(True)      # single-buffer the constant weight/bias blocks
    except Exception:
        out = _run(False)     # fall back to default double buffering

    # Slice back to the real (unpadded) channels per branch and concatenate.
    pieces = [out[:BS, off:off + c] for off, c in zip(col_offsets, cout_last)]
    return jnp.concatenate(pieces, axis=-1)


def msg_mlp_max_ref(branch_feats, branch_params):
    """Pure-JAX reference with matching (bf16-operand, f32-accumulate) precision."""
    outs = []
    for f, params in zip(branch_feats, branch_params):
        K, BS, cin = f.shape
        h = f.astype(jnp.bfloat16).reshape(K * BS, cin)
        for j, (w, b) in enumerate(params):
            h = jnp.dot(h, w.astype(jnp.bfloat16),
                        preferred_element_type=jnp.float32) + b.reshape(1, -1)
            h = jnp.maximum(h, 0.0)
            if j + 1 < len(params):
                h = h.astype(jnp.bfloat16)
        outs.append(h.reshape(K, BS, -1).max(axis=0))
    return jnp.concatenate(outs, axis=-1)


# ----------------------- plain-JAX glue (sampling / grouping) -----------------------

def index_points(points, idx):
    """points [B, N, C], idx [B, S] or [B, S, K] -> [B, S(, K), C]."""
    B = points.shape[0]
    C = points.shape[-1]
    raw = idx.shape
    idx_flat = idx.reshape(B, -1)
    M = idx_flat.shape[1]
    gathered = jnp.take_along_axis(
        points, jnp.broadcast_to(idx_flat[:, :, None], (B, M, C)), axis=1)
    return gathered.reshape(*raw, C)


def gather_neighbors_kmajor(points, group_idx):
    """points [B, N, C], group_idx [B, S, K] -> [K, B*S, C].

    The gather itself emits the neighbor-major (k, centroid) row order the
    Pallas kernel consumes, so no big feature-slab transpose is needed."""
    B, N, C = points.shape
    S, K = group_idx.shape[1], group_idx.shape[2]
    gidx = group_idx.transpose(2, 0, 1)                                   # [K, B, S] (tiny ints)
    gidx = gidx + (jnp.arange(B, dtype=gidx.dtype) * N)[None, :, None]    # global row index
    flat = points.reshape(B * N, C)
    return jnp.take(flat, gidx.reshape(K, B * S), axis=0)                 # [K, B*S, C]


def farthest_point_sample(xyz, npoint, key):
    B, N, _ = xyz.shape
    # TODO(synk): torch seeds the first centroid with torch.randint; a JAX PRNG is used
    # here, so sampled centroids will not match a torch run bit-for-bit.
    farthest = jax.random.randint(key, (B,), 0, N)
    distance = jnp.full((B, N), 1e10, dtype=jnp.float32)
    centroids = jnp.zeros((B, npoint), dtype=jnp.int32)

    def body(i, carry):
        centroids, distance, farthest = carry
        centroids = centroids.at[:, i].set(farthest)
        centroid = jnp.take_along_axis(
            xyz, jnp.broadcast_to(farthest[:, None, None], (B, 1, 3)), axis=1)  # [B,1,3]
        dist = jnp.sum((xyz - centroid) ** 2, axis=-1)
        distance = jnp.minimum(distance, dist)
        farthest = jnp.argmax(distance, axis=-1).astype(jnp.int32)
        return centroids, distance, farthest

    centroids, _, _ = jax.lax.fori_loop(0, npoint, body, (centroids, distance, farthest))
    return centroids


def query_ball_point(radius, nsample, xyz, new_xyz):
    """Matches torch's ball query: the `nsample` lowest-index points inside the
    ball (duplicating the first hit when fewer than nsample fall inside)."""
    B, N, _ = xyz.shape
    sq_x = jnp.sum(xyz * xyz, axis=-1)                                    # [B, N]
    sq_q = jnp.sum(new_xyz * new_xyz, axis=-1)                            # [B, S]
    cross = jnp.einsum("bsc,bnc->bsn", new_xyz, xyz)
    sqrdists = sq_q[:, :, None] - 2.0 * cross + sq_x[:, None, :]          # [B, S, N]
    idx = jnp.broadcast_to(jnp.arange(N, dtype=jnp.int32), sqrdists.shape)
    idx = jnp.where(sqrdists > radius ** 2, jnp.int32(N), idx)
    # lowest `nsample` indices == torch's sort()[..., :nsample], via top_k
    group_idx = -jax.lax.top_k(-idx, nsample)[0]                          # ascending
    group_first = jnp.broadcast_to(group_idx[:, :, :1], group_idx.shape)
    return jnp.where(group_idx == N, group_first, group_idx)


# ----------------------- parameters (deterministic, BN folded) -----------------------

def init_params(key, in_channel, mlp_list):
    """Conv2d(1x1) weight/bias + BatchNorm2d params, folded (inference-mode BN)."""
    # TODO(synk): PyTorch default (training-mode) BN uses batch statistics; here BN is
    # applied with running statistics folded into the conv weight/bias.
    eps = 1e-5
    folded = []
    for branch in mlp_list:
        layers = []
        last = in_channel + 3
        for cout in branch:
            key, kw, kb, kg, kbt, km, kv = jax.random.split(key, 7)
            W = 0.1 * jax.random.normal(kw, (last, cout), jnp.float32)
            b = 0.1 * jax.random.normal(kb, (cout,), jnp.float32)
            gamma = 1.0 + 0.1 * jax.random.normal(kg, (cout,), jnp.float32)
            beta = 0.1 * jax.random.normal(kbt, (cout,), jnp.float32)
            mean = 0.1 * jax.random.normal(km, (cout,), jnp.float32)
            var = jnp.abs(jax.random.normal(kv, (cout,), jnp.float32)) + 1.0
            scale = gamma / jnp.sqrt(var + eps)
            Wf = W * scale[None, :]
            bf = (b - mean) * scale + beta
            layers.append((Wf, bf))
            last = cout
        folded.append(layers)
    return folded


# ----------------------- forward pass -----------------------

def pointnet_sa_msg_forward(xyz, points, folded_params, npoint, radius_list,
                            nsample_list, fps_key, use_pallas=True):
    """xyz: [B, N, 3], points: [B, N, D] -> (new_xyz [B,S,3], new_points [B,S,D'])."""
    B, N, _ = xyz.shape
    S = npoint
    fps_idx = farthest_point_sample(xyz, S, fps_key)
    new_xyz = index_points(xyz, fps_idx)                                  # [B, S, 3]
    new_xyz_flat = new_xyz.reshape(B * S, 3)

    branch_feats = []
    for i, radius in enumerate(radius_list):
        K = nsample_list[i]
        group_idx = query_ball_point(radius, K, xyz, new_xyz)             # [B, S, K]
        grouped_xyz = gather_neighbors_kmajor(xyz, group_idx)             # [K, B*S, 3]
        grouped_xyz = grouped_xyz - new_xyz_flat[None, :, :]
        if points is not None:
            grouped_pts = gather_neighbors_kmajor(points, group_idx)      # [K, B*S, D]
            grouped = jnp.concatenate([grouped_pts.astype(jnp.bfloat16),
                                       grouped_xyz.astype(jnp.bfloat16)], axis=-1)
        else:
            grouped = grouped_xyz.astype(jnp.bfloat16)
        branch_feats.append(grouped)                                      # [K, B*S, D+3] bf16

    if use_pallas:
        out = msg_mlp_max_pallas(branch_feats, folded_params)
    else:
        out = msg_mlp_max_ref(branch_feats, folded_params)

    # torch: cat([B,Ci,S], dim=1).transpose(1,2) == concat channels-last here
    new_points_concat = out.reshape(B, S, -1)                             # [B, S, D']
    return new_xyz, new_points_concat


# ----------------------- main -----------------------

if __name__ == "__main__":
    key = jax.random.PRNGKey(0)
    B, N, D = 2, 64, 4
    npoint = 16
    radius_list = [0.2, 0.4]
    nsample_list = [8, 16]
    mlp_list = [[16, 32], [16, 32]]

    k_xyz, k_pts, k_fps, k_param = jax.random.split(key, 4)
    xyz = jax.random.uniform(k_xyz, (B, N, 3), dtype=jnp.float32)
    points = jax.random.normal(k_pts, (B, N, D), dtype=jnp.float32)
    params = init_params(k_param, D, mlp_list)

    new_xyz, new_points = pointnet_sa_msg_forward(
        xyz, points, params, npoint, radius_list, nsample_list, k_fps, use_pallas=True)
    new_xyz, new_points = jax.block_until_ready((new_xyz, new_points))

    # cross-check the Pallas hot path against a plain-JAX reference (same precision)
    _, ref_points = pointnet_sa_msg_forward(
        xyz, points, params, npoint, radius_list, nsample_list, k_fps, use_pallas=False)
    ref_points = jax.block_until_ready(ref_points)

    assert new_xyz.shape == (B, npoint, 3)
    assert new_points.shape == (B, npoint, sum(m[-1] for m in mlp_list))
    assert jnp.allclose(new_points, ref_points, atol=2e-3, rtol=2e-3), "Pallas/JAX mismatch"
    print("KERNEL_OK")
</pallas_src>

<mosaic_0001>
module attributes {stable_mosaic.version = 11 : i64} {
  func.func @kernel(%arg0: i32, %arg1: memref<8x8x128xbf16, #tpu.memory_space<vmem>>, %arg2: memref<128x16xbf16, #tpu.memory_space<vmem>>, %arg3: memref<1x16xf32, #tpu.memory_space<vmem>>, %arg4: memref<16x128xbf16, #tpu.memory_space<vmem>>, %arg5: memref<1x128xf32, #tpu.memory_space<vmem>>, %arg6: memref<16x8x128xbf16, #tpu.memory_space<vmem>>, %arg7: memref<128x16xbf16, #tpu.memory_space<vmem>>, %arg8: memref<1x16xf32, #tpu.memory_space<vmem>>, %arg9: memref<16x128xbf16, #tpu.memory_space<vmem>>, %arg10: memref<1x128xf32, #tpu.memory_space<vmem>>, %arg11: memref<8x256xf32, #tpu.memory_space<vmem>>) attributes {dimension_semantics = [#tpu.dimension_semantics<parallel>], iteration_bounds = array<i64: 4>, scalar_prefetch = 0 : i64, scratch_operands = 0 : i64, tpu.core_type = #tpu.core_type<tc>, window_params = [{transform_indices = @transform_0, window_bounds = array<i64: 8, 8, 128>}, {pipeline_mode = #tpu.pipeline_mode<synchronous>, transform_indices = @transform_1, window_bounds = array<i64: 128, 16>}, {pipeline_mode = #tpu.pipeline_mode<synchronous>, transform_indices = @transform_2, window_bounds = array<i64: 1, 16>}, {pipeline_mode = #tpu.pipeline_mode<synchronous>, transform_indices = @transform_3, window_bounds = array<i64: 16, 128>}, {pipeline_mode = #tpu.pipeline_mode<synchronous>, transform_indices = @transform_4, window_bounds = array<i64: 1, 128>}, {transform_indices = @transform_5, window_bounds = array<i64: 16, 8, 128>}, {pipeline_mode = #tpu.pipeline_mode<synchronous>, transform_indices = @transform_6, window_bounds = array<i64: 128, 16>}, {pipeline_mode = #tpu.pipeline_mode<synchronous>, transform_indices = @transform_7, window_bounds = array<i64: 1, 16>}, {pipeline_mode = #tpu.pipeline_mode<synchronous>, transform_indices = @transform_8, window_bounds = array<i64: 16, 128>}, {pipeline_mode = #tpu.pipeline_mode<synchronous>, transform_indices = @transform_9, window_bounds = array<i64: 1, 128>}, {transform_indices = @transform_10, window_bounds = array<i64: 8, 256>}]} {
    %c0 = arith.constant 0 : index
    %c0_0 = arith.constant 0 : index
    %0 = vector.load %arg2[%c0, %c0_0] : memref<128x16xbf16, #tpu.memory_space<vmem>>, vector<128x16xbf16>
    %c0_1 = arith.constant 0 : index
    %c0_2 = arith.constant 0 : index
    %1 = vector.load %arg3[%c0_1, %c0_2] : memref<1x16xf32, #tpu.memory_space<vmem>>, vector<1x16xf32>
    %c0_3 = arith.constant 0 : index
    %c0_4 = arith.constant 0 : index
    %2 = vector.load %arg4[%c0_3, %c0_4] : memref<16x128xbf16, #tpu.memory_space<vmem>>, vector<16x128xbf16>
    %c0_5 = arith.constant 0 : index
    %c0_6 = arith.constant 0 : index
    %3 = vector.load %arg5[%c0_5, %c0_6] : memref<1x128xf32, #tpu.memory_space<vmem>>, vector<1x128xf32>
    %c0_7 = arith.constant 0 : index
    %c0_8 = arith.constant 0 : index
    %c0_9 = arith.constant 0 : index
    %4 = vector.load %arg1[%c0_7, %c0_8, %c0_9] : memref<8x8x128xbf16, #tpu.memory_space<vmem>>, vector<1x8x128xbf16>
    %5 = vector.shape_cast %4 : vector<1x8x128xbf16> to vector<8x128xbf16>
    %cst = arith.constant dense<0.000000e+00> : vector<8x16xf32>
    %6 = tpu.matmul %5, %0, %cst {dimension_numbers = #tpu.dot_dimension_numbers<[1], [0], [0], [1], [0, 0, 1, 1], [], []>} : vector<8x128xbf16>, vector<128x16xbf16>, vector<8x16xf32> -> vector<8x16xf32>
    %7 = vector.broadcast %1 : vector<1x16xf32> to vector<8x16xf32>
    %8 = arith.addf %6, %7 : vector<8x16xf32>
    %cst_10 = arith.constant 0.000000e+00 : f32
    %9 = vector.broadcast %cst_10 : f32 to vector<8x16xf32>
    %10 = arith.maximumf %8, %9 : vector<8x16xf32>
    %11 = arith.truncf %10 : vector<8x16xf32> to vector<8x16xbf16>
    %cst_11 = arith.constant dense<0.000000e+00> : vector<8x128xf32>
    %12 = tpu.matmul %11, %2, %cst_11 {dimension_numbers = #tpu.dot_dimension_numbers<[1], [0], [0], [1], [0, 0, 1, 1], [], []>} : vector<8x16xbf16>, vector<16x128xbf16>, vector<8x128xf32> -> vector<8x128xf32>
    %13 = vector.broadcast %3 : vector<1x128xf32> to vector<8x128xf32>
    %14 = arith.addf %12, %13 : vector<8x128xf32>
    %cst_12 = arith.constant 0.000000e+00 : f32
    %15 = vector.broadcast %cst_12 : f32 to vector<8x128xf32>
    %16 = arith.maximumf %14, %15 : vector<8x128xf32>
    %c1 = arith.constant 1 : index
    %c0_13 = arith.constant 0 : index
    %c0_14 = arith.constant 0 : index
    %17 = vector.load %arg1[%c1, %c0_13, %c0_14] : memref<8x8x128xbf16, #tpu.memory_space<vmem>>, vector<1x8x128xbf16>
    %18 = vector.shape_cast %17 : vector<1x8x128xbf16> to vector<8x128xbf16>
    %cst_15 = arith.constant dense<0.000000e+00> : vector<8x16xf32>
    %19 = tpu.matmul %18, %0, %cst_15 {dimension_numbers = #tpu.dot_dimension_numbers<[1], [0], [0], [1], [0, 0, 1, 1], [], []>} : vector<8x128xbf16>, vector<128x16xbf16>, vector<8x16xf32> -> vector<8x16xf32>
    %20 = vector.broadcast %1 : vector<1x16xf32> to vector<8x16xf32>
    %21 = arith.addf %19, %20 : vector<8x16xf32>
    %cst_16 = arith.constant 0.000000e+00 : f32
    %22 = vector.broadcast %cst_16 : f32 to vector<8x16xf32>
    %23 = arith.maximumf %21, %22 : vector<8x16xf32>
    %24 = arith.truncf %23 : vector<8x16xf32> to vector<8x16xbf16>
    %cst_17 = arith.constant dense<0.000000e+00> : vector<8x128xf32>
    %25 = tpu.matmul %24, %2, %cst_17 {dimension_numbers = #tpu.dot_dimension_numbers<[1], [0], [0], [1], [0, 0, 1, 1], [], []>} : vector<8x16xbf16>, vector<16x128xbf16>, vector<8x128xf32> -> vector<8x128xf32>
    %26 = vector.broadcast %3 : vector<1x128xf32> to vector<8x128xf32>
    %27 = arith.addf %25, %26 : vector<8x128xf32>
    %cst_18 = arith.constant 0.000000e+00 : f32
    %28 = vector.broadcast %cst_18 : f32 to vector<8x128xf32>
    %29 = arith.maximumf %27, %28 : vector<8x128xf32>
    %30 = arith.maximumf %16, %29 : vector<8x128xf32>
    %c2 = arith.constant 2 : index
    %c0_19 = arith.constant 0 : index
    %c0_20 = arith.constant 0 : index
    %31 = vector.load %arg1[%c2, %c0_19, %c0_20] : memref<8x8x128xbf16, #tpu.memory_space<vmem>>, vector<1x8x128xbf16>
    %32 = vector.shape_cast %31 : vector<1x8x128xbf16> to vector<8x128xbf16>
    %cst_21 = arith.constant dense<0.000000e+00> : vector<8x16xf32>
    %33 = tpu.matmul %32, %0, %cst_21 {dimension_numbers = #tpu.dot_dimension_numbers<[1], [0], [0], [1], [0, 0, 1, 1], [], []>} : vector<8x128xbf16>, vector<128x16xbf16>, vector<8x16xf32> -> vector<8x16xf32>
    %34 = vector.broadcast %1 : vector<1x16xf32> to vector<8x16xf32>
    %35 = arith.addf %33, %34 : vector<8x16xf32>
    %cst_22 = arith.constant 0.000000e+00 : f32
    %36 = vector.broadcast %cst_22 : f32 to vector<8x16xf32>
    %37 = arith.maximumf %35, %36 : vector<8x16xf32>
    %38 = arith.truncf %37 : vector<8x16xf32> to vector<8x16xbf16>
    %cst_23 = arith.constant dense<0.000000e+00> : vector<8x128xf32>
    %39 = tpu.matmul %38, %2, %cst_23 {dimension_numbers = #tpu.dot_dimension_numbers<[1], [0], [0], [1], [0, 0, 1, 1], [], []>} : vector<8x16xbf16>, vector<16x128xbf16>, vector<8x128xf32> -> vector<8x128xf32>
    %40 = vector.broadcast %3 : vector<1x128xf32> to vector<8x128xf32>
    %41 = arith.addf %39, %40 : vector<8x128xf32>
    %cst_24 = arith.constant 0.000000e+00 : f32
    %42 = vector.broadcast %cst_24 : f32 to vector<8x128xf32>
    %43 = arith.maximumf %41, %42 : vector<8x128xf32>
    %44 = arith.maximumf %30, %43 : vector<8x128xf32>
    %c3 = arith.constant 3 : index
    %c0_25 = arith.constant 0 : index
    %c0_26 = arith.constant 0 : index
    %45 = vector.load %arg1[%c3, %c0_25, %c0_26] : memref<8x8x128xbf16, #tpu.memory_space<vmem>>, vector<1x8x128xbf16>
    %46 = vector.shape_cast %45 : vector<1x8x128xbf16> to vector<8x128xbf16>
    %cst_27 = arith.constant dense<0.000000e+00> : vector<8x16xf32>
    %47 = tpu.matmul %46, %0, %cst_27 {dimension_numbers = #tpu.dot_dimension_numbers<[1], [0], [0], [1], [0, 0, 1, 1], [], []>} : vector<8x128xbf16>, vector<128x16xbf16>, vector<8x16xf32> -> vector<8x16xf32>
    %48 = vector.broadcast %1 : vector<1x16xf32> to vector<8x16xf32>
    %49 = arith.addf %47, %48 : vector<8x16xf32>
    %cst_28 = arith.constant 0.000000e+00 : f32
    %50 = vector.broadcast %cst_28 : f32 to vector<8x16xf32>
    %51 = arith.maximumf %49, %50 : vector<8x16xf32>
    %52 = arith.truncf %51 : vector<8x16xf32> to vector<8x16xbf16>
    %cst_29 = arith.constant dense<0.000000e+00> : vector<8x128xf32>
    %53 = tpu.matmul %52, %2, %cst_29 {dimension_numbers = #tpu.dot_dimension_numbers<[1], [0], [0], [1], [0, 0, 1, 1], [], []>} : vector<8x16xbf16>, vector<16x128xbf16>, vector<8x128xf32> -> vector<8x128xf32>
    %54 = vector.broadcast %3 : vector<1x128xf32> to vector<8x128xf32>
    %55 = arith.addf %53, %54 : vector<8x128xf32>
    %cst_30 = arith.constant 0.000000e+00 : f32
    %56 = vector.broadcast %cst_30 : f32 to vector<8x128xf32>
    %57 = arith.maximumf %55, %56 : vector<8x128xf32>
    %58 = arith.maximumf %44, %57 : vector<8x128xf32>
    %c4 = arith.constant 4 : index
    %c0_31 = arith.constant 0 : index
    %c0_32 = arith.constant 0 : index
    %59 = vector.load %arg1[%c4, %c0_31, %c0_32] : memref<8x8x128xbf16, #tpu.memory_space<vmem>>, vector<1x8x128xbf16>
    %60 = vector.shape_cast %59 : vector<1x8x128xbf16> to vector<8x128xbf16>
    %cst_33 = arith.constant dense<0.000000e+00> : vector<8x16xf32>
    %61 = tpu.matmul %60, %0, %cst_33 {dimension_numbers = #tpu.dot_dimension_numbers<[1], [0], [0], [1], [0, 0, 1, 1], [], []>} : vector<8x128xbf16>, vector<128x16xbf16>, vector<8x16xf32> -> vector<8x16xf32>
    %62 = vector.broadcast %1 : vector<1x16xf32> to vector<8x16xf32>
    %63 = arith.addf %61, %62 : vector<8x16xf32>
    %cst_34 = arith.constant 0.000000e+00 : f32
    %64 = vector.broadcast %cst_34 : f32 to vector<8x16xf32>
    %65 = arith.maximumf %63, %64 : vector<8x16xf32>
    %66 = arith.truncf %65 : vector<8x16xf32> to vector<8x16xbf16>
    %cst_35 = arith.constant dense<0.000000e+00> : vector<8x128xf32>
    %67 = tpu.matmul %66, %2, %cst_35 {dimension_numbers = #tpu.dot_dimension_numbers<[1], [0], [0], [1], [0, 0, 1, 1], [], []>} : vector<8x16xbf16>, vector<16x128xbf16>, vector<8x128xf32> -> vector<8x128xf32>
    %68 = vector.broadcast %3 : vector<1x128xf32> to vector<8x128xf32>
    %69 = arith.addf %67, %68 : vector<8x128xf32>
    %cst_36 = arith.constant 0.000000e+00 : f32
    %70 = vector.broadcast %cst_36 : f32 to vector<8x128xf32>
    %71 = arith.maximumf %69, %70 : vector<8x128xf32>
    %72 = arith.maximumf %58, %71 : vector<8x128xf32>
    %c5 = arith.constant 5 : index
    %c0_37 = arith.constant 0 : index
    %c0_38 = arith.constant 0 : index
    %73 = vector.load %arg1[%c5, %c0_37, %c0_38] : memref<8x8x128xbf16, #tpu.memory_space<vmem>>, vector<1x8x128xbf16>
    %74 = vector.shape_cast %73 : vector<1x8x128xbf16> to vector<8x128xbf16>
    %cst_39 = arith.constant dense<0.000000e+00> : vector<8x16xf32>
    %75 = tpu.matmul %74, %0, %cst_39 {dimension_numbers = #tpu.dot_dimension_numbers<[1], [0], [0], [1], [0, 0, 1, 1], [], []>} : vector<8x128xbf16>, vector<128x16xbf16>, vector<8x16xf32> -> vector<8x16xf32>
    %76 = vector.broadcast %1 : vector<1x16xf32> to vector<8x16xf32>
    %77 = arith.addf %75, %76 : vector<8x16xf32>
    %cst_40 = arith.constant 0.000000e+00 : f32
    %78 = vector.broadcast %cst_40 : f32 to vector<8x16xf32>
    %79 = arith.maximumf %77, %78 : vector<8x16xf32>
    %80 = arith.truncf %79 : vector<8x16xf32> to vector<8x16xbf16>
    %cst_41 = arith.constant dense<0.000000e+00> : vector<8x128xf32>
    %81 = tpu.matmul %80, %2, %cst_41 {dimension_numbers = #tpu.dot_dimension_numbers<[1], [0], [0], [1], [0, 0, 1, 1], [], []>} : vector<8x16xbf16>, vector<16x128xbf16>, vector<8x128xf32> -> vector<8x128xf32>
    %82 = vector.broadcast %3 : vector<1x128xf32> to vector<8x128xf32>
    %83 = arith.addf %81, %82 : vector<8x128xf32>
    %cst_42 = arith.constant 0.000000e+00 : f32
    %84 = vector.broadcast %cst_42 : f32 to vector<8x128xf32>
    %85 = arith.maximumf %83, %84 : vector<8x128xf32>
    %86 = arith.maximumf %72, %85 : vector<8x128xf32>
    %c6 = arith.constant 6 : index
    %c0_43 = arith.constant 0 : index
    %c0_44 = arith.constant 0 : index
    %87 = vector.load %arg1[%c6, %c0_43, %c0_44] : memref<8x8x128xbf16, #tpu.memory_space<vmem>>, vector<1x8x128xbf16>
    %88 = vector.shape_cast %87 : vector<1x8x128xbf16> to vector<8x128xbf16>
    %cst_45 = arith.constant dense<0.000000e+00> : vector<8x16xf32>
    %89 = tpu.matmul %88, %0, %cst_45 {dimension_numbers = #tpu.dot_dimension_numbers<[1], [0], [0], [1], [0, 0, 1, 1], [], []>} : vector<8x128xbf16>, vector<128x16xbf16>, vector<8x16xf32> -> vector<8x16xf32>
    %90 = vector.broadcast %1 : vector<1x16xf32> to vector<8x16xf32>
    %91 = arith.addf %89, %90 : vector<8x16xf32>
    %cst_46 = arith.constant 0.000000e+00 : f32
    %92 = vector.broadcast %cst_46 : f32 to vector<8x16xf32>
    %93 = arith.maximumf %91, %92 : vector<8x16xf32>
    %94 = arith.truncf %93 : vector<8x16xf32> to vector<8x16xbf16>
    %cst_47 = arith.constant dense<0.000000e+00> : vector<8x128xf32>
    %95 = tpu.matmul %94, %2, %cst_47 {dimension_numbers = #tpu.dot_dimension_numbers<[1], [0], [0], [1], [0, 0, 1, 1], [], []>} : vector<8x16xbf16>, vector<16x128xbf16>, vector<8x128xf32> -> vector<8x128xf32>
    %96 = vector.broadcast %3 : vector<1x128xf32> to vector<8x128xf32>
    %97 = arith.addf %95, %96 : vector<8x128xf32>
    %cst_48 = arith.constant 0.000000e+00 : f32
    %98 = vector.broadcast %cst_48 : f32 to vector<8x128xf32>
    %99 = arith.maximumf %97, %98 : vector<8x128xf32>
    %100 = arith.maximumf %86, %99 : vector<8x128xf32>
    %c7 = arith.constant 7 : index
    %c0_49 = arith.constant 0 : index
    %c0_50 = arith.constant 0 : index
    %101 = vector.load %arg1[%c7, %c0_49, %c0_50] : memref<8x8x128xbf16, #tpu.memory_space<vmem>>, vector<1x8x128xbf16>
    %102 = vector.shape_cast %101 : vector<1x8x128xbf16> to vector<8x128xbf16>
    %cst_51 = arith.constant dense<0.000000e+00> : vector<8x16xf32>
    %103 = tpu.matmul %102, %0, %cst_51 {dimension_numbers = #tpu.dot_dimension_numbers<[1], [0], [0], [1], [0, 0, 1, 1], [], []>} : vector<8x128xbf16>, vector<128x16xbf16>, vector<8x16xf32> -> vector<8x16xf32>
    %104 = vector.broadcast %1 : vector<1x16xf32> to vector<8x16xf32>
    %105 = arith.addf %103, %104 : vector<8x16xf32>
    %cst_52 = arith.constant 0.000000e+00 : f32
    %106 = vector.broadcast %cst_52 : f32 to vector<8x16xf32>
    %107 = arith.maximumf %105, %106 : vector<8x16xf32>
    %108 = arith.truncf %107 : vector<8x16xf32> to vector<8x16xbf16>
    %cst_53 = arith.constant dense<0.000000e+00> : vector<8x128xf32>
    %109 = tpu.matmul %108, %2, %cst_53 {dimension_numbers = #tpu.dot_dimension_numbers<[1], [0], [0], [1], [0, 0, 1, 1], [], []>} : vector<8x16xbf16>, vector<16x128xbf16>, vector<8x128xf32> -> vector<8x128xf32>
    %110 = vector.broadcast %3 : vector<1x128xf32> to vector<8x128xf32>
    %111 = arith.addf %109, %110 : vector<8x128xf32>
    %cst_54 = arith.constant 0.000000e+00 : f32
    %112 = vector.broadcast %cst_54 : f32 to vector<8x128xf32>
    %113 = arith.maximumf %111, %112 : vector<8x128xf32>
    %114 = arith.maximumf %100, %113 : vector<8x128xf32>
    %c0_55 = arith.constant 0 : index
    %c0_56 = arith.constant 0 : index
    %115 = vector.load %arg11[%c0_55, %c0_56] : memref<8x256xf32, #tpu.memory_space<vmem>>, vector<8x128xf32>
    tpu.vector_store %arg11[%c0_55, %c0_56], %114 {strides = array<i32>} : memref<8x256xf32, #tpu.memory_space<vmem>>, vector<8x128xf32>,
    %c0_57 = arith.constant 0 : index
    %c0_58 = arith.constant 0 : index
    %116 = vector.load %arg7[%c0_57, %c0_58] : memref<128x16xbf16, #tpu.memory_space<vmem>>, vector<128x16xbf16>
    %c0_59 = arith.constant 0 : index
    %c0_60 = arith.constant 0 : index
    %117 = vector.load %arg8[%c0_59, %c0_60] : memref<1x16xf32, #tpu.memory_space<vmem>>, vector<1x16xf32>
    %c0_61 = arith.constant 0 : index
    %c0_62 = arith.constant 0 : index
    %118 = vector.load %arg9[%c0_61, %c0_62] : memref<16x128xbf16, #tpu.memory_space<vmem>>, vector<16x128xbf16>
    %c0_63 = arith.constant 0 : index
    %c0_64 = arith.constant 0 : index
    %119 = vector.load %arg10[%c0_63, %c0_64] : memref<1x128xf32, #tpu.memory_space<vmem>>, vector<1x128xf32>
    %c0_65 = arith.constant 0 : index
    %c0_66 = arith.constant 0 : index
    %c0_67 = arith.constant 0 : index
    %120 = vector.load %arg6[%c0_65, %c0_66, %c0_67] : memref<16x8x128xbf16, #tpu.memory_space<vmem>>, vector<1x8x128xbf16>
    %121 = vector.shape_cast %120 : vector<1x8x128xbf16> to vector<8x128xbf16>
    %cst_68 = arith.constant dense<0.000000e+00> : vector<8x16xf32>
    %122 = tpu.matmul %121, %116, %cst_68 {dimension_numbers = #tpu.dot_dimension_numbers<[1], [0], [0], [1], [0, 0, 1, 1], [], []>} : vector<8x128xbf16>, vector<128x16xbf16>, vector<8x16xf32> -> vector<8x16xf32>
    %123 = vector.broadcast %117 : vector<1x16xf32> to vector<8x16xf32>
    %124 = arith.addf %122, %123 : vector<8x16xf32>
    %cst_69 = arith.constant 0.000000e+00 : f32
    %125 = vector.broadcast %cst_69 : f32 to vector<8x16xf32>
    %126 = arith.maximumf %124, %125 : vector<8x16xf32>
    %127 = arith.truncf %126 : vector<8x16xf32> to vector<8x16xbf16>
    %cst_70 = arith.constant dense<0.000000e+00> : vector<8x128xf32>
    %128 = tpu.matmul %127, %118, %cst_70 {dimension_numbers = #tpu.dot_dimension_numbers<[1], [0], [0], [1], [0, 0, 1, 1], [], []>} : vector<8x16xbf16>, vector<16x128xbf16>, vector<8x128xf32> -> vector<8x128xf32>
    %129 = vector.broadcast %119 : vector<1x128xf32> to vector<8x128xf32>
    %130 = arith.addf %128, %129 : vector<8x128xf32>
    %cst_71 = arith.constant 0.000000e+00 : f32
    %131 = vector.broadcast %cst_71 : f32 to vector<8x128xf32>
    %132 = arith.maximumf %130, %131 : vector<8x128xf32>
    %c1_72 = arith.constant 1 : index
    %c0_73 = arith.constant 0 : index
    %c0_74 = arith.constant 0 : index
    %133 = vector.load %arg6[%c1_72, %c0_73, %c0_74] : memref<16x8x128xbf16, #tpu.memory_space<vmem>>, vector<1x8x128xbf16>
    %134 = vector.shape_cast %133 : vector<1x8x128xbf16> to vector<8x128xbf16>
    %cst_75 = arith.constant dense<0.000000e+00> : vector<8x16xf32>
    %135 = tpu.matmul %134, %116, %cst_75 {dimension_numbers = #tpu.dot_dimension_numbers<[1], [0], [0], [1], [0, 0, 1, 1], [], []>} : vector<8x128xbf16>, vector<128x16xbf16>, vector<8x16xf32> -> vector<8x16xf32>
    %136 = vector.broadcast %117 : vector<1x16xf32> to vector<8x16xf32>
    %137 = arith.addf %135, %136 : vector<8x16xf32>
    %cst_76 = arith.constant 0.000000e+00 : f32
    %138 = vector.broadcast %cst_76 : f32 to vector<8x16xf32>
    %139 = arith.maximumf %137, %138 : vector<8x16xf32>
    %140 = arith.truncf %139 : vector<8x16xf32> to vector<8x16xbf16>
    %cst_77 = arith.constant dense<0.000000e+00> : vector<8x128xf32>
    %141 = tpu.matmul %140, %118, %cst_77 {dimension_numbers = #tpu.dot_dimension_numbers<[1], [0], [0], [1], [0, 0, 1, 1], [], []>} : vector<8x16xbf16>, vector<16x128xbf16>, vector<8x128xf32> -> vector<8x128xf32>
    %142 = vector.broadcast %119 : vector<1x128xf32> to vector<8x128xf32>
    %143 = arith.addf %141, %142 : vector<8x128xf32>
    %cst_78 = arith.constant 0.000000e+00 : f32
    %144 = vector.broadcast %cst_78 : f32 to vector<8x128xf32>
    %145 = arith.maximumf %143, %144 : vector<8x128xf32>
    %146 = arith.maximumf %132, %145 : vector<8x128xf32>
    %c2_79 = arith.constant 2 : index
    %c0_80 = arith.constant 0 : index
    %c0_81 = arith.constant 0 : index
    %147 = vector.load %arg6[%c2_79, %c0_80, %c0_81] : memref<16x8x128xbf16, #tpu.memory_space<vmem>>, vector<1x8x128xbf16>
    %148 = vector.shape_cast %147 : vector<1x8x128xbf16> to vector<8x128xbf16>
    %cst_82 = arith.constant dense<0.000000e+00> : vector<8x16xf32>
    %149 = tpu.matmul %148, %116, %cst_82 {dimension_numbers = #tpu.dot_dimension_numbers<[1], [0], [0], [1], [0, 0, 1, 1], [], []>} : vector<8x128xbf16>, vector<128x16xbf16>, vector<8x16xf32> -> vector<8x16xf32>
    %150 = vector.broadcast %117 : vector<1x16xf32> to vector<8x16xf32>
    %151 = arith.addf %149, %150 : vector<8x16xf32>
    %cst_83 = arith.constant 0.000000e+00 : f32
    %152 = vector.broadcast %cst_83 : f32 to vector<8x16xf32>
    %153 = arith.maximumf %151, %152 : vector<8x16xf32>
    %154 = arith.truncf %153 : vector<8x16xf32> to vector<8x16xbf16>
    %cst_84 = arith.constant dense<0.000000e+00> : vector<8x128xf32>
    %155 = tpu.matmul %154, %118, %cst_84 {dimension_numbers = #tpu.dot_dimension_numbers<[1], [0], [0], [1], [0, 0, 1, 1], [], []>} : vector<8x16xbf16>, vector<16x128xbf16>, vector<8x128xf32> -> vector<8x128xf32>
    %156 = vector.broadcast %119 : vector<1x128xf32> to vector<8x128xf32>
    %157 = arith.addf %155, %156 : vector<8x128xf32>
    %cst_85 = arith.constant 0.000000e+00 : f32
    %158 = vector.broadcast %cst_85 : f32 to vector<8x128xf32>
    %159 = arith.maximumf %157, %158 : vector<8x128xf32>
    %160 = arith.maximumf %146, %159 : vector<8x128xf32>
    %c3_86 = arith.constant 3 : index
    %c0_87 = arith.constant 0 : index
    %c0_88 = arith.constant 0 : index
    %161 = vector.load %arg6[%c3_86, %c0_87, %c0_88] : memref<16x8x128xbf16, #tpu.memory_space<vmem>>, vector<1x8x128xbf16>
    %162 = vector.shape_cast %161 : vector<1x8x128xbf16> to vector<8x128xbf16>
    %cst_89 = arith.constant dense<0.000000e+00> : vector<8x16xf32>
    %163 = tpu.matmul %162, %116, %cst_89 {dimension_numbers = #tpu.dot_dimension_numbers<[1], [0], [0], [1], [0, 0, 1, 1], [], []>} : vector<8x128xbf16>, vector<128x16xbf16>, vector<8x16xf32> -> vector<8x16xf32>
    %164 = vector.broadcast %117 : vector<1x16xf32> to vector<8x16xf32>
    %165 = arith.addf %163, %164 : vector<8x16xf32>
    %cst_90 = arith.constant 0.000000e+00 : f32
    %166 = vector.broadcast %cst_90 : f32 to vector<8x16xf32>
    %167 = arith.maximumf %165, %166 : vector<8x16xf32>
    %168 = arith.truncf %167 : vector<8x16xf32> to vector<8x16xbf16>
    %cst_91 = arith.constant dense<0.000000e+00> : vector<8x128xf32>
    %169 = tpu.matmul %168, %118, %cst_91 {dimension_numbers = #tpu.dot_dimension_numbers<[1], [0], [0], [1], [0, 0, 1, 1], [], []>} : vector<8x16xbf16>, vector<16x128xbf16>, vector<8x128xf32> -> vector<8x128xf32>
    %170 = vector.broadcast %119 : vector<1x128xf32> to vector<8x128xf32>
    %171 = arith.addf %169, %170 : vector<8x128xf32>
    %cst_92 = arith.constant 0.000000e+00 : f32
    %172 = vector.broadcast %cst_92 : f32 to vector<8x128xf32>
    %173 = arith.maximumf %171, %172 : vector<8x128xf32>
    %174 = arith.maximumf %160, %173 : vector<8x128xf32>
    %c4_93 = arith.constant 4 : index
    %c0_94 = arith.constant 0 : index
    %c0_95 = arith.constant 0 : index
    %175 = vector.load %arg6[%c4_93, %c0_94, %c0_95] : memref<16x8x128xbf16, #tpu.memory_space<vmem>>, vector<1x8x128xbf16>
    %176 = vector.shape_cast %175 : vector<1x8x128xbf16> to vector<8x128xbf16>
    %cst_96 = arith.constant dense<0.000000e+00> : vector<8x16xf32>
    %177 = tpu.matmul %176, %116, %cst_96 {dimension_numbers = #tpu.dot_dimension_numbers<[1], [0], [0], [1], [0, 0, 1, 1], [], []>} : vector<8x128xbf16>, vector<128x16xbf16>, vector<8x16xf32> -> vector<8x16xf32>
    %178 = vector.broadcast %117 : vector<1x16xf32> to vector<8x16xf32>
    %179 = arith.addf %177, %178 : vector<8x16xf32>
    %cst_97 = arith.constant 0.000000e+00 : f32
    %180 = vector.broadcast %cst_97 : f32 to vector<8x16xf32>
    %181 = arith.maximumf %179, %180 : vector<8x16xf32>
    %182 = arith.truncf %181 : vector<8x16xf32> to vector<8x16xbf16>
    %cst_98 = arith.constant dense<0.000000e+00> : vector<8x128xf32>
    %183 = tpu.matmul %182, %118, %cst_98 {dimension_numbers = #tpu.dot_dimension_numbers<[1], [0], [0], [1], [0, 0, 1, 1], [], []>} : vector<8x16xbf16>, vector<16x128xbf16>, vector<8x128xf32> -> vector<8x128xf32>
    %184 = vector.broadcast %119 : vector<1x128xf32> to vector<8x128xf32>
    %185 = arith.addf %183, %184 : vector<8x128xf32>
    %cst_99 = arith.constant 0.000000e+00 : f32
    %186 = vector.broadcast %cst_99 : f32 to vector<8x128xf32>
    %187 = arith.maximumf %185, %186 : vector<8x128xf32>
    %188 = arith.maximumf %174, %187 : vector<8x128xf32>
    %c5_100 = arith.constant 5 : index
    %c0_101 = arith.constant 0 : index
    %c0_102 = arith.constant 0 : index
    %189 = vector.load %arg6[%c5_100, %c0_101, %c0_102] : memref<16x8x128xbf16, #tpu.memory_space<vmem>>, vector<1x8x128xbf16>
    %190 = vector.shape_cast %189 : vector<1x8x128xbf16> to vector<8x128xbf16>
    %cst_103 = arith.constant dense<0.000000e+00> : vector<8x16xf32>
    %191 = tpu.matmul %190, %116, %cst_103 {dimension_numbers = #tpu.dot_dimension_numbers<[1], [0], [0], [1], [0, 0, 1, 1], [], []>} : vector<8x128xbf16>, vector<128x16xbf16>, vector<8x16xf32> -> vector<8x16xf32>
    %192 = vector.broadcast %117 : vector<1x16xf32> to vector<8x16xf32>
    %193 = arith.addf %191, %192 : vector<8x16xf32>
    %cst_104 = arith.constant 0.000000e+00 : f32
    %194 = vector.broadcast %cst_104 : f32 to vector<8x16xf32>
    %195 = arith.maximumf %193, %194 : vector<8x16xf32>
    %196 = arith.truncf %195 : vector<8x16xf32> to vector<8x16xbf16>
    %cst_105 = arith.constant dense<0.000000e+00> : vector<8x128xf32>
    %197 = tpu.matmul %196, %118, %cst_105 {dimension_numbers = #tpu.dot_dimension_numbers<[1], [0], [0], [1], [0, 0, 1, 1], [], []>} : vector<8x16xbf16>, vector<16x128xbf16>, vector<8x128xf32> -> vector<8x128xf32>
    %198 = vector.broadcast %119 : vector<1x128xf32> to vector<8x128xf32>
    %199 = arith.addf %197, %198 : vector<8x128xf32>
    %cst_106 = arith.constant 0.000000e+00 : f32
    %200 = vector.broadcast %cst_106 : f32 to vector<8x128xf32>
    %201 = arith.maximumf %199, %200 : vector<8x128xf32>
    %202 = arith.maximumf %188, %201 : vector<8x128xf32>
    %c6_107 = arith.constant 6 : index
    %c0_108 = arith.constant 0 : index
    %c0_109 = arith.constant 0 : index
    %203 = vector.load %arg6[%c6_107, %c0_108, %c0_109] : memref<16x8x128xbf16, #tpu.memory_space<vmem>>, vector<1x8x128xbf16>
    %204 = vector.shape_cast %203 : vector<1x8x128xbf16> to vector<8x128xbf16>
    %cst_110 = arith.constant dense<0.000000e+00> : vector<8x16xf32>
    %205 = tpu.matmul %204, %116, %cst_110 {dimension_numbers = #tpu.dot_dimension_numbers<[1], [0], [0], [1], [0, 0, 1, 1], [], []>} : vector<8x128xbf16>, vector<128x16xbf16>, vector<8x16xf32> -> vector<8x16xf32>
    %206 = vector.broadcast %117 : vector<1x16xf32> to vector<8x16xf32>
    %207 = arith.addf %205, %206 : vector<8x16xf32>
    %cst_111 = arith.constant 0.000000e+00 : f32
    %208 = vector.broadcast %cst_111 : f32 to vector<8x16xf32>
    %209 = arith.maximumf %207, %208 : vector<8x16xf32>
    %210 = arith.truncf %209 : vector<8x16xf32> to vector<8x16xbf16>
    %cst_112 = arith.constant dense<0.000000e+00> : vector<8x128xf32>
    %211 = tpu.matmul %210, %118, %cst_112 {dimension_numbers = #tpu.dot_dimension_numbers<[1], [0], [0], [1], [0, 0, 1, 1], [], []>} : vector<8x16xbf16>, vector<16x128xbf16>, vector<8x128xf32> -> vector<8x128xf32>
    %212 = vector.broadcast %119 : vector<1x128xf32> to vector<8x128xf32>
    %213 = arith.addf %211, %212 : vector<8x128xf32>
    %cst_113 = arith.constant 0.000000e+00 : f32
    %214 = vector.broadcast %cst_113 : f32 to vector<8x128xf32>
    %215 = arith.maximumf %213, %214 : vector<8x128xf32>
    %216 = arith.maximumf %202, %215 : vector<8x128xf32>
    %c7_114 = arith.constant 7 : index
    %c0_115 = arith.constant 0 : index
    %c0_116 = arith.constant 0 : index
    %217 = vector.load %arg6[%c7_114, %c0_115, %c0_116] : memref<16x8x128xbf16, #tpu.memory_space<vmem>>, vector<1x8x128xbf16>
    %218 = vector.shape_cast %217 : vector<1x8x128xbf16> to vector<8x128xbf16>
    %cst_117 = arith.constant dense<0.000000e+00> : vector<8x16xf32>
    %219 = tpu.matmul %218, %116, %cst_117 {dimension_numbers = #tpu.dot_dimension_numbers<[1], [0], [0], [1], [0, 0, 1, 1], [], []>} : vector<8x128xbf16>, vector<128x16xbf16>, vector<8x16xf32> -> vector<8x16xf32>
    %220 = vector.broadcast %117 : vector<1x16xf32> to vector<8x16xf32>
    %221 = arith.addf %219, %220 : vector<8x16xf32>
    %cst_118 = arith.constant 0.000000e+00 : f32
    %222 = vector.broadcast %cst_118 : f32 to vector<8x16xf32>
    %223 = arith.maximumf %221, %222 : vector<8x16xf32>
    %224 = arith.truncf %223 : vector<8x16xf32> to vector<8x16xbf16>
    %cst_119 = arith.constant dense<0.000000e+00> : vector<8x128xf32>
    %225 = tpu.matmul %224, %118, %cst_119 {dimension_numbers = #tpu.dot_dimension_numbers<[1], [0], [0], [1], [0, 0, 1, 1], [], []>} : vector<8x16xbf16>, vector<16x128xbf16>, vector<8x128xf32> -> vector<8x128xf32>
    %226 = vector.broadcast %119 : vector<1x128xf32> to vector<8x128xf32>
    %227 = arith.addf %225, %226 : vector<8x128xf32>
    %cst_120 = arith.constant 0.000000e+00 : f32
    %228 = vector.broadcast %cst_120 : f32 to vector<8x128xf32>
    %229 = arith.maximumf %227, %228 : vector<8x128xf32>
    %230 = arith.maximumf %216, %229 : vector<8x128xf32>
    %c8 = arith.constant 8 : index
    %c0_121 = arith.constant 0 : index
    %c0_122 = arith.constant 0 : index
    %231 = vector.load %arg6[%c8, %c0_121, %c0_122] : memref<16x8x128xbf16, #tpu.memory_space<vmem>>, vector<1x8x128xbf16>
    %232 = vector.shape_cast %231 : vector<1x8x128xbf16> to vector<8x128xbf16>
    %cst_123 = arith.constant dense<0.000000e+00> : vector<8x16xf32>
    %233 = tpu.matmul %232, %116, %cst_123 {dimension_numbers = #tpu.dot_dimension_numbers<[1], [0], [0], [1], [0, 0, 1, 1], [], []>} : vector<8x128xbf16>, vector<128x16xbf16>, vector<8x16xf32> -> vector<8x16xf32>
    %234 = vector.broadcast %117 : vector<1x16xf32> to vector<8x16xf32>
    %235 = arith.addf %233, %234 : vector<8x16xf32>
    %cst_124 = arith.constant 0.000000e+00 : f32
    %236 = vector.broadcast %cst_124 : f32 to vector<8x16xf32>
    %237 = arith.maximumf %235, %236 : vector<8x16xf32>
    %238 = arith.truncf %237 : vector<8x16xf32> to vector<8x16xbf16>
    %cst_125 = arith.constant dense<0.000000e+00> : vector<8x128xf32>
    %239 = tpu.matmul %238, %118, %cst_125 {dimension_numbers = #tpu.dot_dimension_numbers<[1], [0], [0], [1], [0, 0, 1, 1], [], []>} : vector<8x16xbf16>, vector<16x128xbf16>, vector<8x128xf32> -> vector<8x128xf32>
    %240 = vector.broadcast %119 : vector<1x128xf32> to vector<8x128xf32>
    %241 = arith.addf %239, %240 : vector<8x128xf32>
    %cst_126 = arith.constant 0.000000e+00 : f32
    %242 = vector.broadcast %cst_126 : f32 to vector<8x128xf32>
    %243 = arith.maximumf %241, %242 : vector<8x128xf32>
    %244 = arith.maximumf %230, %243 : vector<8x128xf32>
    %c9 = arith.constant 9 : index
    %c0_127 = arith.constant 0 : index
    %c0_128 = arith.constant 0 : index
    %245 = vector.load %arg6[%c9, %c0_127, %c0_128] : memref<16x8x128xbf16, #tpu.memory_space<vmem>>, vector<1x8x128xbf16>
    %246 = vector.shape_cast %245 : vector<1x8x128xbf16> to vector<8x128xbf16>
    %cst_129 = arith.constant dense<0.000000e+00> : vector<8x16xf32>
    %247 = tpu.matmul %246, %116, %cst_129 {dimension_numbers = #tpu.dot_dimension_numbers<[1], [0], [0], [1], [0, 0, 1, 1], [], []>} : vector<8x128xbf16>, vector<128x16xbf16>, vector<8x16xf32> -> vector<8x16xf32>
    %248 = vector.broadcast %117 : vector<1x16xf32> to vector<8x16xf32>
    %249 = arith.addf %247, %248 : vector<8x16xf32>
    %cst_130 = arith.constant 0.000000e+00 : f32
    %250 = vector.broadcast %cst_130 : f32 to vector<8x16xf32>
    %251 = arith.maximumf %249, %250 : vector<8x16xf32>
    %252 = arith.truncf %251 : vector<8x16xf32> to vector<8x16xbf16>
    %cst_131 = arith.constant dense<0.000000e+00> : vector<8x128xf32>
    %253 = tpu.matmul %252, %118, %cst_131 {dimension_numbers = #tpu.dot_dimension_numbers<[1], [0], [0], [1], [0, 0, 1, 1], [], []>} : vector<8x16xbf16>, vector<16x128xbf16>, vector<8x128xf32> -> vector<8x128xf32>
    %254 = vector.broadcast %119 : vector<1x128xf32> to vector<8x128xf32>
    %255 = arith.addf %253, %254 : vector<8x128xf32>
    %cst_132 = arith.constant 0.000000e+00 : f32
    %256 = vector.broadcast %cst_132 : f32 to vector<8x128xf32>
    %257 = arith.maximumf %255, %256 : vector<8x128xf32>
    %258 = arith.maximumf %244, %257 : vector<8x128xf32>
    %c10 = arith.constant 10 : index
    %c0_133 = arith.constant 0 : index
    %c0_134 = arith.constant 0 : index
    %259 = vector.load %arg6[%c10, %c0_133, %c0_134] : memref<16x8x128xbf16, #tpu.memory_space<vmem>>, vector<1x8x128xbf16>
    %260 = vector.shape_cast %259 : vector<1x8x128xbf16> to vector<8x128xbf16>
    %cst_135 = arith.constant dense<0.000000e+00> : vector<8x16xf32>
    %261 = tpu.matmul %260, %116, %cst_135 {dimension_numbers = #tpu.dot_dimension_numbers<[1], [0], [0], [1], [0, 0, 1, 1], [], []>} : vector<8x128xbf16>, vector<128x16xbf16>, vector<8x16xf32> -> vector<8x16xf32>
    %262 = vector.broadcast %117 : vector<1x16xf32> to vector<8x16xf32>
    %263 = arith.addf %261, %262 : vector<8x16xf32>
    %cst_136 = arith.constant 0.000000e+00 : f32
    %264 = vector.broadcast %cst_136 : f32 to vector<8x16xf32>
    %265 = arith.maximumf %263, %264 : vector<8x16xf32>
    %266 = arith.truncf %265 : vector<8x16xf32> to vector<8x16xbf16>
    %cst_137 = arith.constant dense<0.000000e+00> : vector<8x128xf32>
    %267 = tpu.matmul %266, %118, %cst_137 {dimension_numbers = #tpu.dot_dimension_numbers<[1], [0], [0], [1], [0, 0, 1, 1], [], []>} : vector<8x16xbf16>, vector<16x128xbf16>, vector<8x128xf32> -> vector<8x128xf32>
    %268 = vector.broadcast %119 : vector<1x128xf32> to vector<8x128xf32>
    %269 = arith.addf %267, %268 : vector<8x128xf32>
    %cst_138 = arith.constant 0.000000e+00 : f32
    %270 = vector.broadcast %cst_138 : f32 to vector<8x128xf32>
    %271 = arith.maximumf %269, %270 : vector<8x128xf32>
    %272 = arith.maximumf %258, %271 : vector<8x128xf32>
    %c11 = arith.constant 11 : index
    %c0_139 = arith.constant 0 : index
    %c0_140 = arith.constant 0 : index
    %273 = vector.load %arg6[%c11, %c0_139, %c0_140] : memref<16x8x128xbf16, #tpu.memory_space<vmem>>, vector<1x8x128xbf16>
    %274 = vector.shape_cast %273 : vector<1x8x128xbf16> to vector<8x128xbf16>
    %cst_141 = arith.constant dense<0.000000e+00> : vector<8x16xf32>
    %275 = tpu.matmul %274, %116, %cst_141 {dimension_numbers = #tpu.dot_dimension_numbers<[1], [0], [0], [1], [0, 0, 1, 1], [], []>} : vector<8x128xbf16>, vector<128x16xbf16>, vector<8x16xf32> -> vector<8x16xf32>
    %276 = vector.broadcast %117 : vector<1x16xf32> to vector<8x16xf32>
    %277 = arith.addf %275, %276 : vector<8x16xf32>
    %cst_142 = arith.constant 0.000000e+00 : f32
    %278 = vector.broadcast %cst_142 : f32 to vector<8x16xf32>
    %279 = arith.maximumf %277, %278 : vector<8x16xf32>
    %280 = arith.truncf %279 : vector<8x16xf32> to vector<8x16xbf16>
    %cst_143 = arith.constant dense<0.000000e+00> : vector<8x128xf32>
    %281 = tpu.matmul %280, %118, %cst_143 {dimension_numbers = #tpu.dot_dimension_numbers<[1], [0], [0], [1], [0, 0, 1, 1], [], []>} : vector<8x16xbf16>, vector<16x128xbf16>, vector<8x128xf32> -> vector<8x128xf32>
    %282 = vector.broadcast %119 : vector<1x128xf32> to vector<8x128xf32>
    %283 = arith.addf %281, %282 : vector<8x128xf32>
    %cst_144 = arith.constant 0.000000e+00 : f32
    %284 = vector.broadcast %cst_144 : f32 to vector<8x128xf32>
    %285 = arith.maximumf %283, %284 : vector<8x128xf32>
    %286 = arith.maximumf %272, %285 : vector<8x128xf32>
    %c12 = arith.constant 12 : index
    %c0_145 = arith.constant 0 : index
    %c0_146 = arith.constant 0 : index
    %287 = vector.load %arg6[%c12, %c0_145, %c0_146] : memref<16x8x128xbf16, #tpu.memory_space<vmem>>, vector<1x8x128xbf16>
    %288 = vector.shape_cast %287 : vector<1x8x128xbf16> to vector<8x128xbf16>
    %cst_147 = arith.constant dense<0.000000e+00> : vector<8x16xf32>
    %289 = tpu.matmul %288, %116, %cst_147 {dimension_numbers = #tpu.dot_dimension_numbers<[1], [0], [0], [1], [0, 0, 1, 1], [], []>} : vector<8x128xbf16>, vector<128x16xbf16>, vector<8x16xf32> -> vector<8x16xf32>
    %290 = vector.broadcast %117 : vector<1x16xf32> to vector<8x16xf32>
    %291 = arith.addf %289, %290 : vector<8x16xf32>
    %cst_148 = arith.constant 0.000000e+00 : f32
    %292 = vector.broadcast %cst_148 : f32 to vector<8x16xf32>
    %293 = arith.maximumf %291, %292 : vector<8x16xf32>
    %294 = arith.truncf %293 : vector<8x16xf32> to vector<8x16xbf16>
    %cst_149 = arith.constant dense<0.000000e+00> : vector<8x128xf32>
    %295 = tpu.matmul %294, %118, %cst_149 {dimension_numbers = #tpu.dot_dimension_numbers<[1], [0], [0], [1], [0, 0, 1, 1], [], []>} : vector<8x16xbf16>, vector<16x128xbf16>, vector<8x128xf32> -> vector<8x128xf32>
    %296 = vector.broadcast %119 : vector<1x128xf32> to vector<8x128xf32>
    %297 = arith.addf %295, %296 : vector<8x128xf32>
    %cst_150 = arith.constant 0.000000e+00 : f32
    %298 = vector.broadcast %cst_150 : f32 to vector<8x128xf32>
    %299 = arith.maximumf %297, %298 : vector<8x128xf32>
    %300 = arith.maximumf %286, %299 : vector<8x128xf32>
    %c13 = arith.constant 13 : index
    %c0_151 = arith.constant 0 : index
    %c0_152 = arith.constant 0 : index
    %301 = vector.load %arg6[%c13, %c0_151, %c0_152] : memref<16x8x128xbf16, #tpu.memory_space<vmem>>, vector<1x8x128xbf16>
    %302 = vector.shape_cast %301 : vector<1x8x128xbf16> to vector<8x128xbf16>
    %cst_153 = arith.constant dense<0.000000e+00> : vector<8x16xf32>
    %303 = tpu.matmul %302, %116, %cst_153 {dimension_numbers = #tpu.dot_dimension_numbers<[1], [0], [0], [1], [0, 0, 1, 1], [], []>} : vector<8x128xbf16>, vector<128x16xbf16>, vector<8x16xf32> -> vector<8x16xf32>
    %304 = vector.broadcast %117 : vector<1x16xf32> to vector<8x16xf32>
    %305 = arith.addf %303, %304 : vector<8x16xf32>
    %cst_154 = arith.constant 0.000000e+00 : f32
    %306 = vector.broadcast %cst_154 : f32 to vector<8x16xf32>
    %307 = arith.maximumf %305, %306 : vector<8x16xf32>
    %308 = arith.truncf %307 : vector<8x16xf32> to vector<8x16xbf16>
    %cst_155 = arith.constant dense<0.000000e+00> : vector<8x128xf32>
    %309 = tpu.matmul %308, %118, %cst_155 {dimension_numbers = #tpu.dot_dimension_numbers<[1], [0], [0], [1], [0, 0, 1, 1], [], []>} : vector<8x16xbf16>, vector<16x128xbf16>, vector<8x128xf32> -> vector<8x128xf32>
    %310 = vector.broadcast %119 : vector<1x128xf32> to vector<8x128xf32>
    %311 = arith.addf %309, %310 : vector<8x128xf32>
    %cst_156 = arith.constant 0.000000e+00 : f32
    %312 = vector.broadcast %cst_156 : f32 to vector<8x128xf32>
    %313 = arith.maximumf %311, %312 : vector<8x128xf32>
    %314 = arith.maximumf %300, %313 : vector<8x128xf32>
    %c14 = arith.constant 14 : index
    %c0_157 = arith.constant 0 : index
    %c0_158 = arith.constant 0 : index
    %315 = vector.load %arg6[%c14, %c0_157, %c0_158] : memref<16x8x128xbf16, #tpu.memory_space<vmem>>, vector<1x8x128xbf16>
    %316 = vector.shape_cast %315 : vector<1x8x128xbf16> to vector<8x128xbf16>
    %cst_159 = arith.constant dense<0.000000e+00> : vector<8x16xf32>
    %317 = tpu.matmul %316, %116, %cst_159 {dimension_numbers = #tpu.dot_dimension_numbers<[1], [0], [0], [1], [0, 0, 1, 1], [], []>} : vector<8x128xbf16>, vector<128x16xbf16>, vector<8x16xf32> -> vector<8x16xf32>
    %318 = vector.broadcast %117 : vector<1x16xf32> to vector<8x16xf32>
    %319 = arith.addf %317, %318 : vector<8x16xf32>
    %cst_160 = arith.constant 0.000000e+00 : f32
    %320 = vector.broadcast %cst_160 : f32 to vector<8x16xf32>
    %321 = arith.maximumf %319, %320 : vector<8x16xf32>
    %322 = arith.truncf %321 : vector<8x16xf32> to vector<8x16xbf16>
    %cst_161 = arith.constant dense<0.000000e+00> : vector<8x128xf32>
    %323 = tpu.matmul %322, %118, %cst_161 {dimension_numbers = #tpu.dot_dimension_numbers<[1], [0], [0], [1], [0, 0, 1, 1], [], []>} : vector<8x16xbf16>, vector<16x128xbf16>, vector<8x128xf32> -> vector<8x128xf32>
    %324 = vector.broadcast %119 : vector<1x128xf32> to vector<8x128xf32>
    %325 = arith.addf %323, %324 : vector<8x128xf32>
    %cst_162 = arith.constant 0.000000e+00 : f32
    %326 = vector.broadcast %cst_162 : f32 to vector<8x128xf32>
    %327 = arith.maximumf %325, %326 : vector<8x128xf32>
    %328 = arith.maximumf %314, %327 : vector<8x128xf32>
    %c15 = arith.constant 15 : index
    %c0_163 = arith.constant 0 : index
    %c0_164 = arith.constant 0 : index
    %329 = vector.load %arg6[%c15, %c0_163, %c0_164] : memref<16x8x128xbf16, #tpu.memory_space<vmem>>, vector<1x8x128xbf16>
    %330 = vector.shape_cast %329 : vector<1x8x128xbf16> to vector<8x128xbf16>
    %cst_165 = arith.constant dense<0.000000e+00> : vector<8x16xf32>
    %331 = tpu.matmul %330, %116, %cst_165 {dimension_numbers = #tpu.dot_dimension_numbers<[1], [0], [0], [1], [0, 0, 1, 1], [], []>} : vector<8x128xbf16>, vector<128x16xbf16>, vector<8x16xf32> -> vector<8x16xf32>
    %332 = vector.broadcast %117 : vector<1x16xf32> to vector<8x16xf32>
    %333 = arith.addf %331, %332 : vector<8x16xf32>
    %cst_166 = arith.constant 0.000000e+00 : f32
    %334 = vector.broadcast %cst_166 : f32 to vector<8x16xf32>
    %335 = arith.maximumf %333, %334 : vector<8x16xf32>
    %336 = arith.truncf %335 : vector<8x16xf32> to vector<8x16xbf16>
    %cst_167 = arith.constant dense<0.000000e+00> : vector<8x128xf32>
    %337 = tpu.matmul %336, %118, %cst_167 {dimension_numbers = #tpu.dot_dimension_numbers<[1], [0], [0], [1], [0, 0, 1, 1], [], []>} : vector<8x16xbf16>, vector<16x128xbf16>, vector<8x128xf32> -> vector<8x128xf32>
    %338 = vector.broadcast %119 : vector<1x128xf32> to vector<8x128xf32>
    %339 = arith.addf %337, %338 : vector<8x128xf32>
    %cst_168 = arith.constant 0.000000e+00 : f32
    %340 = vector.broadcast %cst_168 : f32 to vector<8x128xf32>
    %341 = arith.maximumf %339, %340 : vector<8x128xf32>
    %342 = arith.maximumf %328, %341 : vector<8x128xf32>
    %c0_169 = arith.constant 0 : index
    %c128 = arith.constant 128 : index
    %343 = vector.load %arg11[%c0_169, %c128] : memref<8x256xf32, #tpu.memory_space<vmem>>, vector<8x128xf32>
    tpu.vector_store %arg11[%c0_169, %c128], %342 {strides = array<i32>} : memref<8x256xf32, #tpu.memory_space<vmem>>, vector<8x128xf32>,
    return
  }
  func.func @transform_0(%arg0: i32) -> (i32, i32, i32) {
    %c0_i32 = arith.constant 0 : i32
    %c0_i32_0 = arith.constant 0 : i32
    %c0_i32_1 = arith.constant 0 : i32
    return %c0_i32, %arg0, %c0_i32_0 : i32, i32, i32
  }
  func.func @transform_1(%arg0: i32) -> (i32, i32) {
    %c0_i32 = arith.constant 0 : i32
    %c0_i32_0 = arith.constant 0 : i32
    %c0_i32_1 = arith.constant 0 : i32
    return %c0_i32, %c0_i32_0 : i32, i32
  }
  func.func @transform_2(%arg0: i32) -> (i32, i32) {
    %c0_i32 = arith.constant 0 : i32
    %c0_i32_0 = arith.constant 0 : i32
    %c0_i32_1 = arith.constant 0 : i32
    return %c0_i32, %c0_i32_0 : i32, i32
  }
  func.func @transform_3(%arg0: i32) -> (i32, i32) {
    %c0_i32 = arith.constant 0 : i32
    %c0_i32_0 = arith.constant 0 : i32
    %c0_i32_1 = arith.constant 0 : i32
    return %c0_i32, %c0_i32_0 : i32, i32
  }
  func.func @transform_4(%arg0: i32) -> (i32, i32) {
    %c0_i32 = arith.constant 0 : i32
    %c0_i32_0 = arith.constant 0 : i32
    %c0_i32_1 = arith.constant 0 : i32
    return %c0_i32, %c0_i32_0 : i32, i32
  }
  func.func @transform_5(%arg0: i32) -> (i32, i32, i32) {
    %c0_i32 = arith.constant 0 : i32
    %c0_i32_0 = arith.constant 0 : i32
    %c0_i32_1 = arith.constant 0 : i32
    return %c0_i32, %arg0, %c0_i32_0 : i32, i32, i32
  }
  func.func @transform_6(%arg0: i32) -> (i32, i32) {
    %c0_i32 = arith.constant 0 : i32
    %c0_i32_0 = arith.constant 0 : i32
    %c0_i32_1 = arith.constant 0 : i32
    return %c0_i32, %c0_i32_0 : i32, i32
  }
  func.func @transform_7(%arg0: i32) -> (i32, i32) {
    %c0_i32 = arith.constant 0 : i32
    %c0_i32_0 = arith.constant 0 : i32
    %c0_i32_1 = arith.constant 0 : i32
    return %c0_i32, %c0_i32_0 : i32, i32
  }
  func.func @transform_8(%arg0: i32) -> (i32, i32) {
    %c0_i32 = arith.constant 0 : i32
    %c0_i32_0 = arith.constant 0 : i32
    %c0_i32_1 = arith.constant 0 : i32
    return %c0_i32, %c0_i32_0 : i32, i32
  }
  func.func @transform_9(%arg0: i32) -> (i32, i32) {
    %c0_i32 = arith.constant 0 : i32
    %c0_i32_0 = arith.constant 0 : i32
    %c0_i32_1 = arith.constant 0 : i32
    return %c0_i32, %c0_i32_0 : i32, i32
  }
  func.func @transform_10(%arg0: i32) -> (i32, i32) {
    %c0_i32 = arith.constant 0 : i32
    %c0_i32_0 = arith.constant 0 : i32
    return %arg0, %c0_i32 : i32, i32
  }
}

module attributes {stable_mosaic.version = 11 : i64} {
  func.func @kernel(%arg0: i32, %arg1: memref<8x8x128xbf16, #tpu.memory_space<vmem>>, %arg2: memref<128x16xbf16, #tpu.memory_space<vmem>>, %arg3: memref<1x16xf32, #tpu.memory_space<vmem>>, %arg4: memref<16x128xbf16, #tpu.memory_space<vmem>>, %arg5: memref<1x128xf32, #tpu.memory_space<vmem>>, %arg6: memref<16x8x128xbf16, #tpu.memory_space<vmem>>, %arg7: memref<128x16xbf16, #tpu.memory_space<vmem>>, %arg8: memref<1x16xf32, #tpu.memory_space<vmem>>, %arg9: memref<16x128xbf16, #tpu.memory_space<vmem>>, %arg10: memref<1x128xf32, #tpu.memory_space<vmem>>, %arg11: memref<8x256xf32, #tpu.memory_space<vmem>>) attributes {dimension_semantics = [#tpu.dimension_semantics<parallel>], iteration_bounds = array<i64: 4>, scalar_prefetch = 0 : i64, scratch_operands = 0 : i64, tpu.core_type = #tpu.core_type<tc>, window_params = [{transform_indices = @transform_0, window_bounds = array<i64: 8, 8, 128>}, {pipeline_mode = #tpu.pipeline_mode<synchronous>, transform_indices = @transform_1, window_bounds = array<i64: 128, 16>}, {pipeline_mode = #tpu.pipeline_mode<synchronous>, transform_indices = @transform_2, window_bounds = array<i64: 1, 16>}, {pipeline_mode = #tpu.pipeline_mode<synchronous>, transform_indices = @transform_3, window_bounds = array<i64: 16, 128>}, {pipeline_mode = #tpu.pipeline_mode<synchronous>, transform_indices = @transform_4, window_bounds = array<i64: 1, 128>}, {transform_indices = @transform_5, window_bounds = array<i64: 16, 8, 128>}, {pipeline_mode = #tpu.pipeline_mode<synchronous>, transform_indices = @transform_6, window_bounds = array<i64: 128, 16>}, {pipeline_mode = #tpu.pipeline_mode<synchronous>, transform_indices = @transform_7, window_bounds = array<i64: 1, 16>}, {pipeline_mode = #tpu.pipeline_mode<synchronous>, transform_indices = @transform_8, window_bounds = array<i64: 16, 128>}, {pipeline_mode = #tpu.pipeline_mode<synchronous>, transform_indices = @transform_9, window_bounds = array<i64: 1, 128>}, {transform_indices = @transform_10, window_bounds = array<i64: 8, 256>}]} {
    %c0 = arith.constant 0 : index
    %c0_0 = arith.constant 0 : index
    %0 = vector.load %arg2[%c0, %c0_0] : memref<128x16xbf16, #tpu.memory_space<vmem>>, vector<128x16xbf16>
    %c0_1 = arith.constant 0 : index
    %c0_2 = arith.constant 0 : index
    %1 = vector.load %arg3[%c0_1, %c0_2] : memref<1x16xf32, #tpu.memory_space<vmem>>, vector<1x16xf32>
    %c0_3 = arith.constant 0 : index
    %c0_4 = arith.constant 0 : index
    %2 = vector.load %arg4[%c0_3, %c0_4] : memref<16x128xbf16, #tpu.memory_space<vmem>>, vector<16x128xbf16>
    %c0_5 = arith.constant 0 : index
    %c0_6 = arith.constant 0 : index
    %3 = vector.load %arg5[%c0_5, %c0_6] : memref<1x128xf32, #tpu.memory_space<vmem>>, vector<1x128xf32>
    %c0_7 = arith.constant 0 : index
    %c0_8 = arith.constant 0 : index
    %c0_9 = arith.constant 0 : index
    %4 = vector.load %arg1[%c0_7, %c0_8, %c0_9] : memref<8x8x128xbf16, #tpu.memory_space<vmem>>, vector<1x8x128xbf16>
    %5 = vector.shape_cast %4 : vector<1x8x128xbf16> to vector<8x128xbf16>
    %cst = arith.constant dense<0.000000e+00> : vector<8x16xf32>
    %6 = tpu.matmul %5, %0, %cst {dimension_numbers = #tpu.dot_dimension_numbers<[1], [0], [0], [1], [0, 0, 1, 1], [], []>} : vector<8x128xbf16>, vector<128x16xbf16>, vector<8x16xf32> -> vector<8x16xf32>
    %7 = vector.broadcast %1 : vector<1x16xf32> to vector<8x16xf32>
    %8 = arith.addf %6, %7 : vector<8x16xf32>
    %cst_10 = arith.constant 0.000000e+00 : f32
    %9 = vector.broadcast %cst_10 : f32 to vector<8x16xf32>
    %10 = arith.maximumf %8, %9 : vector<8x16xf32>
    %11 = arith.truncf %10 : vector<8x16xf32> to vector<8x16xbf16>
    %cst_11 = arith.constant dense<0.000000e+00> : vector<8x128xf32>
    %12 = tpu.matmul %11, %2, %cst_11 {dimension_numbers = #tpu.dot_dimension_numbers<[1], [0], [0], [1], [0, 0, 1, 1], [], []>} : vector<8x16xbf16>, vector<16x128xbf16>, vector<8x128xf32> -> vector<8x128xf32>
    %13 = vector.broadcast %3 : vector<1x128xf32> to vector<8x128xf32>
    %14 = arith.addf %12, %13 : vector<8x128xf32>
    %cst_12 = arith.constant 0.000000e+00 : f32
    %15 = vector.broadcast %cst_12 : f32 to vector<8x128xf32>
    %16 = arith.maximumf %14, %15 : vector<8x128xf32>
    %c1 = arith.constant 1 : index
    %c0_13 = arith.constant 0 : index
    %c0_14 = arith.constant 0 : index
    %17 = vector.load %arg1[%c1, %c0_13, %c0_14] : memref<8x8x128xbf16, #tpu.memory_space<vmem>>, vector<1x8x128xbf16>
    %18 = vector.shape_cast %17 : vector<1x8x128xbf16> to vector<8x128xbf16>
    %cst_15 = arith.constant dense<0.000000e+00> : vector<8x16xf32>
    %19 = tpu.matmul %18, %0, %cst_15 {dimension_numbers = #tpu.dot_dimension_numbers<[1], [0], [0], [1], [0, 0, 1, 1], [], []>} : vector<8x128xbf16>, vector<128x16xbf16>, vector<8x16xf32> -> vector<8x16xf32>
    %20 = vector.broadcast %1 : vector<1x16xf32> to vector<8x16xf32>
    %21 = arith.addf %19, %20 : vector<8x16xf32>
    %cst_16 = arith.constant 0.000000e+00 : f32
    %22 = vector.broadcast %cst_16 : f32 to vector<8x16xf32>
    %23 = arith.maximumf %21, %22 : vector<8x16xf32>
    %24 = arith.truncf %23 : vector<8x16xf32> to vector<8x16xbf16>
    %cst_17 = arith.constant dense<0.000000e+00> : vector<8x128xf32>
    %25 = tpu.matmul %24, %2, %cst_17 {dimension_numbers = #tpu.dot_dimension_numbers<[1], [0], [0], [1], [0, 0, 1, 1], [], []>} : vector<8x16xbf16>, vector<16x128xbf16>, vector<8x128xf32> -> vector<8x128xf32>
    %26 = vector.broadcast %3 : vector<1x128xf32> to vector<8x128xf32>
    %27 = arith.addf %25, %26 : vector<8x128xf32>
    %cst_18 = arith.constant 0.000000e+00 : f32
    %28 = vector.broadcast %cst_18 : f32 to vector<8x128xf32>
    %29 = arith.maximumf %27, %28 : vector<8x128xf32>
    %30 = arith.maximumf %16, %29 : vector<8x128xf32>
    %c2 = arith.constant 2 : index
    %c0_19 = arith.constant 0 : index
    %c0_20 = arith.constant 0 : index
    %31 = vector.load %arg1[%c2, %c0_19, %c0_20] : memref<8x8x128xbf16, #tpu.memory_space<vmem>>, vector<1x8x128xbf16>
    %32 = vector.shape_cast %31 : vector<1x8x128xbf16> to vector<8x128xbf16>
    %cst_21 = arith.constant dense<0.000000e+00> : vector<8x16xf32>
    %33 = tpu.matmul %32, %0, %cst_21 {dimension_numbers = #tpu.dot_dimension_numbers<[1], [0], [0], [1], [0, 0, 1, 1], [], []>} : vector<8x128xbf16>, vector<128x16xbf16>, vector<8x16xf32> -> vector<8x16xf32>
    %34 = vector.broadcast %1 : vector<1x16xf32> to vector<8x16xf32>
    %35 = arith.addf %33, %34 : vector<8x16xf32>
    %cst_22 = arith.constant 0.000000e+00 : f32
    %36 = vector.broadcast %cst_22 : f32 to vector<8x16xf32>
    %37 = arith.maximumf %35, %36 : vector<8x16xf32>
    %38 = arith.truncf %37 : vector<8x16xf32> to vector<8x16xbf16>
    %cst_23 = arith.constant dense<0.000000e+00> : vector<8x128xf32>
    %39 = tpu.matmul %38, %2, %cst_23 {dimension_numbers = #tpu.dot_dimension_numbers<[1], [0], [0], [1], [0, 0, 1, 1], [], []>} : vector<8x16xbf16>, vector<16x128xbf16>, vector<8x128xf32> -> vector<8x128xf32>
    %40 = vector.broadcast %3 : vector<1x128xf32> to vector<8x128xf32>
    %41 = arith.addf %39, %40 : vector<8x128xf32>
    %cst_24 = arith.constant 0.000000e+00 : f32
    %42 = vector.broadcast %cst_24 : f32 to vector<8x128xf32>
    %43 = arith.maximumf %41, %42 : vector<8x128xf32>
    %44 = arith.maximumf %30, %43 : vector<8x128xf32>
    %c3 = arith.constant 3 : index
    %c0_25 = arith.constant 0 : index
    %c0_26 = arith.constant 0 : index
    %45 = vector.load %arg1[%c3, %c0_25, %c0_26] : memref<8x8x128xbf16, #tpu.memory_space<vmem>>, vector<1x8x128xbf16>
    %46 = vector.shape_cast %45 : vector<1x8x128xbf16> to vector<8x128xbf16>
    %cst_27 = arith.constant dense<0.000000e+00> : vector<8x16xf32>
    %47 = tpu.matmul %46, %0, %cst_27 {dimension_numbers = #tpu.dot_dimension_numbers<[1], [0], [0], [1], [0, 0, 1, 1], [], []>} : vector<8x128xbf16>, vector<128x16xbf16>, vector<8x16xf32> -> vector<8x16xf32>
    %48 = vector.broadcast %1 : vector<1x16xf32> to vector<8x16xf32>
    %49 = arith.addf %47, %48 : vector<8x16xf32>
    %cst_28 = arith.constant 0.000000e+00 : f32
    %50 = vector.broadcast %cst_28 : f32 to vector<8x16xf32>
    %51 = arith.maximumf %49, %50 : vector<8x16xf32>
    %52 = arith.truncf %51 : vector<8x16xf32> to vector<8x16xbf16>
    %cst_29 = arith.constant dense<0.000000e+00> : vector<8x128xf32>
    %53 = tpu.matmul %52, %2, %cst_29 {dimension_numbers = #tpu.dot_dimension_numbers<[1], [0], [0], [1], [0, 0, 1, 1], [], []>} : vector<8x16xbf16>, vector<16x128xbf16>, vector<8x128xf32> -> vector<8x128xf32>
    %54 = vector.broadcast %3 : vector<1x128xf32> to vector<8x128xf32>
    %55 = arith.addf %53, %54 : vector<8x128xf32>
    %cst_30 = arith.constant 0.000000e+00 : f32
    %56 = vector.broadcast %cst_30 : f32 to vector<8x128xf32>
    %57 = arith.maximumf %55, %56 : vector<8x128xf32>
    %58 = arith.maximumf %44, %57 : vector<8x128xf32>
    %c4 = arith.constant 4 : index
    %c0_31 = arith.constant 0 : index
    %c0_32 = arith.constant 0 : index
    %59 = vector.load %arg1[%c4, %c0_31, %c0_32] : memref<8x8x128xbf16, #tpu.memory_space<vmem>>, vector<1x8x128xbf16>
    %60 = vector.shape_cast %59 : vector<1x8x128xbf16> to vector<8x128xbf16>
    %cst_33 = arith.constant dense<0.000000e+00> : vector<8x16xf32>
    %61 = tpu.matmul %60, %0, %cst_33 {dimension_numbers = #tpu.dot_dimension_numbers<[1], [0], [0], [1], [0, 0, 1, 1], [], []>} : vector<8x128xbf16>, vector<128x16xbf16>, vector<8x16xf32> -> vector<8x16xf32>
    %62 = vector.broadcast %1 : vector<1x16xf32> to vector<8x16xf32>
    %63 = arith.addf %61, %62 : vector<8x16xf32>
    %cst_34 = arith.constant 0.000000e+00 : f32
    %64 = vector.broadcast %cst_34 : f32 to vector<8x16xf32>
    %65 = arith.maximumf %63, %64 : vector<8x16xf32>
    %66 = arith.truncf %65 : vector<8x16xf32> to vector<8x16xbf16>
    %cst_35 = arith.constant dense<0.000000e+00> : vector<8x128xf32>
    %67 = tpu.matmul %66, %2, %cst_35 {dimension_numbers = #tpu.dot_dimension_numbers<[1], [0], [0], [1], [0, 0, 1, 1], [], []>} : vector<8x16xbf16>, vector<16x128xbf16>, vector<8x128xf32> -> vector<8x128xf32>
    %68 = vector.broadcast %3 : vector<1x128xf32> to vector<8x128xf32>
    %69 = arith.addf %67, %68 : vector<8x128xf32>
    %cst_36 = arith.constant 0.000000e+00 : f32
    %70 = vector.broadcast %cst_36 : f32 to vector<8x128xf32>
    %71 = arith.maximumf %69, %70 : vector<8x128xf32>
    %72 = arith.maximumf %58, %71 : vector<8x128xf32>
    %c5 = arith.constant 5 : index
    %c0_37 = arith.constant 0 : index
    %c0_38 = arith.constant 0 : index
    %73 = vector.load %arg1[%c5, %c0_37, %c0_38] : memref<8x8x128xbf16, #tpu.memory_space<vmem>>, vector<1x8x128xbf16>
    %74 = vector.shape_cast %73 : vector<1x8x128xbf16> to vector<8x128xbf16>
    %cst_39 = arith.constant dense<0.000000e+00> : vector<8x16xf32>
    %75 = tpu.matmul %74, %0, %cst_39 {dimension_numbers = #tpu.dot_dimension_numbers<[1], [0], [0], [1], [0, 0, 1, 1], [], []>} : vector<8x128xbf16>, vector<128x16xbf16>, vector<8x16xf32> -> vector<8x16xf32>
    %76 = vector.broadcast %1 : vector<1x16xf32> to vector<8x16xf32>
    %77 = arith.addf %75, %76 : vector<8x16xf32>
    %cst_40 = arith.constant 0.000000e+00 : f32
    %78 = vector.broadcast %cst_40 : f32 to vector<8x16xf32>
    %79 = arith.maximumf %77, %78 : vector<8x16xf32>
    %80 = arith.truncf %79 : vector<8x16xf32> to vector<8x16xbf16>
    %cst_41 = arith.constant dense<0.000000e+00> : vector<8x128xf32>
    %81 = tpu.matmul %80, %2, %cst_41 {dimension_numbers = #tpu.dot_dimension_numbers<[1], [0], [0], [1], [0, 0, 1, 1], [], []>} : vector<8x16xbf16>, vector<16x128xbf16>, vector<8x128xf32> -> vector<8x128xf32>
    %82 = vector.broadcast %3 : vector<1x128xf32> to vector<8x128xf32>
    %83 = arith.addf %81, %82 : vector<8x128xf32>
    %cst_42 = arith.constant 0.000000e+00 : f32
    %84 = vector.broadcast %cst_42 : f32 to vector<8x128xf32>
    %85 = arith.maximumf %83, %84 : vector<8x128xf32>
    %86 = arith.maximumf %72, %85 : vector<8x128xf32>
    %c6 = arith.constant 6 : index
    %c0_43 = arith.constant 0 : index
    %c0_44 = arith.constant 0 : index
    %87 = vector.load %arg1[%c6, %c0_43, %c0_44] : memref<8x8x128xbf16, #tpu.memory_space<vmem>>, vector<1x8x128xbf16>
    %88 = vector.shape_cast %87 : vector<1x8x128xbf16> to vector<8x128xbf16>
    %cst_45 = arith.constant dense<0.000000e+00> : vector<8x16xf32>
    %89 = tpu.matmul %88, %0, %cst_45 {dimension_numbers = #tpu.dot_dimension_numbers<[1], [0], [0], [1], [0, 0, 1, 1], [], []>} : vector<8x128xbf16>, vector<128x16xbf16>, vector<8x16xf32> -> vector<8x16xf32>
    %90 = vector.broadcast %1 : vector<1x16xf32> to vector<8x16xf32>
    %91 = arith.addf %89, %90 : vector<8x16xf32>
    %cst_46 = arith.constant 0.000000e+00 : f32
    %92 = vector.broadcast %cst_46 : f32 to vector<8x16xf32>
    %93 = arith.maximumf %91, %92 : vector<8x16xf32>
    %94 = arith.truncf %93 : vector<8x16xf32> to vector<8x16xbf16>
    %cst_47 = arith.constant dense<0.000000e+00> : vector<8x128xf32>
    %95 = tpu.matmul %94, %2, %cst_47 {dimension_numbers = #tpu.dot_dimension_numbers<[1], [0], [0], [1], [0, 0, 1, 1], [], []>} : vector<8x16xbf16>, vector<16x128xbf16>, vector<8x128xf32> -> vector<8x128xf32>
    %96 = vector.broadcast %3 : vector<1x128xf32> to vector<8x128xf32>
    %97 = arith.addf %95, %96 : vector<8x128xf32>
    %cst_48 = arith.constant 0.000000e+00 : f32
    %98 = vector.broadcast %cst_48 : f32 to vector<8x128xf32>
    %99 = arith.maximumf %97, %98 : vector<8x128xf32>
    %100 = arith.maximumf %86, %99 : vector<8x128xf32>
    %c7 = arith.constant 7 : index
    %c0_49 = arith.constant 0 : index
    %c0_50 = arith.constant 0 : index
    %101 = vector.load %arg1[%c7, %c0_49, %c0_50] : memref<8x8x128xbf16, #tpu.memory_space<vmem>>, vector<1x8x128xbf16>
    %102 = vector.shape_cast %101 : vector<1x8x128xbf16> to vector<8x128xbf16>
    %cst_51 = arith.constant dense<0.000000e+00> : vector<8x16xf32>
    %103 = tpu.matmul %102, %0, %cst_51 {dimension_numbers = #tpu.dot_dimension_numbers<[1], [0], [0], [1], [0, 0, 1, 1], [], []>} : vector<8x128xbf16>, vector<128x16xbf16>, vector<8x16xf32> -> vector<8x16xf32>
    %104 = vector.broadcast %1 : vector<1x16xf32> to vector<8x16xf32>
    %105 = arith.addf %103, %104 : vector<8x16xf32>
    %cst_52 = arith.constant 0.000000e+00 : f32
    %106 = vector.broadcast %cst_52 : f32 to vector<8x16xf32>
    %107 = arith.maximumf %105, %106 : vector<8x16xf32>
    %108 = arith.truncf %107 : vector<8x16xf32> to vector<8x16xbf16>
    %cst_53 = arith.constant dense<0.000000e+00> : vector<8x128xf32>
    %109 = tpu.matmul %108, %2, %cst_53 {dimension_numbers = #tpu.dot_dimension_numbers<[1], [0], [0], [1], [0, 0, 1, 1], [], []>} : vector<8x16xbf16>, vector<16x128xbf16>, vector<8x128xf32> -> vector<8x128xf32>
    %110 = vector.broadcast %3 : vector<1x128xf32> to vector<8x128xf32>
    %111 = arith.addf %109, %110 : vector<8x128xf32>
    %cst_54 = arith.constant 0.000000e+00 : f32
    %112 = vector.broadcast %cst_54 : f32 to vector<8x128xf32>
    %113 = arith.maximumf %111, %112 : vector<8x128xf32>
    %114 = arith.maximumf %100, %113 : vector<8x128xf32>
    %c0_55 = arith.constant 0 : index
    %c0_56 = arith.constant 0 : index
    %115 = vector.load %arg11[%c0_55, %c0_56] : memref<8x256xf32, #tpu.memory_space<vmem>>, vector<8x128xf32>
    tpu.vector_store %arg11[%c0_55, %c0_56], %114 {strides = array<i32>} : memref<8x256xf32, #tpu.memory_space<vmem>>, vector<8x128xf32>,
    %c0_57 = arith.constant 0 : index
    %c0_58 = arith.constant 0 : index
    %116 = vector.load %arg7[%c0_57, %c0_58] : memref<128x16xbf16, #tpu.memory_space<vmem>>, vector<128x16xbf16>
    %c0_59 = arith.constant 0 : index
    %c0_60 = arith.constant 0 : index
    %117 = vector.load %arg8[%c0_59, %c0_60] : memref<1x16xf32, #tpu.memory_space<vmem>>, vector<1x16xf32>
    %c0_61 = arith.constant 0 : index
    %c0_62 = arith.constant 0 : index
    %118 = vector.load %arg9[%c0_61, %c0_62] : memref<16x128xbf16, #tpu.memory_space<vmem>>, vector<16x128xbf16>
    %c0_63 = arith.constant 0 : index
    %c0_64 = arith.constant 0 : index
    %119 = vector.load %arg10[%c0_63, %c0_64] : memref<1x128xf32, #tpu.memory_space<vmem>>, vector<1x128xf32>
    %c0_65 = arith.constant 0 : index
    %c0_66 = arith.constant 0 : index
    %c0_67 = arith.constant 0 : index
    %120 = vector.load %arg6[%c0_65, %c0_66, %c0_67] : memref<16x8x128xbf16, #tpu.memory_space<vmem>>, vector<1x8x128xbf16>
    %121 = vector.shape_cast %120 : vector<1x8x128xbf16> to vector<8x128xbf16>
    %cst_68 = arith.constant dense<0.000000e+00> : vector<8x16xf32>
    %122 = tpu.matmul %121, %116, %cst_68 {dimension_numbers = #tpu.dot_dimension_numbers<[1], [0], [0], [1], [0, 0, 1, 1], [], []>} : vector<8x128xbf16>, vector<128x16xbf16>, vector<8x16xf32> -> vector<8x16xf32>
    %123 = vector.broadcast %117 : vector<1x16xf32> to vector<8x16xf32>
    %124 = arith.addf %122, %123 : vector<8x16xf32>
    %cst_69 = arith.constant 0.000000e+00 : f32
    %125 = vector.broadcast %cst_69 : f32 to vector<8x16xf32>
    %126 = arith.maximumf %124, %125 : vector<8x16xf32>
    %127 = arith.truncf %126 : vector<8x16xf32> to vector<8x16xbf16>
    %cst_70 = arith.constant dense<0.000000e+00> : vector<8x128xf32>
    %128 = tpu.matmul %127, %118, %cst_70 {dimension_numbers = #tpu.dot_dimension_numbers<[1], [0], [0], [1], [0, 0, 1, 1], [], []>} : vector<8x16xbf16>, vector<16x128xbf16>, vector<8x128xf32> -> vector<8x128xf32>
    %129 = vector.broadcast %119 : vector<1x128xf32> to vector<8x128xf32>
    %130 = arith.addf %128, %129 : vector<8x128xf32>
    %cst_71 = arith.constant 0.000000e+00 : f32
    %131 = vector.broadcast %cst_71 : f32 to vector<8x128xf32>
    %132 = arith.maximumf %130, %131 : vector<8x128xf32>
    %c1_72 = arith.constant 1 : index
    %c0_73 = arith.constant 0 : index
    %c0_74 = arith.constant 0 : index
    %133 = vector.load %arg6[%c1_72, %c0_73, %c0_74] : memref<16x8x128xbf16, #tpu.memory_space<vmem>>, vector<1x8x128xbf16>
    %134 = vector.shape_cast %133 : vector<1x8x128xbf16> to vector<8x128xbf16>
    %cst_75 = arith.constant dense<0.000000e+00> : vector<8x16xf32>
    %135 = tpu.matmul %134, %116, %cst_75 {dimension_numbers = #tpu.dot_dimension_numbers<[1], [0], [0], [1], [0, 0, 1, 1], [], []>} : vector<8x128xbf16>, vector<128x16xbf16>, vector<8x16xf32> -> vector<8x16xf32>
    %136 = vector.broadcast %117 : vector<1x16xf32> to vector<8x16xf32>
    %137 = arith.addf %135, %136 : vector<8x16xf32>
    %cst_76 = arith.constant 0.000000e+00 : f32
    %138 = vector.broadcast %cst_76 : f32 to vector<8x16xf32>
    %139 = arith.maximumf %137, %138 : vector<8x16xf32>
    %140 = arith.truncf %139 : vector<8x16xf32> to vector<8x16xbf16>
    %cst_77 = arith.constant dense<0.000000e+00> : vector<8x128xf32>
    %141 = tpu.matmul %140, %118, %cst_77 {dimension_numbers = #tpu.dot_dimension_numbers<[1], [0], [0], [1], [0, 0, 1, 1], [], []>} : vector<8x16xbf16>, vector<16x128xbf16>, vector<8x128xf32> -> vector<8x128xf32>
    %142 = vector.broadcast %119 : vector<1x128xf32> to vector<8x128xf32>
    %143 = arith.addf %141, %142 : vector<8x128xf32>
    %cst_78 = arith.constant 0.000000e+00 : f32
    %144 = vector.broadcast %cst_78 : f32 to vector<8x128xf32>
    %145 = arith.maximumf %143, %144 : vector<8x128xf32>
    %146 = arith.maximumf %132, %145 : vector<8x128xf32>
    %c2_79 = arith.constant 2 : index
    %c0_80 = arith.constant 0 : index
    %c0_81 = arith.constant 0 : index
    %147 = vector.load %arg6[%c2_79, %c0_80, %c0_81] : memref<16x8x128xbf16, #tpu.memory_space<vmem>>, vector<1x8x128xbf16>
    %148 = vector.shape_cast %147 : vector<1x8x128xbf16> to vector<8x128xbf16>
    %cst_82 = arith.constant dense<0.000000e+00> : vector<8x16xf32>
    %149 = tpu.matmul %148, %116, %cst_82 {dimension_numbers = #tpu.dot_dimension_numbers<[1], [0], [0], [1], [0, 0, 1, 1], [], []>} : vector<8x128xbf16>, vector<128x16xbf16>, vector<8x16xf32> -> vector<8x16xf32>
    %150 = vector.broadcast %117 : vector<1x16xf32> to vector<8x16xf32>
    %151 = arith.addf %149, %150 : vector<8x16xf32>
    %cst_83 = arith.constant 0.000000e+00 : f32
    %152 = vector.broadcast %cst_83 : f32 to vector<8x16xf32>
    %153 = arith.maximumf %151, %152 : vector<8x16xf32>
    %154 = arith.truncf %153 : vector<8x16xf32> to vector<8x16xbf16>
    %cst_84 = arith.constant dense<0.000000e+00> : vector<8x128xf32>
    %155 = tpu.matmul %154, %118, %cst_84 {dimension_numbers = #tpu.dot_dimension_numbers<[1], [0], [0], [1], [0, 0, 1, 1], [], []>} : vector<8x16xbf16>, vector<16x128xbf16>, vector<8x128xf32> -> vector<8x128xf32>
    %156 = vector.broadcast %119 : vector<1x128xf32> to vector<8x128xf32>
    %157 = arith.addf %155, %156 : vector<8x128xf32>
    %cst_85 = arith.constant 0.000000e+00 : f32
    %158 = vector.broadcast %cst_85 : f32 to vector<8x128xf32>
    %159 = arith.maximumf %157, %158 : vector<8x128xf32>
    %160 = arith.maximumf %146, %159 : vector<8x128xf32>
    %c3_86 = arith.constant 3 : index
    %c0_87 = arith.constant 0 : index
    %c0_88 = arith.constant 0 : index
    %161 = vector.load %arg6[%c3_86, %c0_87, %c0_88] : memref<16x8x128xbf16, #tpu.memory_space<vmem>>, vector<1x8x128xbf16>
    %162 = vector.shape_cast %161 : vector<1x8x128xbf16> to vector<8x128xbf16>
    %cst_89 = arith.constant dense<0.000000e+00> : vector<8x16xf32>
    %163 = tpu.matmul %162, %116, %cst_89 {dimension_numbers = #tpu.dot_dimension_numbers<[1], [0], [0], [1], [0, 0, 1, 1], [], []>} : vector<8x128xbf16>, vector<128x16xbf16>, vector<8x16xf32> -> vector<8x16xf32>
    %164 = vector.broadcast %117 : vector<1x16xf32> to vector<8x16xf32>
    %165 = arith.addf %163, %164 : vector<8x16xf32>
    %cst_90 = arith.constant 0.000000e+00 : f32
    %166 = vector.broadcast %cst_90 : f32 to vector<8x16xf32>
    %167 = arith.maximumf %165, %166 : vector<8x16xf32>
    %168 = arith.truncf %167 : vector<8x16xf32> to vector<8x16xbf16>
    %cst_91 = arith.constant dense<0.000000e+00> : vector<8x128xf32>
    %169 = tpu.matmul %168, %118, %cst_91 {dimension_numbers = #tpu.dot_dimension_numbers<[1], [0], [0], [1], [0, 0, 1, 1], [], []>} : vector<8x16xbf16>, vector<16x128xbf16>, vector<8x128xf32> -> vector<8x128xf32>
    %170 = vector.broadcast %119 : vector<1x128xf32> to vector<8x128xf32>
    %171 = arith.addf %169, %170 : vector<8x128xf32>
    %cst_92 = arith.constant 0.000000e+00 : f32
    %172 = vector.broadcast %cst_92 : f32 to vector<8x128xf32>
    %173 = arith.maximumf %171, %172 : vector<8x128xf32>
    %174 = arith.maximumf %160, %173 : vector<8x128xf32>
    %c4_93 = arith.constant 4 : index
    %c0_94 = arith.constant 0 : index
    %c0_95 = arith.constant 0 : index
    %175 = vector.load %arg6[%c4_93, %c0_94, %c0_95] : memref<16x8x128xbf16, #tpu.memory_space<vmem>>, vector<1x8x128xbf16>
    %176 = vector.shape_cast %175 : vector<1x8x128xbf16> to vector<8x128xbf16>
    %cst_96 = arith.constant dense<0.000000e+00> : vector<8x16xf32>
    %177 = tpu.matmul %176, %116, %cst_96 {dimension_numbers = #tpu.dot_dimension_numbers<[1], [0], [0], [1], [0, 0, 1, 1], [], []>} : vector<8x128xbf16>, vector<128x16xbf16>, vector<8x16xf32> -> vector<8x16xf32>
    %178 = vector.broadcast %117 : vector<1x16xf32> to vector<8x16xf32>
    %179 = arith.addf %177, %178 : vector<8x16xf32>
    %cst_97 = arith.constant 0.000000e+00 : f32
    %180 = vector.broadcast %cst_97 : f32 to vector<8x16xf32>
    %181 = arith.maximumf %179, %180 : vector<8x16xf32>
    %182 = arith.truncf %181 : vector<8x16xf32> to vector<8x16xbf16>
    %cst_98 = arith.constant dense<0.000000e+00> : vector<8x128xf32>
    %183 = tpu.matmul %182, %118, %cst_98 {dimension_numbers = #tpu.dot_dimension_numbers<[1], [0], [0], [1], [0, 0, 1, 1], [], []>} : vector<8x16xbf16>, vector<16x128xbf16>, vector<8x128xf32> -> vector<8x128xf32>
    %184 = vector.broadcast %119 : vector<1x128xf32> to vector<8x128xf32>
    %185 = arith.addf %183, %184 : vector<8x128xf32>
    %cst_99 = arith.constant 0.000000e+00 : f32
    %186 = vector.broadcast %cst_99 : f32 to vector<8x128xf32>
    %187 = arith.maximumf %185, %186 : vector<8x128xf32>
    %188 = arith.maximumf %174, %187 : vector<8x128xf32>
    %c5_100 = arith.constant 5 : index
    %c0_101 = arith.constant 0 : index
    %c0_102 = arith.constant 0 : index
    %189 = vector.load %arg6[%c5_100, %c0_101, %c0_102] : memref<16x8x128xbf16, #tpu.memory_space<vmem>>, vector<1x8x128xbf16>
    %190 = vector.shape_cast %189 : vector<1x8x128xbf16> to vector<8x128xbf16>
    %cst_103 = arith.constant dense<0.000000e+00> : vector<8x16xf32>
    %191 = tpu.matmul %190, %116, %cst_103 {dimension_numbers = #tpu.dot_dimension_numbers<[1], [0], [0], [1], [0, 0, 1, 1], [], []>} : vector<8x128xbf16>, vector<128x16xbf16>, vector<8x16xf32> -> vector<8x16xf32>
    %192 = vector.broadcast %117 : vector<1x16xf32> to vector<8x16xf32>
    %193 = arith.addf %191, %192 : vector<8x16xf32>
    %cst_104 = arith.constant 0.000000e+00 : f32
    %194 = vector.broadcast %cst_104 : f32 to vector<8x16xf32>
    %195 = arith.maximumf %193, %194 : vector<8x16xf32>
    %196 = arith.truncf %195 : vector<8x16xf32> to vector<8x16xbf16>
    %cst_105 = arith.constant dense<0.000000e+00> : vector<8x128xf32>
    %197 = tpu.matmul %196, %118, %cst_105 {dimension_numbers = #tpu.dot_dimension_numbers<[1], [0], [0], [1], [0, 0, 1, 1], [], []>} : vector<8x16xbf16>, vector<16x128xbf16>, vector<8x128xf32> -> vector<8x128xf32>
    %198 = vector.broadcast %119 : vector<1x128xf32> to vector<8x128xf32>
    %199 = arith.addf %197, %198 : vector<8x128xf32>
    %cst_106 = arith.constant 0.000000e+00 : f32
    %200 = vector.broadcast %cst_106 : f32 to vector<8x128xf32>
    %201 = arith.maximumf %199, %200 : vector<8x128xf32>
    %202 = arith.maximumf %188, %201 : vector<8x128xf32>
    %c6_107 = arith.constant 6 : index
    %c0_108 = arith.constant 0 : index
    %c0_109 = arith.constant 0 : index
    %203 = vector.load %arg6[%c6_107, %c0_108, %c0_109] : memref<16x8x128xbf16, #tpu.memory_space<vmem>>, vector<1x8x128xbf16>
    %204 = vector.shape_cast %203 : vector<1x8x128xbf16> to vector<8x128xbf16>
    %cst_110 = arith.constant dense<0.000000e+00> : vector<8x16xf32>
    %205 = tpu.matmul %204, %116, %cst_110 {dimension_numbers = #tpu.dot_dimension_numbers<[1], [0], [0], [1], [0, 0, 1, 1], [], []>} : vector<8x128xbf16>, vector<128x16xbf16>, vector<8x16xf32> -> vector<8x16xf32>
    %206 = vector.broadcast %117 : vector<1x16xf32> to vector<8x16xf32>
    %207 = arith.addf %205, %206 : vector<8x16xf32>
    %cst_111 = arith.constant 0.000000e+00 : f32
    %208 = vector.broadcast %cst_111 : f32 to vector<8x16xf32>
    %209 = arith.maximumf %207, %208 : vector<8x16xf32>
    %210 = arith.truncf %209 : vector<8x16xf32> to vector<8x16xbf16>
    %cst_112 = arith.constant dense<0.000000e+00> : vector<8x128xf32>
    %211 = tpu.matmul %210, %118, %cst_112 {dimension_numbers = #tpu.dot_dimension_numbers<[1], [0], [0], [1], [0, 0, 1, 1], [], []>} : vector<8x16xbf16>, vector<16x128xbf16>, vector<8x128xf32> -> vector<8x128xf32>
    %212 = vector.broadcast %119 : vector<1x128xf32> to vector<8x128xf32>
    %213 = arith.addf %211, %212 : vector<8x128xf32>
    %cst_113 = arith.constant 0.000000e+00 : f32
    %214 = vector.broadcast %cst_113 : f32 to vector<8x128xf32>
    %215 = arith.maximumf %213, %214 : vector<8x128xf32>
    %216 = arith.maximumf %202, %215 : vector<8x128xf32>
    %c7_114 = arith.constant 7 : index
    %c0_115 = arith.constant 0 : index
    %c0_116 = arith.constant 0 : index
    %217 = vector.load %arg6[%c7_114, %c0_115, %c0_116] : memref<16x8x128xbf16, #tpu.memory_space<vmem>>, vector<1x8x128xbf16>
    %218 = vector.shape_cast %217 : vector<1x8x128xbf16> to vector<8x128xbf16>
    %cst_117 = arith.constant dense<0.000000e+00> : vector<8x16xf32>
    %219 = tpu.matmul %218, %116, %cst_117 {dimension_numbers = #tpu.dot_dimension_numbers<[1], [0], [0], [1], [0, 0, 1, 1], [], []>} : vector<8x128xbf16>, vector<128x16xbf16>, vector<8x16xf32> -> vector<8x16xf32>
    %220 = vector.broadcast %117 : vector<1x16xf32> to vector<8x16xf32>
    %221 = arith.addf %219, %220 : vector<8x16xf32>
    %cst_118 = arith.constant 0.000000e+00 : f32
    %222 = vector.broadcast %cst_118 : f32 to vector<8x16xf32>
    %223 = arith.maximumf %221, %222 : vector<8x16xf32>
    %224 = arith.truncf %223 : vector<8x16xf32> to vector<8x16xbf16>
    %cst_119 = arith.constant dense<0.000000e+00> : vector<8x128xf32>
    %225 = tpu.matmul %224, %118, %cst_119 {dimension_numbers = #tpu.dot_dimension_numbers<[1], [0], [0], [1], [0, 0, 1, 1], [], []>} : vector<8x16xbf16>, vector<16x128xbf16>, vector<8x128xf32> -> vector<8x128xf32>
    %226 = vector.broadcast %119 : vector<1x128xf32> to vector<8x128xf32>
    %227 = arith.addf %225, %226 : vector<8x128xf32>
    %cst_120 = arith.constant 0.000000e+00 : f32
    %228 = vector.broadcast %cst_120 : f32 to vector<8x128xf32>
    %229 = arith.maximumf %227, %228 : vector<8x128xf32>
    %230 = arith.maximumf %216, %229 : vector<8x128xf32>
    %c8 = arith.constant 8 : index
    %c0_121 = arith.constant 0 : index
    %c0_122 = arith.constant 0 : index
    %231 = vector.load %arg6[%c8, %c0_121, %c0_122] : memref<16x8x128xbf16, #tpu.memory_space<vmem>>, vector<1x8x128xbf16>
    %232 = vector.shape_cast %231 : vector<1x8x128xbf16> to vector<8x128xbf16>
    %cst_123 = arith.constant dense<0.000000e+00> : vector<8x16xf32>
    %233 = tpu.matmul %232, %116, %cst_123 {dimension_numbers = #tpu.dot_dimension_numbers<[1], [0], [0], [1], [0, 0, 1, 1], [], []>} : vector<8x128xbf16>, vector<128x16xbf16>, vector<8x16xf32> -> vector<8x16xf32>
    %234 = vector.broadcast %117 : vector<1x16xf32> to vector<8x16xf32>
    %235 = arith.addf %233, %234 : vector<8x16xf32>
    %cst_124 = arith.constant 0.000000e+00 : f32
    %236 = vector.broadcast %cst_124 : f32 to vector<8x16xf32>
    %237 = arith.maximumf %235, %236 : vector<8x16xf32>
    %238 = arith.truncf %237 : vector<8x16xf32> to vector<8x16xbf16>
    %cst_125 = arith.constant dense<0.000000e+00> : vector<8x128xf32>
    %239 = tpu.matmul %238, %118, %cst_125 {dimension_numbers = #tpu.dot_dimension_numbers<[1], [0], [0], [1], [0, 0, 1, 1], [], []>} : vector<8x16xbf16>, vector<16x128xbf16>, vector<8x128xf32> -> vector<8x128xf32>
    %240 = vector.broadcast %119 : vector<1x128xf32> to vector<8x128xf32>
    %241 = arith.addf %239, %240 : vector<8x128xf32>
    %cst_126 = arith.constant 0.000000e+00 : f32
    %242 = vector.broadcast %cst_126 : f32 to vector<8x128xf32>
    %243 = arith.maximumf %241, %242 : vector<8x128xf32>
    %244 = arith.maximumf %230, %243 : vector<8x128xf32>
    %c9 = arith.constant 9 : index
    %c0_127 = arith.constant 0 : index
    %c0_128 = arith.constant 0 : index
    %245 = vector.load %arg6[%c9, %c0_127, %c0_128] : memref<16x8x128xbf16, #tpu.memory_space<vmem>>, vector<1x8x128xbf16>
    %246 = vector.shape_cast %245 : vector<1x8x128xbf16> to vector<8x128xbf16>
    %cst_129 = arith.constant dense<0.000000e+00> : vector<8x16xf32>
    %247 = tpu.matmul %246, %116, %cst_129 {dimension_numbers = #tpu.dot_dimension_numbers<[1], [0], [0], [1], [0, 0, 1, 1], [], []>} : vector<8x128xbf16>, vector<128x16xbf16>, vector<8x16xf32> -> vector<8x16xf32>
    %248 = vector.broadcast %117 : vector<1x16xf32> to vector<8x16xf32>
    %249 = arith.addf %247, %248 : vector<8x16xf32>
    %cst_130 = arith.constant 0.000000e+00 : f32
    %250 = vector.broadcast %cst_130 : f32 to vector<8x16xf32>
    %251 = arith.maximumf %249, %250 : vector<8x16xf32>
    %252 = arith.truncf %251 : vector<8x16xf32> to vector<8x16xbf16>
    %cst_131 = arith.constant dense<0.000000e+00> : vector<8x128xf32>
    %253 = tpu.matmul %252, %118, %cst_131 {dimension_numbers = #tpu.dot_dimension_numbers<[1], [0], [0], [1], [0, 0, 1, 1], [], []>} : vector<8x16xbf16>, vector<16x128xbf16>, vector<8x128xf32> -> vector<8x128xf32>
    %254 = vector.broadcast %119 : vector<1x128xf32> to vector<8x128xf32>
    %255 = arith.addf %253, %254 : vector<8x128xf32>
    %cst_132 = arith.constant 0.000000e+00 : f32
    %256 = vector.broadcast %cst_132 : f32 to vector<8x128xf32>
    %257 = arith.maximumf %255, %256 : vector<8x128xf32>
    %258 = arith.maximumf %244, %257 : vector<8x128xf32>
    %c10 = arith.constant 10 : index
    %c0_133 = arith.constant 0 : index
    %c0_134 = arith.constant 0 : index
    %259 = vector.load %arg6[%c10, %c0_133, %c0_134] : memref<16x8x128xbf16, #tpu.memory_space<vmem>>, vector<1x8x128xbf16>
    %260 = vector.shape_cast %259 : vector<1x8x128xbf16> to vector<8x128xbf16>
    %cst_135 = arith.constant dense<0.000000e+00> : vector<8x16xf32>
    %261 = tpu.matmul %260, %116, %cst_135 {dimension_numbers = #tpu.dot_dimension_numbers<[1], [0], [0], [1], [0, 0, 1, 1], [], []>} : vector<8x128xbf16>, vector<128x16xbf16>, vector<8x16xf32> -> vector<8x16xf32>
    %262 = vector.broadcast %117 : vector<1x16xf32> to vector<8x16xf32>
    %263 = arith.addf %261, %262 : vector<8x16xf32>
    %cst_136 = arith.constant 0.000000e+00 : f32
    %264 = vector.broadcast %cst_136 : f32 to vector<8x16xf32>
    %265 = arith.maximumf %263, %264 : vector<8x16xf32>
    %266 = arith.truncf %265 : vector<8x16xf32> to vector<8x16xbf16>
    %cst_137 = arith.constant dense<0.000000e+00> : vector<8x128xf32>
    %267 = tpu.matmul %266, %118, %cst_137 {dimension_numbers = #tpu.dot_dimension_numbers<[1], [0], [0], [1], [0, 0, 1, 1], [], []>} : vector<8x16xbf16>, vector<16x128xbf16>, vector<8x128xf32> -> vector<8x128xf32>
    %268 = vector.broadcast %119 : vector<1x128xf32> to vector<8x128xf32>
    %269 = arith.addf %267, %268 : vector<8x128xf32>
    %cst_138 = arith.constant 0.000000e+00 : f32
    %270 = vector.broadcast %cst_138 : f32 to vector<8x128xf32>
    %271 = arith.maximumf %269, %270 : vector<8x128xf32>
    %272 = arith.maximumf %258, %271 : vector<8x128xf32>
    %c11 = arith.constant 11 : index
    %c0_139 = arith.constant 0 : index
    %c0_140 = arith.constant 0 : index
    %273 = vector.load %arg6[%c11, %c0_139, %c0_140] : memref<16x8x128xbf16, #tpu.memory_space<vmem>>, vector<1x8x128xbf16>
    %274 = vector.shape_cast %273 : vector<1x8x128xbf16> to vector<8x128xbf16>
    %cst_141 = arith.constant dense<0.000000e+00> : vector<8x16xf32>
    %275 = tpu.matmul %274, %116, %cst_141 {dimension_numbers = #tpu.dot_dimension_numbers<[1], [0], [0], [1], [0, 0, 1, 1], [], []>} : vector<8x128xbf16>, vector<128x16xbf16>, vector<8x16xf32> -> vector<8x16xf32>
    %276 = vector.broadcast %117 : vector<1x16xf32> to vector<8x16xf32>
    %277 = arith.addf %275, %276 : vector<8x16xf32>
    %cst_142 = arith.constant 0.000000e+00 : f32
    %278 = vector.broadcast %cst_142 : f32 to vector<8x16xf32>
    %279 = arith.maximumf %277, %278 : vector<8x16xf32>
    %280 = arith.truncf %279 : vector<8x16xf32> to vector<8x16xbf16>
    %cst_143 = arith.constant dense<0.000000e+00> : vector<8x128xf32>
    %281 = tpu.matmul %280, %118, %cst_143 {dimension_numbers = #tpu.dot_dimension_numbers<[1], [0], [0], [1], [0, 0, 1, 1], [], []>} : vector<8x16xbf16>, vector<16x128xbf16>, vector<8x128xf32> -> vector<8x128xf32>
    %282 = vector.broadcast %119 : vector<1x128xf32> to vector<8x128xf32>
    %283 = arith.addf %281, %282 : vector<8x128xf32>
    %cst_144 = arith.constant 0.000000e+00 : f32
    %284 = vector.broadcast %cst_144 : f32 to vector<8x128xf32>
    %285 = arith.maximumf %283, %284 : vector<8x128xf32>
    %286 = arith.maximumf %272, %285 : vector<8x128xf32>
    %c12 = arith.constant 12 : index
    %c0_145 = arith.constant 0 : index
    %c0_146 = arith.constant 0 : index
    %287 = vector.load %arg6[%c12, %c0_145, %c0_146] : memref<16x8x128xbf16, #tpu.memory_space<vmem>>, vector<1x8x128xbf16>
    %288 = vector.shape_cast %287 : vector<1x8x128xbf16> to vector<8x128xbf16>
    %cst_147 = arith.constant dense<0.000000e+00> : vector<8x16xf32>
    %289 = tpu.matmul %288, %116, %cst_147 {dimension_numbers = #tpu.dot_dimension_numbers<[1], [0], [0], [1], [0, 0, 1, 1], [], []>} : vector<8x128xbf16>, vector<128x16xbf16>, vector<8x16xf32> -> vector<8x16xf32>
    %290 = vector.broadcast %117 : vector<1x16xf32> to vector<8x16xf32>
    %291 = arith.addf %289, %290 : vector<8x16xf32>
    %cst_148 = arith.constant 0.000000e+00 : f32
    %292 = vector.broadcast %cst_148 : f32 to vector<8x16xf32>
    %293 = arith.maximumf %291, %292 : vector<8x16xf32>
    %294 = arith.truncf %293 : vector<8x16xf32> to vector<8x16xbf16>
    %cst_149 = arith.constant dense<0.000000e+00> : vector<8x128xf32>
    %295 = tpu.matmul %294, %118, %cst_149 {dimension_numbers = #tpu.dot_dimension_numbers<[1], [0], [0], [1], [0, 0, 1, 1], [], []>} : vector<8x16xbf16>, vector<16x128xbf16>, vector<8x128xf32> -> vector<8x128xf32>
    %296 = vector.broadcast %119 : vector<1x128xf32> to vector<8x128xf32>
    %297 = arith.addf %295, %296 : vector<8x128xf32>
    %cst_150 = arith.constant 0.000000e+00 : f32
    %298 = vector.broadcast %cst_150 : f32 to vector<8x128xf32>
    %299 = arith.maximumf %297, %298 : vector<8x128xf32>
    %300 = arith.maximumf %286, %299 : vector<8x128xf32>
    %c13 = arith.constant 13 : index
    %c0_151 = arith.constant 0 : index
    %c0_152 = arith.constant 0 : index
    %301 = vector.load %arg6[%c13, %c0_151, %c0_152] : memref<16x8x128xbf16, #tpu.memory_space<vmem>>, vector<1x8x128xbf16>
    %302 = vector.shape_cast %301 : vector<1x8x128xbf16> to vector<8x128xbf16>
    %cst_153 = arith.constant dense<0.000000e+00> : vector<8x16xf32>
    %303 = tpu.matmul %302, %116, %cst_153 {dimension_numbers = #tpu.dot_dimension_numbers<[1], [0], [0], [1], [0, 0, 1, 1], [], []>} : vector<8x128xbf16>, vector<128x16xbf16>, vector<8x16xf32> -> vector<8x16xf32>
    %304 = vector.broadcast %117 : vector<1x16xf32> to vector<8x16xf32>
    %305 = arith.addf %303, %304 : vector<8x16xf32>
    %cst_154 = arith.constant 0.000000e+00 : f32
    %306 = vector.broadcast %cst_154 : f32 to vector<8x16xf32>
    %307 = arith.maximumf %305, %306 : vector<8x16xf32>
    %308 = arith.truncf %307 : vector<8x16xf32> to vector<8x16xbf16>
    %cst_155 = arith.constant dense<0.000000e+00> : vector<8x128xf32>
    %309 = tpu.matmul %308, %118, %cst_155 {dimension_numbers = #tpu.dot_dimension_numbers<[1], [0], [0], [1], [0, 0, 1, 1], [], []>} : vector<8x16xbf16>, vector<16x128xbf16>, vector<8x128xf32> -> vector<8x128xf32>
    %310 = vector.broadcast %119 : vector<1x128xf32> to vector<8x128xf32>
    %311 = arith.addf %309, %310 : vector<8x128xf32>
    %cst_156 = arith.constant 0.000000e+00 : f32
    %312 = vector.broadcast %cst_156 : f32 to vector<8x128xf32>
    %313 = arith.maximumf %311, %312 : vector<8x128xf32>
    %314 = arith.maximumf %300, %313 : vector<8x128xf32>
    %c14 = arith.constant 14 : index
    %c0_157 = arith.constant 0 : index
    %c0_158 = arith.constant 0 : index
    %315 = vector.load %arg6[%c14, %c0_157, %c0_158] : memref<16x8x128xbf16, #tpu.memory_space<vmem>>, vector<1x8x128xbf16>
    %316 = vector.shape_cast %315 : vector<1x8x128xbf16> to vector<8x128xbf16>
    %cst_159 = arith.constant dense<0.000000e+00> : vector<8x16xf32>
    %317 = tpu.matmul %316, %116, %cst_159 {dimension_numbers = #tpu.dot_dimension_numbers<[1], [0], [0], [1], [0, 0, 1, 1], [], []>} : vector<8x128xbf16>, vector<128x16xbf16>, vector<8x16xf32> -> vector<8x16xf32>
    %318 = vector.broadcast %117 : vector<1x16xf32> to vector<8x16xf32>
    %319 = arith.addf %317, %318 : vector<8x16xf32>
    %cst_160 = arith.constant 0.000000e+00 : f32
    %320 = vector.broadcast %cst_160 : f32 to vector<8x16xf32>
    %321 = arith.maximumf %319, %320 : vector<8x16xf32>
    %322 = arith.truncf %321 : vector<8x16xf32> to vector<8x16xbf16>
    %cst_161 = arith.constant dense<0.000000e+00> : vector<8x128xf32>
    %323 = tpu.matmul %322, %118, %cst_161 {dimension_numbers = #tpu.dot_dimension_numbers<[1], [0], [0], [1], [0, 0, 1, 1], [], []>} : vector<8x16xbf16>, vector<16x128xbf16>, vector<8x128xf32> -> vector<8x128xf32>
    %324 = vector.broadcast %119 : vector<1x128xf32> to vector<8x128xf32>
    %325 = arith.addf %323, %324 : vector<8x128xf32>
    %cst_162 = arith.constant 0.000000e+00 : f32
    %326 = vector.broadcast %cst_162 : f32 to vector<8x128xf32>
    %327 = arith.maximumf %325, %326 : vector<8x128xf32>
    %328 = arith.maximumf %314, %327 : vector<8x128xf32>
    %c15 = arith.constant 15 : index
    %c0_163 = arith.constant 0 : index
    %c0_164 = arith.constant 0 : index
    %329 = vector.load %arg6[%c15, %c0_163, %c0_164] : memref<16x8x128xbf16, #tpu.memory_space<vmem>>, vector<1x8x128xbf16>
    %330 = vector.shape_cast %329 : vector<1x8x128xbf16> to vector<8x128xbf16>
    %cst_165 = arith.constant dense<0.000000e+00> : vector<8x16xf32>
    %331 = tpu.matmul %330, %116, %cst_165 {dimension_numbers = #tpu.dot_dimension_numbers<[1], [0], [0], [1], [0, 0, 1, 1], [], []>} : vector<8x128xbf16>, vector<128x16xbf16>, vector<8x16xf32> -> vector<8x16xf32>
    %332 = vector.broadcast %117 : vector<1x16xf32> to vector<8x16xf32>
    %333 = arith.addf %331, %332 : vector<8x16xf32>
    %cst_166 = arith.constant 0.000000e+00 : f32
    %334 = vector.broadcast %cst_166 : f32 to vector<8x16xf32>
    %335 = arith.maximumf %333, %334 : vector<8x16xf32>
    %336 = arith.truncf %335 : vector<8x16xf32> to vector<8x16xbf16>
    %cst_167 = arith.constant dense<0.000000e+00> : vector<8x128xf32>
    %337 = tpu.matmul %336, %118, %cst_167 {dimension_numbers = #tpu.dot_dimension_numbers<[1], [0], [0], [1], [0, 0, 1, 1], [], []>} : vector<8x16xbf16>, vector<16x128xbf16>, vector<8x128xf32> -> vector<8x128xf32>
    %338 = vector.broadcast %119 : vector<1x128xf32> to vector<8x128xf32>
    %339 = arith.addf %337, %338 : vector<8x128xf32>
    %cst_168 = arith.constant 0.000000e+00 : f32
    %340 = vector.broadcast %cst_168 : f32 to vector<8x128xf32>
    %341 = arith.maximumf %339, %340 : vector<8x128xf32>
    %342 = arith.maximumf %328, %341 : vector<8x128xf32>
    %c0_169 = arith.constant 0 : index
    %c128 = arith.constant 128 : index
    %343 = vector.load %arg11[%c0_169, %c128] : memref<8x256xf32, #tpu.memory_space<vmem>>, vector<8x128xf32>
    tpu.vector_store %arg11[%c0_169, %c128], %342 {strides = array<i32>} : memref<8x256xf32, #tpu.memory_space<vmem>>, vector<8x128xf32>,
    return
  }
  func.func @transform_0(%arg0: i32) -> (i32, i32, i32) {
    %c0_i32 = arith.constant 0 : i32
    %c0_i32_0 = arith.constant 0 : i32
    %c0_i32_1 = arith.constant 0 : i32
    return %c0_i32, %arg0, %c0_i32_0 : i32, i32, i32
  }
  func.func @transform_1(%arg0: i32) -> (i32, i32) {
    %c0_i32 = arith.constant 0 : i32
    %c0_i32_0 = arith.constant 0 : i32
    %c0_i32_1 = arith.constant 0 : i32
    return %c0_i32, %c0_i32_0 : i32, i32
  }
  func.func @transform_2(%arg0: i32) -> (i32, i32) {
    %c0_i32 = arith.constant 0 : i32
    %c0_i32_0 = arith.constant 0 : i32
    %c0_i32_1 = arith.constant 0 : i32
    return %c0_i32, %c0_i32_0 : i32, i32
  }
  func.func @transform_3(%arg0: i32) -> (i32, i32) {
    %c0_i32 = arith.constant 0 : i32
    %c0_i32_0 = arith.constant 0 : i32
    %c0_i32_1 = arith.constant 0 : i32
    return %c0_i32, %c0_i32_0 : i32, i32
  }
  func.func @transform_4(%arg0: i32) -> (i32, i32) {
    %c0_i32 = arith.constant 0 : i32
    %c0_i32_0 = arith.constant 0 : i32
    %c0_i32_1 = arith.constant 0 : i32
    return %c0_i32, %c0_i32_0 : i32, i32
  }
  func.func @transform_5(%arg0: i32) -> (i32, i32, i32) {
    %c0_i32 = arith.constant 0 : i32
    %c0_i32_0 = arith.constant 0 : i32
    %c0_i32_1 = arith.constant 0 : i32
    return %c0_i32, %arg0, %c0_i32_0 : i32, i32, i32
  }
  func.func @transform_6(%arg0: i32) -> (i32, i32) {
    %c0_i32 = arith.constant 0 : i32
    %c0_i32_0 = arith.constant 0 : i32
    %c0_i32_1 = arith.constant 0 : i32
    return %c0_i32, %c0_i32_0 : i32, i32
  }
  func.func @transform_7(%arg0: i32) -> (i32, i32) {
    %c0_i32 = arith.constant 0 : i32
    %c0_i32_0 = arith.constant 0 : i32
    %c0_i32_1 = arith.constant 0 : i32
    return %c0_i32, %c0_i32_0 : i32, i32
  }
  func.func @transform_8(%arg0: i32) -> (i32, i32) {
    %c0_i32 = arith.constant 0 : i32
    %c0_i32_0 = arith.constant 0 : i32
    %c0_i32_1 = arith.constant 0 : i32
    return %c0_i32, %c0_i32_0 : i32, i32
  }
  func.func @transform_9(%arg0: i32) -> (i32, i32) {
    %c0_i32 = arith.constant 0 : i32
    %c0_i32_0 = arith.constant 0 : i32
    %c0_i32_1 = arith.constant 0 : i32
    return %c0_i32, %c0_i32_0 : i32, i32
  }
  func.func @transform_10(%arg0: i32) -> (i32, i32) {
    %c0_i32 = arith.constant 0 : i32
    %c0_i32_0 = arith.constant 0 : i32
    return %arg0, %c0_i32 : i32, i32
  }
}

</mosaic_0001>

<bundles_post_ra>
// kernel: tpu_custom_call.1
= control target key start
LH: loop header
LB: loop body
LE: loop exit
PB: predicated region body
PF: predicated region fallthrough
CT: control target
= control target key end

     0   :  { %s4993_s0 = inlined_call_operand.vmem [shape: bf16[8,32,128], index: 0, kind: input, shape index: {}]   ;;  %s4994_s1 = inlined_call_operand.vmem [shape: bf16[128,16], index: 1, kind: input, shape index: {}]   ;;  %s4995_s2 = inlined_call_operand.vmem [shape: f32[1,16], index: 2, kind: input, shape index: {}]   ;;  %s4996_s3 = inlined_call_operand.vmem [shape: bf16[16,128], index: 3, kind: input, shape index: {}]   ;;  %s4997_s4 = inlined_call_operand.vmem [shape: f32[1,128], index: 4, kind: input, shape index: {}]   ;;  %s4998_s5 = inlined_call_operand.hbm [shape: bf16[16,32,128], index: 5, kind: input, shape index: {}]   ;;  %s4999_s6 = inlined_call_operand.vmem [shape: bf16[128,16], index: 6, kind: input, shape index: {}]   ;;  %s5000_s7 = inlined_call_operand.vmem [shape: f32[1,16], index: 7, kind: input, shape index: {}]   ;;  %s5001_s8 = inlined_call_operand.vmem [shape: bf16[16,128], index: 8, kind: input, shape index: {}]   ;;  %s5002_s9 = inlined_call_operand.vmem [shape: f32[1,128], index: 9, kind: input, shape index: {}]   ;;  %s5003_s10 = inlined_call_operand.hbm [shape: f32[32,256], index: 10, kind: output, shape index: {}]  }
   0x1   :  { %5006 = sst [smem:[#allocation11_spill]] %s4993_s0 }
   0x2   :  { %15 = vsyncpa [#allocation4], 0 }
   0x3   :  { %17 = vsyncpa [#allocation4 + $0x1], 0 }
   0x4   :  { %18 = vsyncpa [#allocation5], 0 }
   0x5   :  { %20 = vsyncpa [#allocation5 + $0x1], 0  ;;  %s4082_s13 = smov 0   ;;  %s4084_s14 = smov 0  }
   0x6   :  { %s4086_s15 = smov 0   ;;  %s4088_s16 = smov 0  }
   0x7 LB: > { %5007 = sst [smem:[#allocation9_spill]] %s4014_s15  ;;  %s4103_s17 = sadd.s32 4294967295, %s4018_s16   ;;  %s4018_s16 = sphi %s4088_s16, %s5020_s16   ;;  %s4014_s15 = sphi %s4086_s15, %s5017_s15   ;;  %s4010_s14 = sphi %s4084_s14, %s5019_s14   ;;  %s4006_s13 = sphi %s4082_s13, %s5018_s13  }
   0x8   : > { %s2877_s18 = sadd.s32 4294967294, %s4018_s16   ;;  %s4107_s19 = sadd.s32 1, %s4018_s16  }
   0x9   : > { %s33_s20 = sadd.s32 1, %s4014_s15  ;;  %s30_s21 = ssub.s32 %s4018_s16, %s4107_s19 }
   0xa   : > { %p40_p0 = scmp.ne.s32.totalorder %s4014_s15, %s4010_s14  ;;  %p31_p1 = scmp.eq.s32.totalorder %s30_s21, 0 }
   0xb   : > { %p41_p2 = scmp.eq.s32.totalorder %s4018_s16, 0  ;;  %p156_p3 = scmp.ne.s32.totalorder %s4010_s14, %s4006_s13 }
   0xc   : > { %p157_p4 = scmp.eq.s32.totalorder %s4103_s17, 0  ;;  %p264_p7 = scmp.eq.s32.totalorder %s4103_s17, 3 }
   0xd   : > { %s4119_s22 = scalar_select %p31_p1, %s4014_s15, %s33_s20  }
   0xe   : > { %p4121_p5 = por %p41_p2, %p40_p0  ;;  %p4125_p6 = por %p157_p4, %p156_p3 }
   0xf   : > { %5008 = sst [smem:[#allocation10_spill]] %s4119_s22  ;;  %p270_p8 = scmp.eq.s32.totalorder %s2877_s18, 3 }
  0x10   : > { %p4130_p9 = por %p264_p7, %p40_p0  ;;  %p2879_p11 = scmp.ge.s32.totalorder %s4018_s16, 4 }
  0x11   : > { %p4134_p10 = por %p270_p8, %p156_p3 }
  0x12   : > { %s5011_s25 = scalar_select %p4130_p9, 1, 0 }
  0x13   : > { %s5012_s26 = scalar_select %p4134_p10, 1, 0 }
  0x14   : > { %310 = sbr.rel (%p2879_p11) target bundleno = 69 (0x45), region = 48 }
  0x1b   : > { %313 = sbr.rel (!%p4121_p5) target bundleno = 42 (0x2a), region = 52  ;;  %s315_s27 = sand.u32 (%p4121_p5), 1, %s4014_s15  }
  0x1c   : > { %s2881_s28 = sshll.u32 (%p4121_p5), %s4018_s16, 2  ;;  %s2880_s29 = sshll.u32 (%p4121_p5), %s315_s27, 5 }
  0x1d   : > { %s5013_s0 = sld [smem:[#allocation11_spill]] (%p4121_p5)  ;;  %s317_s18 = scalar_lea.vmem (%p4121_p5), [#allocation2], %s2880_s29 }
  0x23   : > { %s319_s12 = scalar_lea.vmem %s5013_s0, %s2881_s28 }
  0x24   : > { %v335_v0 = vld [vmem:[%s319_s12] sm:$0xf]  ;;  %v337_v1 = vld [vmem:[%s319_s12 + $0x10] sm:$0xf] }
  0x25   : > { %336 = vst [vmem:[%s317_s18] sm:$0xf] %v335_v0  ;;  %338 = vst [vmem:[%s317_s18 + $0x4] sm:$0xf] %v337_v1  ;;  %v339_v2 = vld [vmem:[%s319_s12 + $0x20] sm:$0xf] }
  0x26   : > { %v341_v3 = vld [vmem:[%s319_s12 + $0x30] sm:$0xf]  ;;  %v343_v4 = vld [vmem:[%s319_s12 + $0x40] sm:$0xf]  ;;  %340 = vst [vmem:[%s317_s18 + $0x8] sm:$0xf] %v339_v2 }
  0x27   : > { %342 = vst [vmem:[%s317_s18 + $0xc] sm:$0xf] %v341_v3  ;;  %344 = vst [vmem:[%s317_s18 + $0x10] sm:$0xf] %v343_v4  ;;  %v345_v5 = vld [vmem:[%s319_s12 + $0x50] sm:$0xf] }
  0x28   : > { %v347_v6 = vld [vmem:[%s319_s12 + $0x60] sm:$0xf]  ;;  %v349_v7 = vld [vmem:[%s319_s12 + $0x70] sm:$0xf]  ;;  %346 = vst [vmem:[%s317_s18 + $0x14] sm:$0xf] %v345_v5 }
  0x29   : > { %348 = vst [vmem:[%s317_s18 + $0x18] sm:$0xf] %v347_v6  ;;  %350 = vst [vmem:[%s317_s18 + $0x1c] sm:$0xf] %v349_v7 }
  0x2a PF: > { %s390_s20 = sand.u32 1, %s4014_s15   ;;  %s2883_s21 = sshll.u32 %s4018_s16, 6 }
  0x2b   : > { %s2882_s27 = sshll.u32 %s390_s20, 6  ;;  %s4151_s30 = scalar_lea.hbm %s4998_s5, %s2883_s21 }
  0x2c   : > { %s394_s11 = scalar_lea.vmem [#allocation3], %s2882_s27  ;;  %s4155_s18 = scalar_lea.sflag [#allocation4], %s390_s20 }
  0x2d   : > { %s400_s12 = sshll.u32 %s394_s11, 4  ;;  %s3924_s0 = scalar_lea.hbm %s4151_s30, 1024  ;;  %s4153_s12 = int_to_ptr.vmem [resolvable:$true] %s400_s12 }
  0x2e   : > { %p3925_p12 = scmp.ne.s32.totalorder %s4151_s30, %s3924_s0  ;;  %s3928_s21 = scalar_lea.hbm %s4998_s5, 4096 }
  0x2f   : > { %p3929_p1 = scmp.lt.u32.totalorder %s4151_s30, %s4998_s5  ;;  %p3930_p2 = scmp.lt.u32.totalorder %s3928_s21, %s3924_s0 }
  0x30   : > { %p3926_p13 = pnand %p3925_p12, %p4121_p5  ;;  %p3932_p4 = scmp.lt.u32.totalorder %s3924_s0, %s4151_s30 }
  0x31   : > { %p3931_p3 = por %p3930_p2, %p3929_p1 }
  0x32   : > { %p3927_p0 = pneg %p3926_p13 }
  0x33   : > { %p3933_p7 = por %p3932_p4, %p3931_p3 }
  0x35   : > { %p3934_p8 = pnand %p3933_p7, %p3927_p0 }
  0x37   : > { %3937 = shalt.err (!%p3934_p8)
}
  0x38   : > { %s3938_s20 = scalar_lea.vmem %s4153_s12, 1024  ;;  %s4020_s15 = smov [#allocation3]  }
  0x39   : > { %p3939_p11 = scmp.ne.s32.totalorder %s4153_s12, %s3938_s20  ;;  %s3942_s22 = sshll.u32 %s4020_s15, 4  ;;  %s3943_s22 = int_to_ptr.vmem [resolvable:$false] %s3942_s22 }
  0x3a   : > { %s3944_s27 = scalar_lea.vmem %s3943_s22, 2048  ;;  %p3945_p10 = scmp.lt.s32.totalorder %s4153_s12, %s3943_s22 }
  0x3b   : > { %p3940_p12 = pnand %p3939_p11, %p4121_p5  ;;  %p3946_p9 = scmp.lt.s32.totalorder %s3944_s27, %s3938_s20 }
  0x3d   : > { %p3941_p13 = pneg %p3940_p12  ;;  %p3947_p1 = por %p3946_p9, %p3945_p10 }
  0x3f   : > { %p3948_p2 = pnand %p3947_p1, %p3941_p13 }
  0x41   : > { %3951 = shalt.err (!%p3948_p2)
}
  0x42   : > { %s4021_s0 = smov 256   ;;  %s4022_s11 = smov 64  }
  0x43   : > { %s4023_s21 = smov 4  }
  0x44   : > { %3850 = dma.hbm_to_vmem [thread:$0]  (%p4121_p5), %s4151_s30, 1024, %s4153_s12, %s4155_s18, %s4021_s0, %s4022_s11, %s4023_s21  }
  0x45 PF: > { %p2884_p0 = scmp.ge.s32.totalorder %s4018_s16, 1  ;;  %p408_p3 = scmp.lt.s32.totalorder %s4018_s16, 5 }
  0x47   : > { %p409_p4 = pnand %p2884_p0, %p408_p3 }
  0x48   : > { %s4182_s28 = sand.u32 (!%p409_p4), 1, %s4010_s14  }
  0x49   : > { %412 = sbr.rel (%p409_p4) target bundleno = 6097 (0x17d1), region = 97  ;;  %s2885_s29 = sshll.u32 (!%p409_p4), %s4182_s28, 5 }
  0x4a   : > { %s2886_s20 = sshll.u32 (!%p409_p4), %s4182_s28, 6  ;;  %s4186_s15 = scalar_lea.vmem (!%p409_p4), [#allocation2], %s2885_s29 }
  0x4b   : > { %s422_s23 = scalar_lea.sflag (!%p409_p4), [#allocation4], %s4182_s28  ;;  %s4189_s30 = scalar_lea.vmem (!%p409_p4), [#allocation3], %s2886_s20 }
  0x50   : > { %3997 = dma.done.wait (%p4125_p6), %s422_s23, 1024  }
  0x51   : > { %3999 = vsyncadd (%p4125_p6), %s422_s23, 4294966272  ;;  %v4024_v8 = vmov 0.0   ;;  %vm4025_vm0 = vmmov 0   ;;  %v4204_v9 = vld [vmem:[%s4994_s1] sm:$0xff]   ;;  %v4210_v10 = vld [vmem:[%s4994_s1 + $0x8] sm:$0xff]   ;;  %vm596_vm1 = vcmask 130048  }
  0x52   : > { %3226 = vmatprep.subr.bf16.mxu0 %v4024_v8  ;;  %3242 = vmatprep.mubr.msk.bf16.mxu0 %vm4025_vm0, %v4024_v8  ;;  %v4217_v11 = vld [vmem:[%s4994_s1 + $0x10] sm:$0xff]   ;;  %v4223_v12 = vld [vmem:[%s4994_s1 + $0x18] sm:$0xff]   ;;  %v4230_v13 = vld [vmem:[%s4994_s1 + $0x20] sm:$0xff]   ;;  %s2887_s0 = sshll.u32 %s4182_s28, 4  ;;  %s2775_s18 = scalar_lea.sflag [#allocation5], %s4182_s28 }
  0x53   : > { %3246 = vmatprep.subr.bf16.mxu1 %v4024_v8  ;;  %3248 = vmatprep.mubr.msk.bf16.mxu1 %vm4025_vm0, %v4024_v8  ;;  %v4238_v14 = vld [vmem:[%s4994_s1 + $0x28] sm:$0xff]   ;;  %v4245_v15 = vld [vmem:[%s4994_s1 + $0x30] sm:$0xff]   ;;  %v4252_v16 = vld [vmem:[%s4994_s1 + $0x38] sm:$0xff]   ;;  %s4533_s11 = scalar_lea.vmem [#allocation6], %s2887_s0  ;;  %p5014_p6 = scmp.ne.s32.totalorder %s5011_s25, 0 }
  0x54   : > { %3227 = vmatpush3.bf16.msra.mxu0 %v4204_v9  ;;  %v487_v17 = vld [vmem:[%s4186_s15] sm:$0xf]  ;;  %v2900_v27 = vld [vmem:[%s4186_s15 + $0x4] sm:$0xf]  ;;  %v2902_v28 = vld [vmem:[%s4186_s15 + $0x8] sm:$0xf] }
  0x55   : > { %3228 = vmatprep.subr.bf16.mxu0 %v4024_v8  ;;  %v4263_v18 = vld [vmem:[%s4996_s3] sm:$0xff]   ;;  %v2904_v47 = vld [vmem:[%s4186_s15 + $0xc] sm:$0xf]  ;;  %s2789_s20 = sshll.u32 %s4533_s11, 4  ;;  %s4951_s20 = int_to_ptr.vmem [resolvable:$true] %s2789_s20 }
  0x56   : > { %3247 = vmatpush3.bf16.msra.mxu1 %v4263_v18  ;;  %v4272_v19 = vld [vmem:[%s4995_s2] ss:$0 sm:$0xff]  ;;  %s3952_s24 = scalar_lea.vmem %s4951_s20, 256 }
  0x57   : > { %3252 = vmatprep.subr.bf16.mxu1 %v4024_v8  ;;  %v4352_v48 = vld [vmem:[%s4997_s4] ss:$0 sm:$0xff]  ;;  %p3953_p5 = scmp.ne.s32.totalorder %s4951_s20, %s3952_s24 }
  0x58   : > { %3229 = vmatpush3.bf16.msra.mxu0 %v4210_v10 }
  0x59   : > { %3230 = vmatprep.subr.bf16.mxu0 %v4024_v8  ;;  %p3954_p9 = pnand %p3953_p5, %p5014_p6 }
  0x5b   : > { %p3955_p10 = pneg %p3954_p9 }
  0x5c   : > { %3231 = vmatpush3.bf16.msra.mxu0 %v4217_v11 }
  0x5d   : > { %3232 = vmatprep.subr.bf16.mxu0 %v4024_v8 }
  0x60   : > { %3233 = vmatpush3.bf16.msra.mxu0 %v4223_v12 }
  0x61   : > { %3234 = vmatprep.subr.bf16.mxu0 %v4024_v8 }
  0x64   : > { %3235 = vmatpush3.bf16.msra.mxu0 %v4230_v13 }
  0x65   : > { %3236 = vmatprep.subr.bf16.mxu0 %v4024_v8 }
  0x68   : > { %3237 = vmatpush3.bf16.msra.mxu0 %v4238_v14 }
  0x69   : > { %3238 = vmatprep.subr.bf16.mxu0 %v4024_v8 }
  0x6c   : > { %3239 = vmatpush3.bf16.msra.mxu0 %v4245_v15 }
  0x6d   : > { %3240 = vmatprep.subr.bf16.mxu0 %v4024_v8 }
  0x70   : > { %3241 = vmatpush3.bf16.msra.mxu0 %v4252_v16 }
  0x71   : > { %3272 = vmatprep.subr.bf16.mxu0 %v4024_v8 }
  0x73   : > { %3243 = vmatmul.mubr.bf16.vlgmr.msra.gmra.mrb[0].mxu0 %v487_v17  ;;  %v2906_v17 = vld [vmem:[%s4186_s15 + $0x10] sm:$0xf] }
  0x74   : > { %3274 = vmatprep.mubr.msk.bf16.mxu0 %vm4025_vm0, %v4024_v8  ;;  %3273 = vmatpush3.bf16.msra.mxu0 %v4263_v18 }
  0x75   : > { %3298 = vmatprep.subr.bf16.mxu0 %v4024_v8 }
 0x146   : > { %v576_v20 = vpop.f32.mrb[0].mxu0 }
 0x147   : > { %v577_v21 = vadd.f32 %v4272_v19, %v576_v20  ;;  %v3244_v22 = vpop.f32.mrb[1].mxu0 }
 0x148   : > { %v579_v23 = vpop.f32.mrb[2].mxu0 }
 0x149   : > { %v582_v24 = vmax.f32 %v577_v21, 0.0  ;;  %v3245_v25 = vpop.f32.mrb[3].mxu0 }
 0x14b   : > { %v583_v26 = vpack.c.bf16 %v582_v24, %v582_v24 }
 0x14d   : > { %3249 = vmatmul.mubr.msk.bf16.vlgmr.msra.gmra.mrb[0].mxu1 %vm596_vm1, %v583_v26 }
 0x14e   : > { %3253 = vmatpush3.bf16.msra.mxu1 %v4204_v9  ;;  %3268 = vmatprep.mubr.msk.bf16.mxu1 %vm4025_vm0, %v4024_v8 }
 0x14f   : > { %3254 = vmatprep.subr.bf16.mxu1 %v4024_v8 }
 0x152   : > { %3255 = vmatpush3.bf16.msra.mxu1 %v4210_v10 }
 0x153   : > { %3256 = vmatprep.subr.bf16.mxu1 %v4024_v8 }
 0x156   : > { %3257 = vmatpush3.bf16.msra.mxu1 %v4217_v11 }
 0x157   : > { %3258 = vmatprep.subr.bf16.mxu1 %v4024_v8 }
 0x15a   : > { %3259 = vmatpush3.bf16.msra.mxu1 %v4223_v12 }
 0x15b   : > { %3260 = vmatprep.subr.bf16.mxu1 %v4024_v8 }
 0x15e   : > { %3261 = vmatpush3.bf16.msra.mxu1 %v4230_v13 }
 0x15f   : > { %3262 = vmatprep.subr.bf16.mxu1 %v4024_v8 }
 0x162   : > { %3263 = vmatpush3.bf16.msra.mxu1 %v4238_v14 }
 0x163   : > { %3264 = vmatprep.subr.bf16.mxu1 %v4024_v8 }
 0x166   : > { %3265 = vmatpush3.bf16.msra.mxu1 %v4245_v15 }
 0x167   : > { %3266 = vmatprep.subr.bf16.mxu1 %v4024_v8 }
 0x16a   : > { %3267 = vmatpush3.bf16.msra.mxu1 %v4252_v16 }
 0x16b   : > { %3278 = vmatprep.subr.bf16.mxu1 %v4024_v8 }
 0x16d   : > { %3269 = vmatmul.mubr.bf16.vlgmr.msra.gmra.mrb[4].mxu1 %v2900_v27 }
 0x16e   : > { %3279 = vmatpush3.bf16.msra.mxu1 %v4204_v9  ;;  %3294 = vmatprep.mubr.msk.bf16.mxu1 %vm4025_vm0, %v4024_v8 }
 0x16f   : > { %3280 = vmatprep.subr.bf16.mxu1 %v4024_v8 }
 0x172   : > { %3281 = vmatpush3.bf16.msra.mxu1 %v4210_v10 }
 0x173   : > { %3282 = vmatprep.subr.bf16.mxu1 %v4024_v8 }
 0x176   : > { %3283 = vmatpush3.bf16.msra.mxu1 %v4217_v11 }
 0x177   : > { %3284 = vmatprep.subr.bf16.mxu1 %v4024_v8 }
 0x17a   : > { %3285 = vmatpush3.bf16.msra.mxu1 %v4223_v12 }
 0x17b   : > { %3286 = vmatprep.subr.bf16.mxu1 %v4024_v8 }
 0x17e   : > { %3287 = vmatpush3.bf16.msra.mxu1 %v4230_v13 }
 0x17f   : > { %3288 = vmatprep.subr.bf16.mxu1 %v4024_v8 }
 0x182   : > { %3289 = vmatpush3.bf16.msra.mxu1 %v4238_v14 }
 0x183   : > { %3290 = vmatprep.subr.bf16.mxu1 %v4024_v8 }
 0x186   : > { %3291 = vmatpush3.bf16.msra.mxu1 %v4245_v15 }
 0x187   : > { %3292 = vmatprep.subr.bf16.mxu1 %v4024_v8 }
 0x18a   : > { %3293 = vmatpush3.bf16.msra.mxu1 %v4252_v16 }
 0x18b   : > { %3324 = vmatprep.subr.bf16.mxu1 %v4024_v8 }
 0x18d   : > { %3295 = vmatmul.mubr.bf16.vlgmr.msra.gmra.mrb[8].mxu1 %v2902_v28 }
 0x18e   : > { %3325 = vmatpush3.bf16.msra.mxu1 %v4263_v18  ;;  %3326 = vmatprep.mubr.msk.bf16.mxu1 %vm4025_vm0, %v4024_v8 }
 0x18f   : > { %3330 = vmatprep.subr.bf16.mxu1 %v4024_v8 }
 0x220   : > { %v634_v29 = vpop.f32.mrb[0].mxu1 }
 0x221   : > { %v3250_v30 = vpop.f32.mrb[1].mxu1  ;;  %v635_v49 = vadd.f32 %v4352_v48, %v634_v29 }
 0x222   : > { %v637_v31 = vpop.f32.mrb[2].mxu1 }
 0x223   : > { %v3251_v32 = vpop.f32.mrb[3].mxu1  ;;  %v640_v54 = vmax.f32 %v635_v49, 0.0 }
 0x240   : > { %v677_v33 = vpop.f32.mrb[4].mxu1 }
 0x241   : > { %v678_v34 = vadd.f32 %v4272_v19, %v677_v33  ;;  %v3270_v35 = vpop.f32.mrb[5].mxu1 }
 0x242   : > { %v680_v36 = vpop.f32.mrb[6].mxu1 }
 0x243   : > { %v683_v37 = vmax.f32 %v678_v34, 0.0  ;;  %v3271_v38 = vpop.f32.mrb[7].mxu1  ;;  %v2908_v34 = vld [vmem:[%s4186_s15 + $0x14] sm:$0xf] }
 0x245   : > { %v684_v39 = vpack.c.bf16 %v683_v37, %v683_v37 }
 0x247   : > { %3275 = vmatmul.mubr.msk.bf16.vlgmr.msra.gmra.mrb[4].mxu0 %vm596_vm1, %v684_v39 }
 0x248   : > { %3299 = vmatpush3.bf16.msra.mxu0 %v4263_v18  ;;  %3300 = vmatprep.mubr.msk.bf16.mxu0 %vm4025_vm0, %v4024_v8 }
 0x249   : > { %3304 = vmatprep.subr.bf16.mxu0 %v4024_v8 }
 0x260   : > { %v766_v40 = vpop.f32.mrb[8].mxu1 }
 0x261   : > { %v767_v41 = vadd.f32 %v4272_v19, %v766_v40  ;;  %v3296_v42 = vpop.f32.mrb[9].mxu1 }
 0x262   : > { %v769_v43 = vpop.f32.mrb[10].mxu1 }
 0x263   : > { %v772_v44 = vmax.f32 %v767_v41, 0.0  ;;  %v3297_v45 = vpop.f32.mrb[11].mxu1 }
 0x265   : > { %v773_v46 = vpack.c.bf16 %v772_v44, %v772_v44 }
 0x267   : > { %3301 = vmatmul.mubr.msk.bf16.vlgmr.msra.gmra.mrb[8].mxu0 %vm596_vm1, %v773_v46 }
 0x268   : > { %3305 = vmatpush3.bf16.msra.mxu0 %v4204_v9  ;;  %3320 = vmatprep.mubr.msk.bf16.mxu0 %vm4025_vm0, %v4024_v8 }
 0x269   : > { %3306 = vmatprep.subr.bf16.mxu0 %v4024_v8 }
 0x26c   : > { %3307 = vmatpush3.bf16.msra.mxu0 %v4210_v10 }
 0x26d   : > { %3308 = vmatprep.subr.bf16.mxu0 %v4024_v8 }
 0x270   : > { %3309 = vmatpush3.bf16.msra.mxu0 %v4217_v11 }
 0x271   : > { %3310 = vmatprep.subr.bf16.mxu0 %v4024_v8 }
 0x274   : > { %3311 = vmatpush3.bf16.msra.mxu0 %v4223_v12 }
 0x275   : > { %3312 = vmatprep.subr.bf16.mxu0 %v4024_v8 }
 0x278   : > { %3313 = vmatpush3.bf16.msra.mxu0 %v4230_v13 }
 0x279   : > { %3314 = vmatprep.subr.bf16.mxu0 %v4024_v8 }
 0x27c   : > { %3315 = vmatpush3.bf16.msra.mxu0 %v4238_v14 }
 0x27d   : > { %3316 = vmatprep.subr.bf16.mxu0 %v4024_v8 }
 0x280   : > { %3317 = vmatpush3.bf16.msra.mxu0 %v4245_v15 }
 0x281   : > { %3318 = vmatprep.subr.bf16.mxu0 %v4024_v8 }
 0x284   : > { %3319 = vmatpush3.bf16.msra.mxu0 %v4252_v16 }
 0x285   : > { %3350 = vmatprep.subr.bf16.mxu0 %v4024_v8 }
 0x287   : > { %3321 = vmatmul.mubr.bf16.vlgmr.msra.gmra.mrb[12].mxu0 %v2904_v47 }
 0x288   : > { %3351 = vmatpush3.bf16.msra.mxu0 %v4263_v18  ;;  %3352 = vmatprep.mubr.msk.bf16.mxu0 %vm4025_vm0, %v4024_v8 }
 0x289   : > { %3356 = vmatprep.subr.bf16.mxu0 %v4024_v8 }
 0x31a   : > { %v722_v50 = vpop.f32.mrb[4].mxu0 }
 0x31b   : > { %v723_v51 = vadd.f32 %v4352_v48, %v722_v50  ;;  %v3276_v52 = vpop.f32.mrb[5].mxu0  ;;  %v2910_v50 = vld [vmem:[%s4186_s15 + $0x18] sm:$0xf] }
 0x31c   : > { %v725_v53 = vpop.f32.mrb[6].mxu0 }
 0x31d   : > { %v728_v55 = vmax.f32 %v723_v51, 0.0  ;;  %v3277_v56 = vpop.f32.mrb[7].mxu0 }
 0x31f   : > { %v729_v57 = vmax.f32 %v640_v54, %v728_v55 }
 0x33a   : > { %v811_v58 = vpop.f32.mrb[8].mxu0 }
 0x33b   : > { %v812_v59 = vadd.f32 %v4352_v48, %v811_v58  ;;  %v3302_v60 = vpop.f32.mrb[9].mxu0 }
 0x33c   : > { %v814_v61 = vpop.f32.mrb[10].mxu0 }
 0x33d   : > { %v817_v62 = vmax.f32 %v812_v59, 0.0  ;;  %v3303_v63 = vpop.f32.mrb[11].mxu0 }
 0x33f   : > { %v818_v0 = vmax.f32 %v729_v57, %v817_v62 }
 0x35a   : > { %v855_v1 = vpop.f32.mrb[12].mxu0 }
 0x35b   : > { %v856_v2 = vadd.f32 %v4272_v19, %v855_v1  ;;  %v3322_v3 = vpop.f32.mrb[13].mxu0 }
 0x35c   : > { %v858_v4 = vpop.f32.mrb[14].mxu0 }
 0x35d   : > { %v861_v5 = vmax.f32 %v856_v2, 0.0  ;;  %v3323_v6 = vpop.f32.mrb[15].mxu0 }
 0x35e   : > { %v4463_v6 = vld [vmem:[%s4999_s6] sm:$0xff]  }
 0x35f   : > { %v862_v7 = vpack.c.bf16 %v861_v5, %v861_v5 }
 0x361   : > { %3327 = vmatmul.mubr.msk.bf16.vlgmr.msra.gmra.mrb[12].mxu1 %vm596_vm1, %v862_v7 }
 0x362   : > { %3331 = vmatpush3.bf16.msra.mxu1 %v4204_v9  ;;  %3346 = vmatprep.mubr.msk.bf16.mxu1 %vm4025_vm0, %v4024_v8 }
 0x363   : > { %3332 = vmatprep.subr.bf16.mxu1 %v4024_v8 }
 0x366   : > { %3333 = vmatpush3.bf16.msra.mxu1 %v4210_v10 }
 0x367   : > { %3334 = vmatprep.subr.bf16.mxu1 %v4024_v8 }
 0x36a   : > { %3335 = vmatpush3.bf16.msra.mxu1 %v4217_v11 }
 0x36b   : > { %3336 = vmatprep.subr.bf16.mxu1 %v4024_v8 }
 0x36e   : > { %3337 = vmatpush3.bf16.msra.mxu1 %v4223_v12 }
 0x36f   : > { %3338 = vmatprep.subr.bf16.mxu1 %v4024_v8 }
 0x372   : > { %3339 = vmatpush3.bf16.msra.mxu1 %v4230_v13 }
 0x373   : > { %3340 = vmatprep.subr.bf16.mxu1 %v4024_v8 }
 0x376   : > { %3341 = vmatpush3.bf16.msra.mxu1 %v4238_v14 }
 0x377   : > { %3342 = vmatprep.subr.bf16.mxu1 %v4024_v8 }
 0x37a   : > { %3343 = vmatpush3.bf16.msra.mxu1 %v4245_v15 }
 0x37b   : > { %3344 = vmatprep.subr.bf16.mxu1 %v4024_v8 }
 0x37e   : > { %3345 = vmatpush3.bf16.msra.mxu1 %v4252_v16 }
 0x37f   : > { %3376 = vmatprep.subr.bf16.mxu1 %v4024_v8 }
 0x381   : > { %3347 = vmatmul.mubr.bf16.vlgmr.msra.gmra.mrb[16].mxu1 %v2906_v17  ;;  %v4470_v17 = vld [vmem:[%s4999_s6 + $0x8] sm:$0xff]  }
 0x382   : > { %3377 = vmatpush3.bf16.msra.mxu1 %v4263_v18  ;;  %3378 = vmatprep.mubr.msk.bf16.mxu1 %vm4025_vm0, %v4024_v8 }
 0x383   : > { %3382 = vmatprep.subr.bf16.mxu1 %v4024_v8 }
 0x434   : > { %v900_v20 = vpop.f32.mrb[12].mxu1 }
 0x435   : > { %v901_v21 = vadd.f32 %v4352_v48, %v900_v20  ;;  %v3328_v22 = vpop.f32.mrb[13].mxu1  ;;  %v4486_v20 = vld [vmem:[%s4999_s6 + $0x18] sm:$0xff]  }
 0x436   : > { %v903_v23 = vpop.f32.mrb[14].mxu1  ;;  %v4500_v22 = vld [vmem:[%s4999_s6 + $0x28] sm:$0xff]  }
 0x437   : > { %v906_v24 = vmax.f32 %v901_v21, 0.0  ;;  %v3329_v25 = vpop.f32.mrb[15].mxu1  ;;  %v4493_v21 = vld [vmem:[%s4999_s6 + $0x20] sm:$0xff]   ;;  %v4507_v23 = vld [vmem:[%s4999_s6 + $0x30] sm:$0xff]  }
 0x438   : > { %v1285_v25 = vld [vmem:[%s4189_s30] sm:$0xf] }
 0x439   : > { %v907_v26 = vmax.f32 %v818_v0, %v906_v24  ;;  %v4514_v24 = vld [vmem:[%s4999_s6 + $0x38] sm:$0xff]  }
 0x454   : > { %v944_v27 = vpop.f32.mrb[16].mxu1 }
 0x455   : > { %v945_v28 = vadd.f32 %v4272_v19, %v944_v27  ;;  %v3348_v29 = vpop.f32.mrb[17].mxu1 }
 0x456   : > { %v947_v30 = vpop.f32.mrb[18].mxu1 }
 0x457   : > { %v950_v31 = vmax.f32 %v945_v28, 0.0  ;;  %v3349_v32 = vpop.f32.mrb[19].mxu1 }
 0x459   : > { %v951_v33 = vpack.c.bf16 %v950_v31, %v950_v31 }
 0x45b   : > { %3353 = vmatmul.mubr.msk.bf16.vlgmr.msra.gmra.mrb[16].mxu0 %vm596_vm1, %v951_v33 }
 0x45c   : > { %3357 = vmatpush3.bf16.msra.mxu0 %v4204_v9  ;;  %3372 = vmatprep.mubr.msk.bf16.mxu0 %vm4025_vm0, %v4024_v8 }
 0x45d   : > { %3358 = vmatprep.subr.bf16.mxu0 %v4024_v8 }
 0x460   : > { %3359 = vmatpush3.bf16.msra.mxu0 %v4210_v10 }
 0x461   : > { %3360 = vmatprep.subr.bf16.mxu0 %v4024_v8 }
 0x464   : > { %3361 = vmatpush3.bf16.msra.mxu0 %v4217_v11 }
 0x465   : > { %3362 = vmatprep.subr.bf16.mxu0 %v4024_v8 }
 0x468   : > { %3363 = vmatpush3.bf16.msra.mxu0 %v4223_v12 }
 0x469   : > { %3364 = vmatprep.subr.bf16.mxu0 %v4024_v8 }
 0x46c   : > { %3365 = vmatpush3.bf16.msra.mxu0 %v4230_v13 }
 0x46d   : > { %3366 = vmatprep.subr.bf16.mxu0 %v4024_v8 }
 0x470   : > { %3367 = vmatpush3.bf16.msra.mxu0 %v4238_v14 }
 0x471   : > { %3368 = vmatprep.subr.bf16.mxu0 %v4024_v8 }
 0x474   : > { %3369 = vmatpush3.bf16.msra.mxu0 %v4245_v15 }
 0x475   : > { %3370 = vmatprep.subr.bf16.mxu0 %v4024_v8 }
 0x478   : > { %3371 = vmatpush3.bf16.msra.mxu0 %v4252_v16 }
 0x479   : > { %3402 = vmatprep.subr.bf16.mxu0 %v4024_v8 }
 0x47b   : > { %3373 = vmatmul.mubr.bf16.vlgmr.msra.gmra.mrb[20].mxu0 %v2908_v34  ;;  %v4539_v34 = vld [vmem:[%s5000_s7] ss:$0 sm:$0xff] }
 0x47c   : > { %3403 = vmatpush3.bf16.msra.mxu0 %v4263_v18  ;;  %3404 = vmatprep.mubr.msk.bf16.mxu0 %vm4025_vm0, %v4024_v8 }
 0x47d   : > { %3408 = vmatprep.subr.bf16.mxu0 %v4024_v8 }
 0x52e   : > { %v989_v35 = vpop.f32.mrb[16].mxu0 }
 0x52f   : > { %v990_v36 = vadd.f32 %v4352_v48, %v989_v35  ;;  %v3354_v37 = vpop.f32.mrb[17].mxu0 }
 0x530   : > { %v992_v38 = vpop.f32.mrb[18].mxu0 }
 0x531   : > { %v995_v39 = vmax.f32 %v990_v36, 0.0  ;;  %v3355_v40 = vpop.f32.mrb[19].mxu0 }
 0x533   : > { %v996_v41 = vmax.f32 %v907_v26, %v995_v39  ;;  %v4525_v26 = vld [vmem:[%s5001_s8] sm:$0xff]  }
 0x54e   : > { %v1033_v42 = vpop.f32.mrb[20].mxu0 }
 0x54f   : > { %v1034_v43 = vadd.f32 %v4272_v19, %v1033_v42  ;;  %v3374_v44 = vpop.f32.mrb[21].mxu0 }
 0x550   : > { %v1036_v45 = vpop.f32.mrb[22].mxu0 }
 0x551   : > { %v1039_v46 = vmax.f32 %v1034_v43, 0.0  ;;  %v3375_v47 = vpop.f32.mrb[23].mxu0 }
 0x553   : > { %v1040_v49 = vpack.c.bf16 %v1039_v46, %v1039_v46 }
 0x555   : > { %3379 = vmatmul.mubr.msk.bf16.vlgmr.msra.gmra.mrb[20].mxu1 %vm596_vm1, %v1040_v49 }
 0x556   : > { %3383 = vmatpush3.bf16.msra.mxu1 %v4204_v9  ;;  %3398 = vmatprep.mubr.msk.bf16.mxu1 %vm4025_vm0, %v4024_v8 }
 0x557   : > { %3384 = vmatprep.subr.bf16.mxu1 %v4024_v8 }
 0x55a   : > { %3385 = vmatpush3.bf16.msra.mxu1 %v4210_v10 }
 0x55b   : > { %3386 = vmatprep.subr.bf16.mxu1 %v4024_v8 }
 0x55e   : > { %3387 = vmatpush3.bf16.msra.mxu1 %v4217_v11 }
 0x55f   : > { %3388 = vmatprep.subr.bf16.mxu1 %v4024_v8 }
 0x562   : > { %3389 = vmatpush3.bf16.msra.mxu1 %v4223_v12 }
 0x563   : > { %3390 = vmatprep.subr.bf16.mxu1 %v4024_v8 }
 0x566   : > { %3391 = vmatpush3.bf16.msra.mxu1 %v4230_v13 }
 0x567   : > { %3392 = vmatprep.subr.bf16.mxu1 %v4024_v8 }
 0x56a   : > { %3393 = vmatpush3.bf16.msra.mxu1 %v4238_v14 }
 0x56b   : > { %3394 = vmatprep.subr.bf16.mxu1 %v4024_v8 }
 0x56e   : > { %3395 = vmatpush3.bf16.msra.mxu1 %v4245_v15 }
 0x56f   : > { %3396 = vmatprep.subr.bf16.mxu1 %v4024_v8 }
 0x572   : > { %3397 = vmatpush3.bf16.msra.mxu1 %v4252_v16 }
 0x573   : > { %3428 = vmatprep.subr.bf16.mxu1 %v4024_v8 }
 0x575   : > { %3399 = vmatmul.mubr.bf16.vlgmr.msra.gmra.mrb[24].mxu1 %v2910_v50 }
 0x576   : > { %3429 = vmatpush3.bf16.msra.mxu1 %v4263_v18  ;;  %3430 = vmatprep.mubr.msk.bf16.mxu1 %vm4025_vm0, %v4024_v8 }
 0x577   : > { %3434 = vmatprep.subr.bf16.mxu1 %v4024_v8 }
 0x628   : > { %v1078_v51 = vpop.f32.mrb[20].mxu1 }
 0x629   : > { %v1079_v52 = vadd.f32 %v4352_v48, %v1078_v51  ;;  %v3380_v53 = vpop.f32.mrb[21].mxu1 }
 0x62a   : > { %v1081_v54 = vpop.f32.mrb[22].mxu1 }
 0x62b   : > { %v1084_v55 = vmax.f32 %v1079_v52, 0.0  ;;  %v3381_v56 = vpop.f32.mrb[23].mxu1  ;;  %v2928_v54 = vld [vmem:[%s4189_s30 + $0x8] sm:$0xf] }
 0x62d   : > { %v1085_v57 = vmax.f32 %v996_v41, %v1084_v55  ;;  %v2926_v41 = vld [vmem:[%s4189_s30 + $0x4] sm:$0xf]  ;;  %v4594_v55 = vld [vmem:[%s5002_s9] ss:$0 sm:$0xff] }
 0x648   : > { %v1122_v58 = vpop.f32.mrb[24].mxu1 }
 0x649   : > { %v1123_v59 = vadd.f32 %v4272_v19, %v1122_v58  ;;  %v3400_v60 = vpop.f32.mrb[25].mxu1 }
 0x64a   : > { %v1125_v61 = vpop.f32.mrb[26].mxu1 }
 0x64b   : > { %v1128_v62 = vmax.f32 %v1123_v59, 0.0  ;;  %v3401_v18 = vpop.f32.mrb[27].mxu1 }
 0x64d   : > { %v1129_v63 = vpack.c.bf16 %v1128_v62, %v1128_v62 }
 0x64f   : > { %3405 = vmatmul.mubr.msk.bf16.vlgmr.msra.gmra.mrb[24].mxu0 %vm596_vm1, %v1129_v63 }
 0x650   : > { %3409 = vmatpush3.bf16.msra.mxu0 %v4204_v9  ;;  %3424 = vmatprep.mubr.msk.bf16.mxu0 %vm4025_vm0, %v4024_v8  ;;  %v2912_v9 = vld [vmem:[%s4186_s15 + $0x1c] sm:$0xf] }
 0x651   : > { %3410 = vmatprep.subr.bf16.mxu0 %v4024_v8 }
 0x654   : > { %3411 = vmatpush3.bf16.msra.mxu0 %v4210_v10 }
 0x655   : > { %3412 = vmatprep.subr.bf16.mxu0 %v4024_v8 }
 0x658   : > { %3413 = vmatpush3.bf16.msra.mxu0 %v4217_v11 }
 0x659   : > { %3414 = vmatprep.subr.bf16.mxu0 %v4024_v8 }
 0x65c   : > { %3415 = vmatpush3.bf16.msra.mxu0 %v4223_v12 }
 0x65d   : > { %3416 = vmatprep.subr.bf16.mxu0 %v4024_v8 }
 0x660   : > { %3417 = vmatpush3.bf16.msra.mxu0 %v4230_v13 }
 0x661   : > { %3418 = vmatprep.subr.bf16.mxu0 %v4024_v8 }
 0x664   : > { %3419 = vmatpush3.bf16.msra.mxu0 %v4238_v14 }
 0x665   : > { %3420 = vmatprep.subr.bf16.mxu0 %v4024_v8 }
 0x668   : > { %3421 = vmatpush3.bf16.msra.mxu0 %v4245_v15 }
 0x669   : > { %3422 = vmatprep.subr.bf16.mxu0 %v4024_v8 }
 0x66c   : > { %3423 = vmatpush3.bf16.msra.mxu0 %v4252_v16 }
 0x66d   : > { %3454 = vmatprep.subr.bf16.mxu0 %v4024_v8 }
 0x66f   : > { %3425 = vmatmul.mubr.bf16.vlgmr.msra.gmra.mrb[28].mxu0 %v2912_v9 }
 0x670   : > { %3456 = vmatprep.mubr.msk.bf16.mxu0 %vm4025_vm0, %v4024_v8  ;;  %3455 = vmatpush3.bf16.msra.mxu0 %v4525_v26 }
 0x671   : > { %3460 = vmatprep.subr.bf16.mxu0 %v4024_v8 }
 0x722   : > { %v1167_v10 = vpop.f32.mrb[24].mxu0 }
 0x723   : > { %v1168_v11 = vadd.f32 %v4352_v48, %v1167_v10  ;;  %v3406_v12 = vpop.f32.mrb[25].mxu0 }
 0x724   : > { %v1170_v13 = vpop.f32.mrb[26].mxu0 }
 0x725   : > { %v1173_v14 = vmax.f32 %v1168_v11, 0.0  ;;  %v3407_v0 = vpop.f32.mrb[27].mxu0 }
 0x727   : > { %v1174_v1 = vmax.f32 %v1085_v57, %v1173_v14 }
 0x742   : > { %v1211_v15 = vpop.f32.mrb[28].mxu0 }
 0x743   : > { %v1212_v2 = vadd.f32 %v4272_v19, %v1211_v15  ;;  %v3426_v3 = vpop.f32.mrb[29].mxu0  ;;  %v4479_v19 = vld [vmem:[%s4999_s6 + $0x10] sm:$0xff]  }
 0x744   : > { %v1214_v16 = vpop.f32.mrb[30].mxu0 }
 0x745   : > { %v1217_v4 = vmax.f32 %v1212_v2, 0.0  ;;  %v3427_v5 = vpop.f32.mrb[31].mxu0 }
 0x747   : > { %v1218_v7 = vpack.c.bf16 %v1217_v4, %v1217_v4 }
 0x749   : > { %3431 = vmatmul.mubr.msk.bf16.vlgmr.msra.gmra.mrb[28].mxu1 %vm596_vm1, %v1218_v7 }
 0x74a   : > { %3435 = vmatpush3.bf16.msra.mxu1 %v4463_v6  ;;  %3450 = vmatprep.mubr.msk.bf16.mxu1 %vm4025_vm0, %v4024_v8 }
 0x74b   : > { %3436 = vmatprep.subr.bf16.mxu1 %v4024_v8 }
 0x74e   : > { %3437 = vmatpush3.bf16.msra.mxu1 %v4470_v17 }
 0x74f   : > { %3438 = vmatprep.subr.bf16.mxu1 %v4024_v8 }
 0x752   : > { %3439 = vmatpush3.bf16.msra.mxu1 %v4479_v19 }
 0x753   : > { %3440 = vmatprep.subr.bf16.mxu1 %v4024_v8 }
 0x756   : > { %3441 = vmatpush3.bf16.msra.mxu1 %v4486_v20 }
 0x757   : > { %3442 = vmatprep.subr.bf16.mxu1 %v4024_v8 }
 0x75a   : > { %3443 = vmatpush3.bf16.msra.mxu1 %v4493_v21 }
 0x75b   : > { %3444 = vmatprep.subr.bf16.mxu1 %v4024_v8 }
 0x75e   : > { %3445 = vmatpush3.bf16.msra.mxu1 %v4500_v22 }
 0x75f   : > { %3446 = vmatprep.subr.bf16.mxu1 %v4024_v8 }
 0x762   : > { %3447 = vmatpush3.bf16.msra.mxu1 %v4507_v23 }
 0x763   : > { %3448 = vmatprep.subr.bf16.mxu1 %v4024_v8 }
 0x766   : > { %3449 = vmatpush3.bf16.msra.mxu1 %v4514_v24 }
 0x767   : > { %3480 = vmatprep.subr.bf16.mxu1 %v4024_v8 }
 0x769   : > { %3451 = vmatmul.mubr.bf16.vlgmr.msra.gmra.mrb[32].mxu1 %v1285_v25 }
 0x76a   : > { %3482 = vmatprep.mubr.msk.bf16.mxu1 %vm4025_vm0, %v4024_v8  ;;  %3481 = vmatpush3.bf16.msra.mxu1 %v4525_v26 }
 0x76b   : > { %3486 = vmatprep.subr.bf16.mxu1 %v4024_v8 }
 0x81c   : > { %v1256_v27 = vpop.f32.mrb[28].mxu1 }
 0x81d   : > { %v1257_v28 = vadd.f32 %v4352_v48, %v1256_v27  ;;  %v3432_v29 = vpop.f32.mrb[29].mxu1 }
 0x81e   : > { %v1259_v30 = vpop.f32.mrb[30].mxu1 }
 0x81f   : > { %v1262_v31 = vmax.f32 %v1257_v28, 0.0  ;;  %v3433_v32 = vpop.f32.mrb[31].mxu1 }
 0x821   : > { %v1263_v33 = vmax.f32 %v1174_v1, %v1262_v31  ;;  %v2930_v1 = vld [vmem:[%s4189_s30 + $0xc] sm:$0xf] }
 0x823   : > { %1264 = vst [vmem:[%s4533_s11] sm:$0xff] %v1263_v33  ;;  %v2932_v33 = vld [vmem:[%s4189_s30 + $0x10] sm:$0xf] }
 0x83c   : > { %v1374_v35 = vpop.f32.mrb[32].mxu1 }
 0x83d   : > { %v1375_v36 = vadd.f32 %v4539_v34, %v1374_v35  ;;  %v3452_v37 = vpop.f32.mrb[33].mxu1 }
 0x83e   : > { %v1377_v38 = vpop.f32.mrb[34].mxu1 }
 0x83f   : > { %v1380_v48 = vmax.f32 %v1375_v36, 0.0  ;;  %v3453_v39 = vpop.f32.mrb[35].mxu1 }
 0x841   : > { %v1381_v40 = vpack.c.bf16 %v1380_v48, %v1380_v48 }
 0x843   : > { %3457 = vmatmul.mubr.msk.bf16.vlgmr.msra.gmra.mrb[32].mxu0 %vm596_vm1, %v1381_v40 }
 0x844   : > { %3461 = vmatpush3.bf16.msra.mxu0 %v4463_v6  ;;  %3476 = vmatprep.mubr.msk.bf16.mxu0 %vm4025_vm0, %v4024_v8 }
 0x845   : > { %3462 = vmatprep.subr.bf16.mxu0 %v4024_v8 }
 0x848   : > { %3463 = vmatpush3.bf16.msra.mxu0 %v4470_v17 }
 0x849   : > { %3464 = vmatprep.subr.bf16.mxu0 %v4024_v8 }
 0x84c   : > { %3465 = vmatpush3.bf16.msra.mxu0 %v4479_v19 }
 0x84d   : > { %3466 = vmatprep.subr.bf16.mxu0 %v4024_v8 }
 0x850   : > { %3467 = vmatpush3.bf16.msra.mxu0 %v4486_v20 }
 0x851   : > { %3468 = vmatprep.subr.bf16.mxu0 %v4024_v8 }
 0x854   : > { %3469 = vmatpush3.bf16.msra.mxu0 %v4493_v21 }
 0x855   : > { %3470 = vmatprep.subr.bf16.mxu0 %v4024_v8 }
 0x858   : > { %3471 = vmatpush3.bf16.msra.mxu0 %v4500_v22 }
 0x859   : > { %3472 = vmatprep.subr.bf16.mxu0 %v4024_v8 }
 0x85c   : > { %3473 = vmatpush3.bf16.msra.mxu0 %v4507_v23 }
 0x85d   : > { %3474 = vmatprep.subr.bf16.mxu0 %v4024_v8 }
 0x860   : > { %3475 = vmatpush3.bf16.msra.mxu0 %v4514_v24 }
 0x861   : > { %3506 = vmatprep.subr.bf16.mxu0 %v4024_v8 }
 0x863   : > { %3477 = vmatmul.mubr.bf16.vlgmr.msra.gmra.mrb[36].mxu0 %v2926_v41 }
 0x864   : > { %3507 = vmatpush3.bf16.msra.mxu0 %v4525_v26  ;;  %3508 = vmatprep.mubr.msk.bf16.mxu0 %vm4025_vm0, %v4024_v8 }
 0x865   : > { %3512 = vmatprep.subr.bf16.mxu0 %v4024_v8 }
 0x916   : > { %v1431_v42 = vpop.f32.mrb[32].mxu0 }
 0x917   : > { %v3458_v43 = vpop.f32.mrb[33].mxu0  ;;  %v1432_v56 = vadd.f32 %v4594_v55, %v1431_v42 }
 0x918   : > { %v1434_v44 = vpop.f32.mrb[34].mxu0 }
 0x919   : > { %v3459_v45 = vpop.f32.mrb[35].mxu0  ;;  %v1437_v61 = vmax.f32 %v1432_v56, 0.0 }
 0x936   : > { %v1474_v46 = vpop.f32.mrb[36].mxu0 }
 0x937   : > { %v1475_v47 = vadd.f32 %v4539_v34, %v1474_v46  ;;  %v3478_v49 = vpop.f32.mrb[37].mxu0 }
 0x938   : > { %v1477_v50 = vpop.f32.mrb[38].mxu0  ;;  %v2934_v49 = vld [vmem:[%s4189_s30 + $0x14] sm:$0xf] }
 0x939   : > { %v1480_v51 = vmax.f32 %v1475_v47, 0.0  ;;  %v3479_v52 = vpop.f32.mrb[39].mxu0 }
 0x93b   : > { %v1481_v53 = vpack.c.bf16 %v1480_v51, %v1480_v51 }
 0x93d   : > { %3483 = vmatmul.mubr.msk.bf16.vlgmr.msra.gmra.mrb[36].mxu1 %vm596_vm1, %v1481_v53 }
 0x93e   : > { %3487 = vmatpush3.bf16.msra.mxu1 %v4463_v6  ;;  %3502 = vmatprep.mubr.msk.bf16.mxu1 %vm4025_vm0, %v4024_v8 }
 0x93f   : > { %3488 = vmatprep.subr.bf16.mxu1 %v4024_v8 }
 0x942   : > { %3489 = vmatpush3.bf16.msra.mxu1 %v4470_v17 }
 0x943   : > { %3490 = vmatprep.subr.bf16.mxu1 %v4024_v8 }
 0x946   : > { %3491 = vmatpush3.bf16.msra.mxu1 %v4479_v19 }
 0x947   : > { %3492 = vmatprep.subr.bf16.mxu1 %v4024_v8 }
 0x94a   : > { %3493 = vmatpush3.bf16.msra.mxu1 %v4486_v20 }
 0x94b   : > { %3494 = vmatprep.subr.bf16.mxu1 %v4024_v8 }
 0x94e   : > { %3495 = vmatpush3.bf16.msra.mxu1 %v4493_v21 }
 0x94f   : > { %3496 = vmatprep.subr.bf16.mxu1 %v4024_v8 }
 0x952   : > { %3497 = vmatpush3.bf16.msra.mxu1 %v4500_v22 }
 0x953   : > { %3498 = vmatprep.subr.bf16.mxu1 %v4024_v8 }
 0x956   : > { %3499 = vmatpush3.bf16.msra.mxu1 %v4507_v23 }
 0x957   : > { %3500 = vmatprep.subr.bf16.mxu1 %v4024_v8 }
 0x95a   : > { %3501 = vmatpush3.bf16.msra.mxu1 %v4514_v24 }
 0x95b   : > { %3532 = vmatprep.subr.bf16.mxu1 %v4024_v8 }
 0x95d   : > { %3503 = vmatmul.mubr.bf16.vlgmr.msra.gmra.mrb[40].mxu1 %v2928_v54 }
 0x95e   : > { %3533 = vmatpush3.bf16.msra.mxu1 %v4525_v26  ;;  %3534 = vmatprep.mubr.msk.bf16.mxu1 %vm4025_vm0, %v4024_v8 }
 0x95f   : > { %3538 = vmatprep.subr.bf16.mxu1 %v4024_v8 }
 0xa10   : > { %v1519_v57 = vpop.f32.mrb[36].mxu1 }
 0xa11   : > { %v1520_v58 = vadd.f32 %v4594_v55, %v1519_v57  ;;  %v3484_v59 = vpop.f32.mrb[37].mxu1 }
 0xa12   : > { %v1522_v60 = vpop.f32.mrb[38].mxu1 }
 0xa13   : > { %v1525_v62 = vmax.f32 %v1520_v58, 0.0  ;;  %v3485_v18 = vpop.f32.mrb[39].mxu1 }
 0xa15   : > { %v1526_v63 = vmax.f32 %v1437_v61, %v1525_v62 }
 0xa30   : > { %v1563_v9 = vpop.f32.mrb[40].mxu1 }
 0xa31   : > { %v1564_v10 = vadd.f32 %v4539_v34, %v1563_v9  ;;  %v3504_v11 = vpop.f32.mrb[41].mxu1  ;;  %v2936_v9 = vld [vmem:[%s4189_s30 + $0x18] sm:$0xf] }
 0xa32   : > { %v1566_v12 = vpop.f32.mrb[42].mxu1 }
 0xa33   : > { %v1569_v13 = vmax.f32 %v1564_v10, 0.0  ;;  %v3505_v14 = vpop.f32.mrb[43].mxu1 }
 0xa35   : > { %v1570_v0 = vpack.c.bf16 %v1569_v13, %v1569_v13 }
 0xa37   : > { %3509 = vmatmul.mubr.msk.bf16.vlgmr.msra.gmra.mrb[40].mxu0 %vm596_vm1, %v1570_v0 }
 0xa38   : > { %3513 = vmatpush3.bf16.msra.mxu0 %v4463_v6  ;;  %3528 = vmatprep.mubr.msk.bf16.mxu0 %vm4025_vm0, %v4024_v8 }
 0xa39   : > { %3514 = vmatprep.subr.bf16.mxu0 %v4024_v8 }
 0xa3c   : > { %3515 = vmatpush3.bf16.msra.mxu0 %v4470_v17 }
 0xa3d   : > { %3516 = vmatprep.subr.bf16.mxu0 %v4024_v8 }
 0xa40   : > { %3517 = vmatpush3.bf16.msra.mxu0 %v4479_v19 }
 0xa41   : > { %3518 = vmatprep.subr.bf16.mxu0 %v4024_v8 }
 0xa44   : > { %3519 = vmatpush3.bf16.msra.mxu0 %v4486_v20 }
 0xa45   : > { %3520 = vmatprep.subr.bf16.mxu0 %v4024_v8 }
 0xa48   : > { %3521 = vmatpush3.bf16.msra.mxu0 %v4493_v21 }
 0xa49   : > { %3522 = vmatprep.subr.bf16.mxu0 %v4024_v8 }
 0xa4c   : > { %3523 = vmatpush3.bf16.msra.mxu0 %v4500_v22 }
 0xa4d   : > { %3524 = vmatprep.subr.bf16.mxu0 %v4024_v8 }
 0xa50   : > { %3525 = vmatpush3.bf16.msra.mxu0 %v4507_v23 }
 0xa51   : > { %3526 = vmatprep.subr.bf16.mxu0 %v4024_v8 }
 0xa54   : > { %3527 = vmatpush3.bf16.msra.mxu0 %v4514_v24 }
 0xa55   : > { %3558 = vmatprep.subr.bf16.mxu0 %v4024_v8 }
 0xa57   : > { %3529 = vmatmul.mubr.bf16.vlgmr.msra.gmra.mrb[44].mxu0 %v2930_v1 }
 0xa58   : > { %3559 = vmatpush3.bf16.msra.mxu0 %v4525_v26  ;;  %3560 = vmatprep.mubr.msk.bf16.mxu0 %vm4025_vm0, %v4024_v8 }
 0xa59   : > { %3564 = vmatprep.subr.bf16.mxu0 %v4024_v8 }
 0xb0a   : > { %v1608_v15 = vpop.f32.mrb[40].mxu0 }
 0xb0b   : > { %v1609_v2 = vadd.f32 %v4594_v55, %v1608_v15  ;;  %v3510_v3 = vpop.f32.mrb[41].mxu0 }
 0xb0c   : > { %v1611_v16 = vpop.f32.mrb[42].mxu0 }
 0xb0d   : > { %v1614_v4 = vmax.f32 %v1609_v2, 0.0  ;;  %v3511_v5 = vpop.f32.mrb[43].mxu0 }
 0xb0f   : > { %v1615_v7 = vmax.f32 %v1526_v63, %v1614_v4 }
 0xb2a   : > { %v1652_v25 = vpop.f32.mrb[44].mxu0 }
 0xb2b   : > { %v1653_v27 = vadd.f32 %v4539_v34, %v1652_v25  ;;  %v3530_v28 = vpop.f32.mrb[45].mxu0  ;;  %v2938_v25 = vld [vmem:[%s4189_s30 + $0x1c] sm:$0xf] }
 0xb2c   : > { %v1655_v29 = vpop.f32.mrb[46].mxu0 }
 0xb2d   : > { %v1658_v30 = vmax.f32 %v1653_v27, 0.0  ;;  %v3531_v31 = vpop.f32.mrb[47].mxu0 }
 0xb2f   : > { %v1659_v32 = vpack.c.bf16 %v1658_v30, %v1658_v30 }
 0xb31   : > { %3535 = vmatmul.mubr.msk.bf16.vlgmr.msra.gmra.mrb[44].mxu1 %vm596_vm1, %v1659_v32 }
 0xb32   : > { %3539 = vmatpush3.bf16.msra.mxu1 %v4463_v6  ;;  %3554 = vmatprep.mubr.msk.bf16.mxu1 %vm4025_vm0, %v4024_v8 }
 0xb33   : > { %3540 = vmatprep.subr.bf16.mxu1 %v4024_v8 }
 0xb36   : > { %3541 = vmatpush3.bf16.msra.mxu1 %v4470_v17 }
 0xb37   : > { %3542 = vmatprep.subr.bf16.mxu1 %v4024_v8 }
 0xb3a   : > { %3543 = vmatpush3.bf16.msra.mxu1 %v4479_v19 }
 0xb3b   : > { %3544 = vmatprep.subr.bf16.mxu1 %v4024_v8 }
 0xb3e   : > { %3545 = vmatpush3.bf16.msra.mxu1 %v4486_v20 }
 0xb3f   : > { %3546 = vmatprep.subr.bf16.mxu1 %v4024_v8 }
 0xb42   : > { %3547 = vmatpush3.bf16.msra.mxu1 %v4493_v21 }
 0xb43   : > { %3548 = vmatprep.subr.bf16.mxu1 %v4024_v8 }
 0xb46   : > { %3549 = vmatpush3.bf16.msra.mxu1 %v4500_v22 }
 0xb47   : > { %3550 = vmatprep.subr.bf16.mxu1 %v4024_v8 }
 0xb4a   : > { %3551 = vmatpush3.bf16.msra.mxu1 %v4507_v23 }
 0xb4b   : > { %3552 = vmatprep.subr.bf16.mxu1 %v4024_v8 }
 0xb4e   : > { %3553 = vmatpush3.bf16.msra.mxu1 %v4514_v24 }
 0xb4f   : > { %3584 = vmatprep.subr.bf16.mxu1 %v4024_v8 }
 0xb51   : > { %3555 = vmatmul.mubr.bf16.vlgmr.msra.gmra.mrb[48].mxu1 %v2932_v33 }
 0xb52   : > { %3585 = vmatpush3.bf16.msra.mxu1 %v4525_v26  ;;  %3586 = vmatprep.mubr.msk.bf16.mxu1 %vm4025_vm0, %v4024_v8 }
 0xb53   : > { %3590 = vmatprep.subr.bf16.mxu1 %v4024_v8 }
 0xc04   : > { %v1697_v35 = vpop.f32.mrb[44].mxu1 }
 0xc05   : > { %v1698_v36 = vadd.f32 %v4594_v55, %v1697_v35  ;;  %v3536_v37 = vpop.f32.mrb[45].mxu1 }
 0xc06   : > { %v1700_v38 = vpop.f32.mrb[46].mxu1 }
 0xc07   : > { %v1703_v48 = vmax.f32 %v1698_v36, 0.0  ;;  %v3537_v39 = vpop.f32.mrb[47].mxu1 }
 0xc09   : > { %v1704_v40 = vmax.f32 %v1615_v7, %v1703_v48 }
 0xc24   : > { %v1741_v41 = vpop.f32.mrb[48].mxu1 }
 0xc25   : > { %v1742_v42 = vadd.f32 %v4539_v34, %v1741_v41  ;;  %v3556_v43 = vpop.f32.mrb[49].mxu1  ;;  %v2940_v41 = vld [vmem:[%s4189_s30 + $0x20] sm:$0xf] }
 0xc26   : > { %v1744_v44 = vpop.f32.mrb[50].mxu1 }
 0xc27   : > { %v1747_v45 = vmax.f32 %v1742_v42, 0.0  ;;  %v3557_v46 = vpop.f32.mrb[51].mxu1 }
 0xc29   : > { %v1748_v47 = vpack.c.bf16 %v1747_v45, %v1747_v45 }
 0xc2b   : > { %3561 = vmatmul.mubr.msk.bf16.vlgmr.msra.gmra.mrb[48].mxu0 %vm596_vm1, %v1748_v47 }
 0xc2c   : > { %3565 = vmatpush3.bf16.msra.mxu0 %v4463_v6  ;;  %3580 = vmatprep.mubr.msk.bf16.mxu0 %vm4025_vm0, %v4024_v8 }
 0xc2d   : > { %3566 = vmatprep.subr.bf16.mxu0 %v4024_v8 }
 0xc30   : > { %3567 = vmatpush3.bf16.msra.mxu0 %v4470_v17 }
 0xc31   : > { %3568 = vmatprep.subr.bf16.mxu0 %v4024_v8 }
 0xc34   : > { %3569 = vmatpush3.bf16.msra.mxu0 %v4479_v19 }
 0xc35   : > { %3570 = vmatprep.subr.bf16.mxu0 %v4024_v8 }
 0xc38   : > { %3571 = vmatpush3.bf16.msra.mxu0 %v4486_v20 }
 0xc39   : > { %3572 = vmatprep.subr.bf16.mxu0 %v4024_v8 }
 0xc3c   : > { %3573 = vmatpush3.bf16.msra.mxu0 %v4493_v21 }
 0xc3d   : > { %3574 = vmatprep.subr.bf16.mxu0 %v4024_v8 }
 0xc40   : > { %3575 = vmatpush3.bf16.msra.mxu0 %v4500_v22 }
 0xc41   : > { %3576 = vmatprep.subr.bf16.mxu0 %v4024_v8 }
 0xc44   : > { %3577 = vmatpush3.bf16.msra.mxu0 %v4507_v23 }
 0xc45   : > { %3578 = vmatprep.subr.bf16.mxu0 %v4024_v8 }
 0xc48   : > { %3579 = vmatpush3.bf16.msra.mxu0 %v4514_v24 }
 0xc49   : > { %3610 = vmatprep.subr.bf16.mxu0 %v4024_v8 }
 0xc4b   : > { %3581 = vmatmul.mubr.bf16.vlgmr.msra.gmra.mrb[52].mxu0 %v2934_v49 }
 0xc4c   : > { %3611 = vmatpush3.bf16.msra.mxu0 %v4525_v26  ;;  %3612 = vmatprep.mubr.msk.bf16.mxu0 %vm4025_vm0, %v4024_v8 }
 0xc4d   : > { %3616 = vmatprep.subr.bf16.mxu0 %v4024_v8 }
 0xcfe   : > { %v1786_v50 = vpop.f32.mrb[48].mxu0 }
 0xcff   : > { %v1787_v51 = vadd.f32 %v4594_v55, %v1786_v50  ;;  %v3562_v52 = vpop.f32.mrb[49].mxu0 }
 0xd00   : > { %v1789_v53 = vpop.f32.mrb[50].mxu0 }
 0xd01   : > { %v1792_v54 = vmax.f32 %v1787_v51, 0.0  ;;  %v3563_v56 = vpop.f32.mrb[51].mxu0 }
 0xd03   : > { %v1793_v57 = vmax.f32 %v1704_v40, %v1792_v54 }
 0xd1e   : > { %v1830_v58 = vpop.f32.mrb[52].mxu0 }
 0xd1f   : > { %v1831_v59 = vadd.f32 %v4539_v34, %v1830_v58  ;;  %v3582_v60 = vpop.f32.mrb[53].mxu0  ;;  %v2942_v58 = vld [vmem:[%s4189_s30 + $0x24] sm:$0xf] }
 0xd20   : > { %v1833_v61 = vpop.f32.mrb[54].mxu0 }
 0xd21   : > { %v1836_v62 = vmax.f32 %v1831_v59, 0.0  ;;  %v3583_v18 = vpop.f32.mrb[55].mxu0 }
 0xd23   : > { %v1837_v63 = vpack.c.bf16 %v1836_v62, %v1836_v62 }
 0xd25   : > { %3587 = vmatmul.mubr.msk.bf16.vlgmr.msra.gmra.mrb[52].mxu1 %vm596_vm1, %v1837_v63 }
 0xd26   : > { %3591 = vmatpush3.bf16.msra.mxu1 %v4463_v6  ;;  %3606 = vmatprep.mubr.msk.bf16.mxu1 %vm4025_vm0, %v4024_v8 }
 0xd27   : > { %3592 = vmatprep.subr.bf16.mxu1 %v4024_v8 }
 0xd2a   : > { %3593 = vmatpush3.bf16.msra.mxu1 %v4470_v17 }
 0xd2b   : > { %3594 = vmatprep.subr.bf16.mxu1 %v4024_v8 }
 0xd2e   : > { %3595 = vmatpush3.bf16.msra.mxu1 %v4479_v19 }
 0xd2f   : > { %3596 = vmatprep.subr.bf16.mxu1 %v4024_v8 }
 0xd32   : > { %3597 = vmatpush3.bf16.msra.mxu1 %v4486_v20 }
 0xd33   : > { %3598 = vmatprep.subr.bf16.mxu1 %v4024_v8 }
 0xd36   : > { %3599 = vmatpush3.bf16.msra.mxu1 %v4493_v21 }
 0xd37   : > { %3600 = vmatprep.subr.bf16.mxu1 %v4024_v8 }
 0xd3a   : > { %3601 = vmatpush3.bf16.msra.mxu1 %v4500_v22 }
 0xd3b   : > { %3602 = vmatprep.subr.bf16.mxu1 %v4024_v8 }
 0xd3e   : > { %3603 = vmatpush3.bf16.msra.mxu1 %v4507_v23 }
 0xd3f   : > { %3604 = vmatprep.subr.bf16.mxu1 %v4024_v8 }
 0xd42   : > { %3605 = vmatpush3.bf16.msra.mxu1 %v4514_v24 }
 0xd43   : > { %3636 = vmatprep.subr.bf16.mxu1 %v4024_v8 }
 0xd45   : > { %3607 = vmatmul.mubr.bf16.vlgmr.msra.gmra.mrb[56].mxu1 %v2936_v9 }
 0xd46   : > { %3637 = vmatpush3.bf16.msra.mxu1 %v4525_v26  ;;  %3638 = vmatprep.mubr.msk.bf16.mxu1 %vm4025_vm0, %v4024_v8 }
 0xd47   : > { %3642 = vmatprep.subr.bf16.mxu1 %v4024_v8 }
 0xdf8   : > { %v1875_v10 = vpop.f32.mrb[52].mxu1 }
 0xdf9   : > { %v1876_v11 = vadd.f32 %v4594_v55, %v1875_v10  ;;  %v3588_v12 = vpop.f32.mrb[53].mxu1 }
 0xdfa   : > { %v1878_v13 = vpop.f32.mrb[54].mxu1 }
 0xdfb   : > { %v1881_v14 = vmax.f32 %v1876_v11, 0.0  ;;  %v3589_v0 = vpop.f32.mrb[55].mxu1 }
 0xdfd   : > { %v1882_v1 = vmax.f32 %v1793_v57, %v1881_v14 }
 0xe18   : > { %v1919_v15 = vpop.f32.mrb[56].mxu1 }
 0xe19   : > { %v1920_v2 = vadd.f32 %v4539_v34, %v1919_v15  ;;  %v3608_v3 = vpop.f32.mrb[57].mxu1  ;;  %v2944_v15 = vld [vmem:[%s4189_s30 + $0x28] sm:$0xf] }
 0xe1a   : > { %v1922_v16 = vpop.f32.mrb[58].mxu1 }
 0xe1b   : > { %v1925_v4 = vmax.f32 %v1920_v2, 0.0  ;;  %v3609_v5 = vpop.f32.mrb[59].mxu1 }
 0xe1d   : > { %v1926_v7 = vpack.c.bf16 %v1925_v4, %v1925_v4 }
 0xe1f   : > { %3613 = vmatmul.mubr.msk.bf16.vlgmr.msra.gmra.mrb[56].mxu0 %vm596_vm1, %v1926_v7 }
 0xe20   : > { %3617 = vmatpush3.bf16.msra.mxu0 %v4463_v6  ;;  %3632 = vmatprep.mubr.msk.bf16.mxu0 %vm4025_vm0, %v4024_v8 }
 0xe21   : > { %3618 = vmatprep.subr.bf16.mxu0 %v4024_v8 }
 0xe24   : > { %3619 = vmatpush3.bf16.msra.mxu0 %v4470_v17 }
 0xe25   : > { %3620 = vmatprep.subr.bf16.mxu0 %v4024_v8 }
 0xe28   : > { %3621 = vmatpush3.bf16.msra.mxu0 %v4479_v19 }
 0xe29   : > { %3622 = vmatprep.subr.bf16.mxu0 %v4024_v8 }
 0xe2c   : > { %3623 = vmatpush3.bf16.msra.mxu0 %v4486_v20 }
 0xe2d   : > { %3624 = vmatprep.subr.bf16.mxu0 %v4024_v8 }
 0xe30   : > { %3625 = vmatpush3.bf16.msra.mxu0 %v4493_v21 }
 0xe31   : > { %3626 = vmatprep.subr.bf16.mxu0 %v4024_v8 }
 0xe34   : > { %3627 = vmatpush3.bf16.msra.mxu0 %v4500_v22 }
 0xe35   : > { %3628 = vmatprep.subr.bf16.mxu0 %v4024_v8 }
 0xe38   : > { %3629 = vmatpush3.bf16.msra.mxu0 %v4507_v23 }
 0xe39   : > { %3630 = vmatprep.subr.bf16.mxu0 %v4024_v8 }
 0xe3c   : > { %3631 = vmatpush3.bf16.msra.mxu0 %v4514_v24 }
 0xe3d   : > { %3662 = vmatprep.subr.bf16.mxu0 %v4024_v8 }
 0xe3f   : > { %3633 = vmatmul.mubr.bf16.vlgmr.msra.gmra.mrb[60].mxu0 %v2938_v25 }
 0xe40   : > { %3663 = vmatpush3.bf16.msra.mxu0 %v4525_v26  ;;  %3664 = vmatprep.mubr.msk.bf16.mxu0 %vm4025_vm0, %v4024_v8 }
 0xe41   : > { %3668 = vmatprep.subr.bf16.mxu0 %v4024_v8 }
 0xef2   : > { %v1964_v27 = vpop.f32.mrb[56].mxu0 }
 0xef3   : > { %v1965_v28 = vadd.f32 %v4594_v55, %v1964_v27  ;;  %v3614_v29 = vpop.f32.mrb[57].mxu0 }
 0xef4   : > { %v1967_v30 = vpop.f32.mrb[58].mxu0 }
 0xef5   : > { %v1970_v31 = vmax.f32 %v1965_v28, 0.0  ;;  %v3615_v32 = vpop.f32.mrb[59].mxu0 }
 0xef7   : > { %v1971_v33 = vmax.f32 %v1882_v1, %v1970_v31 }
 0xf12   : > { %v2008_v35 = vpop.f32.mrb[60].mxu0 }
 0xf13   : > { %v2009_v36 = vadd.f32 %v4539_v34, %v2008_v35  ;;  %v3634_v37 = vpop.f32.mrb[61].mxu0  ;;  %v2946_v35 = vld [vmem:[%s4189_s30 + $0x2c] sm:$0xf] }
 0xf14   : > { %v2011_v38 = vpop.f32.mrb[62].mxu0 }
 0xf15   : > { %v2014_v48 = vmax.f32 %v2009_v36, 0.0  ;;  %v3635_v39 = vpop.f32.mrb[63].mxu0 }
 0xf17   : > { %v2015_v40 = vpack.c.bf16 %v2014_v48, %v2014_v48 }
 0xf19   : > { %3639 = vmatmul.mubr.msk.bf16.vlgmr.msra.gmra.mrb[60].mxu1 %vm596_vm1, %v2015_v40 }
 0xf1a   : > { %3643 = vmatpush3.bf16.msra.mxu1 %v4463_v6  ;;  %3658 = vmatprep.mubr.msk.bf16.mxu1 %vm4025_vm0, %v4024_v8 }
 0xf1b   : > { %3644 = vmatprep.subr.bf16.mxu1 %v4024_v8 }
 0xf1e   : > { %3645 = vmatpush3.bf16.msra.mxu1 %v4470_v17 }
 0xf1f   : > { %3646 = vmatprep.subr.bf16.mxu1 %v4024_v8 }
 0xf22   : > { %3647 = vmatpush3.bf16.msra.mxu1 %v4479_v19 }
 0xf23   : > { %3648 = vmatprep.subr.bf16.mxu1 %v4024_v8 }
 0xf26   : > { %3649 = vmatpush3.bf16.msra.mxu1 %v4486_v20 }
 0xf27   : > { %3650 = vmatprep.subr.bf16.mxu1 %v4024_v8 }
 0xf2a   : > { %3651 = vmatpush3.bf16.msra.mxu1 %v4493_v21 }
 0xf2b   : > { %3652 = vmatprep.subr.bf16.mxu1 %v4024_v8 }
 0xf2e   : > { %3653 = vmatpush3.bf16.msra.mxu1 %v4500_v22 }
 0xf2f   : > { %3654 = vmatprep.subr.bf16.mxu1 %v4024_v8 }
 0xf32   : > { %3655 = vmatpush3.bf16.msra.mxu1 %v4507_v23 }
 0xf33   : > { %3656 = vmatprep.subr.bf16.mxu1 %v4024_v8 }
 0xf36   : > { %3657 = vmatpush3.bf16.msra.mxu1 %v4514_v24 }
 0xf37   : > { %3688 = vmatprep.subr.bf16.mxu1 %v4024_v8 }
 0xf39   : > { %3659 = vmatmul.mubr.bf16.vlgmr.msra.gmra.mrb[64].mxu1 %v2940_v41 }
 0xf3a   : > { %3689 = vmatpush3.bf16.msra.mxu1 %v4525_v26  ;;  %3690 = vmatprep.mubr.msk.bf16.mxu1 %vm4025_vm0, %v4024_v8 }
 0xf3b   : > { %3694 = vmatprep.subr.bf16.mxu1 %v4024_v8 }
 0xfec   : > { %v2053_v42 = vpop.f32.mrb[60].mxu1 }
 0xfed   : > { %v2054_v43 = vadd.f32 %v4594_v55, %v2053_v42  ;;  %v3640_v44 = vpop.f32.mrb[61].mxu1 }
 0xfee   : > { %v2056_v45 = vpop.f32.mrb[62].mxu1 }
 0xfef   : > { %v2059_v46 = vmax.f32 %v2054_v43, 0.0  ;;  %v3641_v47 = vpop.f32.mrb[63].mxu1 }
 0xff1   : > { %v2060_v49 = vmax.f32 %v1971_v33, %v2059_v46 }
0x100c   : > { %v2097_v50 = vpop.f32.mrb[64].mxu1 }
0x100d   : > { %v2098_v51 = vadd.f32 %v4539_v34, %v2097_v50  ;;  %v3660_v52 = vpop.f32.mrb[65].mxu1  ;;  %v2948_v50 = vld [vmem:[%s4189_s30 + $0x30] sm:$0xf] }
0x100e   : > { %v2100_v53 = vpop.f32.mrb[66].mxu1 }
0x100f   : > { %v2103_v54 = vmax.f32 %v2098_v51, 0.0  ;;  %v3661_v56 = vpop.f32.mrb[67].mxu1 }
0x1011   : > { %v2104_v57 = vpack.c.bf16 %v2103_v54, %v2103_v54 }
0x1013   : > { %3665 = vmatmul.mubr.msk.bf16.vlgmr.msra.gmra.mrb[64].mxu0 %vm596_vm1, %v2104_v57 }
0x1014   : > { %3669 = vmatpush3.bf16.msra.mxu0 %v4463_v6  ;;  %3684 = vmatprep.mubr.msk.bf16.mxu0 %vm4025_vm0, %v4024_v8 }
0x1015   : > { %3670 = vmatprep.subr.bf16.mxu0 %v4024_v8 }
0x1018   : > { %3671 = vmatpush3.bf16.msra.mxu0 %v4470_v17 }
0x1019   : > { %3672 = vmatprep.subr.bf16.mxu0 %v4024_v8 }
0x101c   : > { %3673 = vmatpush3.bf16.msra.mxu0 %v4479_v19 }
0x101d   : > { %3674 = vmatprep.subr.bf16.mxu0 %v4024_v8 }
0x1020   : > { %3675 = vmatpush3.bf16.msra.mxu0 %v4486_v20 }
0x1021   : > { %3676 = vmatprep.subr.bf16.mxu0 %v4024_v8 }
0x1024   : > { %3677 = vmatpush3.bf16.msra.mxu0 %v4493_v21 }
0x1025   : > { %3678 = vmatprep.subr.bf16.mxu0 %v4024_v8 }
0x1028   : > { %3679 = vmatpush3.bf16.msra.mxu0 %v4500_v22 }
0x1029   : > { %3680 = vmatprep.subr.bf16.mxu0 %v4024_v8 }
0x102c   : > { %3681 = vmatpush3.bf16.msra.mxu0 %v4507_v23 }
0x102d   : > { %3682 = vmatprep.subr.bf16.mxu0 %v4024_v8 }
0x1030   : > { %3683 = vmatpush3.bf16.msra.mxu0 %v4514_v24 }
0x1031   : > { %3714 = vmatprep.subr.bf16.mxu0 %v4024_v8 }
0x1033   : > { %3685 = vmatmul.mubr.bf16.vlgmr.msra.gmra.mrb[68].mxu0 %v2942_v58 }
0x1034   : > { %3715 = vmatpush3.bf16.msra.mxu0 %v4525_v26  ;;  %3716 = vmatprep.mubr.msk.bf16.mxu0 %vm4025_vm0, %v4024_v8 }
0x1035   : > { %3720 = vmatprep.subr.bf16.mxu0 %v4024_v8 }
0x10e6   : > { %v2142_v59 = vpop.f32.mrb[64].mxu0 }
0x10e7   : > { %v2143_v60 = vadd.f32 %v4594_v55, %v2142_v59  ;;  %v3666_v61 = vpop.f32.mrb[65].mxu0 }
0x10e8   : > { %v2145_v62 = vpop.f32.mrb[66].mxu0 }
0x10e9   : > { %v2148_v18 = vmax.f32 %v2143_v60, 0.0  ;;  %v3667_v63 = vpop.f32.mrb[67].mxu0 }
0x10eb   : > { %v2149_v9 = vmax.f32 %v2060_v49, %v2148_v18 }
0x1106   : > { %v2186_v10 = vpop.f32.mrb[68].mxu0 }
0x1107   : > { %v2187_v11 = vadd.f32 %v4539_v34, %v2186_v10  ;;  %v3686_v12 = vpop.f32.mrb[69].mxu0 }
0x1108   : > { %v2189_v13 = vpop.f32.mrb[70].mxu0 }
0x1109   : > { %v2192_v14 = vmax.f32 %v2187_v11, 0.0  ;;  %v3687_v0 = vpop.f32.mrb[71].mxu0 }
0x110b   : > { %v2193_v1 = vpack.c.bf16 %v2192_v14, %v2192_v14 }
0x110d   : > { %3691 = vmatmul.mubr.msk.bf16.vlgmr.msra.gmra.mrb[68].mxu1 %vm596_vm1, %v2193_v1  ;;  %v3914_v1 = vld [vmem:[%s4999_s6] sm:$0xff]  }
0x110e   : > { %3695 = vmatpush3.bf16.msra.mxu1 %v4463_v6  ;;  %3710 = vmatprep.mubr.msk.bf16.mxu1 %vm4025_vm0, %v4024_v8 }
0x110f   : > { %3696 = vmatprep.subr.bf16.mxu1 %v4024_v8 }
0x1112   : > { %3697 = vmatpush3.bf16.msra.mxu1 %v4470_v17 }
0x1113   : > { %3698 = vmatprep.subr.bf16.mxu1 %v4024_v8 }
0x1116   : > { %3699 = vmatpush3.bf16.msra.mxu1 %v4479_v19 }
0x1117   : > { %3700 = vmatprep.subr.bf16.mxu1 %v4024_v8 }
0x111a   : > { %3701 = vmatpush3.bf16.msra.mxu1 %v4486_v20 }
0x111b   : > { %3702 = vmatprep.subr.bf16.mxu1 %v4024_v8 }
0x111e   : > { %3703 = vmatpush3.bf16.msra.mxu1 %v4493_v21 }
0x111f   : > { %3704 = vmatprep.subr.bf16.mxu1 %v4024_v8 }
0x1122   : > { %3705 = vmatpush3.bf16.msra.mxu1 %v4500_v22 }
0x1123   : > { %3706 = vmatprep.subr.bf16.mxu1 %v4024_v8 }
0x1126   : > { %3707 = vmatpush3.bf16.msra.mxu1 %v4507_v23 }
0x1127   : > { %3708 = vmatprep.subr.bf16.mxu1 %v4024_v8 }
0x112a   : > { %3709 = vmatpush3.bf16.msra.mxu1 %v4514_v24 }
0x112b   : > { %3740 = vmatprep.subr.bf16.mxu1 %v4024_v8 }
0x112d   : > { %3711 = vmatmul.mubr.bf16.vlgmr.msra.gmra.mrb[72].mxu1 %v2944_v15  ;;  %v3916_v15 = vld [vmem:[%s4999_s6 + $0x10] sm:$0xff]  }
0x112e   : > { %3741 = vmatpush3.bf16.msra.mxu1 %v4525_v26  ;;  %3742 = vmatprep.mubr.msk.bf16.mxu1 %vm4025_vm0, %v4024_v8 }
0x112f   : > { %3746 = vmatprep.subr.bf16.mxu1 %v4024_v8 }
0x11e0   : > { %v2231_v2 = vpop.f32.mrb[68].mxu1 }
0x11e1   : > { %v2232_v3 = vadd.f32 %v4594_v55, %v2231_v2  ;;  %v3692_v16 = vpop.f32.mrb[69].mxu1  ;;  %v3917_v2 = vld [vmem:[%s4999_s6 + $0x18] sm:$0xff]  }
0x11e2   : > { %v2234_v4 = vpop.f32.mrb[70].mxu1  ;;  %v3919_v16 = vld [vmem:[%s4999_s6 + $0x28] sm:$0xff]  }
0x11e3   : > { %v2237_v5 = vmax.f32 %v2232_v3, 0.0  ;;  %v3693_v7 = vpop.f32.mrb[71].mxu1  ;;  %v3918_v3 = vld [vmem:[%s4999_s6 + $0x20] sm:$0xff]   ;;  %v3920_v4 = vld [vmem:[%s4999_s6 + $0x30] sm:$0xff]  }
0x11e4   : > { %v2952_v7 = vld [vmem:[%s4189_s30 + $0x38] sm:$0xf] }
0x11e5   : > { %v2238_v25 = vmax.f32 %v2149_v9, %v2237_v5  ;;  %v3921_v5 = vld [vmem:[%s4999_s6 + $0x38] sm:$0xff]  }
0x1200   : > { %v2275_v27 = vpop.f32.mrb[72].mxu1 }
0x1201   : > { %v2276_v28 = vadd.f32 %v4539_v34, %v2275_v27  ;;  %v3712_v29 = vpop.f32.mrb[73].mxu1 }
0x1202   : > { %v2278_v30 = vpop.f32.mrb[74].mxu1 }
0x1203   : > { %v2281_v31 = vmax.f32 %v2276_v28, 0.0  ;;  %v3713_v32 = vpop.f32.mrb[75].mxu1 }
0x1205   : > { %v2282_v33 = vpack.c.bf16 %v2281_v31, %v2281_v31 }
0x1207   : > { %3717 = vmatmul.mubr.msk.bf16.vlgmr.msra.gmra.mrb[72].mxu0 %vm596_vm1, %v2282_v33 }
0x1208   : > { %3721 = vmatpush3.bf16.msra.mxu0 %v4463_v6  ;;  %3736 = vmatprep.mubr.msk.bf16.mxu0 %vm4025_vm0, %v4024_v8 }
0x1209   : > { %3722 = vmatprep.subr.bf16.mxu0 %v4024_v8 }
0x120c   : > { %3723 = vmatpush3.bf16.msra.mxu0 %v4470_v17 }
0x120d   : > { %3724 = vmatprep.subr.bf16.mxu0 %v4024_v8 }
0x1210   : > { %3725 = vmatpush3.bf16.msra.mxu0 %v4479_v19 }
0x1211   : > { %3726 = vmatprep.subr.bf16.mxu0 %v4024_v8 }
0x1214   : > { %3727 = vmatpush3.bf16.msra.mxu0 %v4486_v20 }
0x1215   : > { %3728 = vmatprep.subr.bf16.mxu0 %v4024_v8 }
0x1218   : > { %3729 = vmatpush3.bf16.msra.mxu0 %v4493_v21 }
0x1219   : > { %3730 = vmatprep.subr.bf16.mxu0 %v4024_v8 }
0x121c   : > { %3731 = vmatpush3.bf16.msra.mxu0 %v4500_v22 }
0x121d   : > { %3732 = vmatprep.subr.bf16.mxu0 %v4024_v8 }
0x1220   : > { %3733 = vmatpush3.bf16.msra.mxu0 %v4507_v23 }
0x1221   : > { %3734 = vmatprep.subr.bf16.mxu0 %v4024_v8 }
0x1224   : > { %3735 = vmatpush3.bf16.msra.mxu0 %v4514_v24 }
0x1225   : > { %3766 = vmatprep.subr.bf16.mxu0 %v4024_v8 }
0x1227   : > { %3737 = vmatmul.mubr.bf16.vlgmr.msra.gmra.mrb[76].mxu0 %v2946_v35 }
0x1228   : > { %3767 = vmatpush3.bf16.msra.mxu0 %v4525_v26  ;;  %3768 = vmatprep.mubr.msk.bf16.mxu0 %vm4025_vm0, %v4024_v8 }
0x1229   : > { %3772 = vmatprep.subr.bf16.mxu0 %v4024_v8 }
0x12da   : > { %v2320_v36 = vpop.f32.mrb[72].mxu0 }
0x12db   : > { %v2321_v37 = vadd.f32 %v4594_v55, %v2320_v36  ;;  %v3718_v38 = vpop.f32.mrb[73].mxu0  ;;  %v3923_v36 = vld [vmem:[%s5000_s7] ss:$0 sm:$0xff] }
0x12dc   : > { %v2323_v48 = vpop.f32.mrb[74].mxu0 }
0x12dd   : > { %v2326_v39 = vmax.f32 %v2321_v37, 0.0  ;;  %v3719_v40 = vpop.f32.mrb[75].mxu0 }
0x12df   : > { %v2327_v41 = vmax.f32 %v2238_v25, %v2326_v39  ;;  %v3922_v25 = vld [vmem:[%s5001_s8] sm:$0xff]  }
0x12fa   : > { %v2364_v42 = vpop.f32.mrb[76].mxu0 }
0x12fb   : > { %v2365_v43 = vadd.f32 %v4539_v34, %v2364_v42  ;;  %v3738_v44 = vpop.f32.mrb[77].mxu0  ;;  %v2954_v42 = vld [vmem:[%s4189_s30 + $0x3c] sm:$0xf] }
0x12fc   : > { %v2367_v45 = vpop.f32.mrb[78].mxu0 }
0x12fd   : > { %v2370_v46 = vmax.f32 %v2365_v43, 0.0  ;;  %v3739_v47 = vpop.f32.mrb[79].mxu0 }
0x12ff   : > { %v2371_v49 = vpack.c.bf16 %v2370_v46, %v2370_v46 }
0x1301   : > { %3743 = vmatmul.mubr.msk.bf16.vlgmr.msra.gmra.mrb[76].mxu1 %vm596_vm1, %v2371_v49 }
0x1302   : > { %3747 = vmatpush3.bf16.msra.mxu1 %v4463_v6  ;;  %3762 = vmatprep.mubr.msk.bf16.mxu1 %vm4025_vm0, %v4024_v8 }
0x1303   : > { %3748 = vmatprep.subr.bf16.mxu1 %v4024_v8 }
0x1306   : > { %3749 = vmatpush3.bf16.msra.mxu1 %v4470_v17 }
0x1307   : > { %3750 = vmatprep.subr.bf16.mxu1 %v4024_v8 }
0x130a   : > { %3751 = vmatpush3.bf16.msra.mxu1 %v4479_v19 }
0x130b   : > { %3752 = vmatprep.subr.bf16.mxu1 %v4024_v8 }
0x130e   : > { %3753 = vmatpush3.bf16.msra.mxu1 %v4486_v20 }
0x130f   : > { %3754 = vmatprep.subr.bf16.mxu1 %v4024_v8 }
0x1312   : > { %3755 = vmatpush3.bf16.msra.mxu1 %v4493_v21 }
0x1313   : > { %3756 = vmatprep.subr.bf16.mxu1 %v4024_v8 }
0x1316   : > { %3757 = vmatpush3.bf16.msra.mxu1 %v4500_v22 }
0x1317   : > { %3758 = vmatprep.subr.bf16.mxu1 %v4024_v8 }
0x131a   : > { %3759 = vmatpush3.bf16.msra.mxu1 %v4507_v23 }
0x131b   : > { %3760 = vmatprep.subr.bf16.mxu1 %v4024_v8 }
0x131e   : > { %3761 = vmatpush3.bf16.msra.mxu1 %v4514_v24 }
0x131f   : > { %3792 = vmatprep.subr.bf16.mxu1 %v4024_v8 }
0x1321   : > { %3763 = vmatmul.mubr.bf16.vlgmr.msra.gmra.mrb[80].mxu1 %v2948_v50 }
0x1322   : > { %3793 = vmatpush3.bf16.msra.mxu1 %v4525_v26  ;;  %3794 = vmatprep.mubr.msk.bf16.mxu1 %vm4025_vm0, %v4024_v8 }
0x1323   : > { %3798 = vmatprep.subr.bf16.mxu1 %v4024_v8 }
0x13d4   : > { %v2409_v51 = vpop.f32.mrb[76].mxu1 }
0x13d5   : > { %v2410_v52 = vadd.f32 %v4594_v55, %v2409_v51  ;;  %v3744_v53 = vpop.f32.mrb[77].mxu1 }
0x13d6   : > { %v2412_v54 = vpop.f32.mrb[78].mxu1 }
0x13d7   : > { %v2415_v56 = vmax.f32 %v2410_v52, 0.0  ;;  %v3745_v57 = vpop.f32.mrb[79].mxu1 }
0x13d9   : > { %v2416_v58 = vmax.f32 %v2327_v41, %v2415_v56 }
0x13f4   : > { %v2453_v59 = vpop.f32.mrb[80].mxu1 }
0x13f5   : > { %v2454_v60 = vadd.f32 %v4539_v34, %v2453_v59  ;;  %v3764_v61 = vpop.f32.mrb[81].mxu1 }
0x13f6   : > { %v2456_v62 = vpop.f32.mrb[82].mxu1 }
0x13f7   : > { %v2459_v18 = vmax.f32 %v2454_v60, 0.0  ;;  %v3765_v63 = vpop.f32.mrb[83].mxu1 }
0x13f9   : > { %v2460_v9 = vpack.c.bf16 %v2459_v18, %v2459_v18 }
0x13fb   : > { %3769 = vmatmul.mubr.msk.bf16.vlgmr.msra.gmra.mrb[80].mxu0 %vm596_vm1, %v2460_v9 }
0x13fc   : > { %3773 = vmatpush3.bf16.msra.mxu0 %v4463_v6  ;;  %3788 = vmatprep.mubr.msk.bf16.mxu0 %vm4025_vm0, %v4024_v8  ;;  %v2950_v6 = vld [vmem:[%s4189_s30 + $0x34] sm:$0xf]  ;;  %s2961_s30 = sshll.u32 %s4103_s17, 8  ;;  %s4026_s17 = smov [#allocation6]  }
0x13fd   : > { %3774 = vmatprep.subr.bf16.mxu0 %v4024_v8  ;;  %s4949_s12 = scalar_lea.hbm %s5003_s10, %s2961_s30  ;;  %s3956_s22 = sshll.u32 %s4026_s17, 4  ;;  %s3957_s22 = int_to_ptr.vmem [resolvable:$false] %s3956_s22 }
0x13fe   : > { %s3958_s27 = scalar_lea.vmem %s3957_s22, 512  ;;  %p3959_p7 = scmp.lt.s32.totalorder %s4951_s20, %s3957_s22 }
0x13ff   : > { %p3960_p8 = scmp.lt.s32.totalorder %s3958_s27, %s3952_s24 }
0x1400   : > { %3775 = vmatpush3.bf16.msra.mxu0 %v4470_v17 }
0x1401   : > { %3776 = vmatprep.subr.bf16.mxu0 %v4024_v8  ;;  %p3961_p11 = por %p3960_p8, %p3959_p7 }
0x1403   : > { %p3962_p12 = pnand %p3961_p11, %p3955_p10 }
0x1404   : > { %3777 = vmatpush3.bf16.msra.mxu0 %v4479_v19 }
0x1405   : > { %3778 = vmatprep.subr.bf16.mxu0 %v4024_v8 }
0x1408   : > { %3779 = vmatpush3.bf16.msra.mxu0 %v4486_v20 }
0x1409   : > { %3780 = vmatprep.subr.bf16.mxu0 %v4024_v8 }
0x140c   : > { %3781 = vmatpush3.bf16.msra.mxu0 %v4493_v21 }
0x140d   : > { %3782 = vmatprep.subr.bf16.mxu0 %v4024_v8 }
0x1410   : > { %3783 = vmatpush3.bf16.msra.mxu0 %v4500_v22 }
0x1411   : > { %3784 = vmatprep.subr.bf16.mxu0 %v4024_v8 }
0x1414   : > { %3785 = vmatpush3.bf16.msra.mxu0 %v4507_v23 }
0x1415   : > { %3786 = vmatprep.subr.bf16.mxu0 %v4024_v8 }
0x1418   : > { %3787 = vmatpush3.bf16.msra.mxu0 %v4514_v24 }
0x1419   : > { %3818 = vmatprep.subr.bf16.mxu0 %v4024_v8 }
0x141b   : > { %3789 = vmatmul.mubr.bf16.vlgmr.msra.gmra.mrb[84].mxu0 %v2950_v6 }
0x141c   : > { %3819 = vmatpush3.bf16.msra.mxu0 %v4525_v26  ;;  %3820 = vmatprep.mubr.msk.bf16.mxu0 %vm4025_vm0, %v4024_v8 }
0x141d   : > { %3824 = vmatprep.subr.bf16.mxu0 %v4024_v8 }
0x14ce   : > { %v2498_v17 = vpop.f32.mrb[80].mxu0 }
0x14cf   : > { %v2499_v19 = vadd.f32 %v4594_v55, %v2498_v17  ;;  %v3770_v20 = vpop.f32.mrb[81].mxu0 }
0x14d0   : > { %v2501_v21 = vpop.f32.mrb[82].mxu0 }
0x14d1   : > { %v2504_v22 = vmax.f32 %v2499_v19, 0.0  ;;  %v3771_v23 = vpop.f32.mrb[83].mxu0 }
0x14d3   : > { %v2505_v10 = vmax.f32 %v2416_v58, %v2504_v22 }
0x14ee   : > { %v2542_v24 = vpop.f32.mrb[84].mxu0 }
0x14ef   : > { %v2543_v11 = vadd.f32 %v4539_v34, %v2542_v24  ;;  %v3790_v12 = vpop.f32.mrb[85].mxu0  ;;  %v3915_v34 = vld [vmem:[%s4999_s6 + $0x8] sm:$0xff]  }
0x14f0   : > { %v2545_v13 = vpop.f32.mrb[86].mxu0 }
0x14f1   : > { %v2548_v14 = vmax.f32 %v2543_v11, 0.0  ;;  %v3791_v26 = vpop.f32.mrb[87].mxu0 }
0x14f3   : > { %v2549_v0 = vpack.c.bf16 %v2548_v14, %v2548_v14 }
0x14f5   : > { %3795 = vmatmul.mubr.msk.bf16.vlgmr.msra.gmra.mrb[84].mxu1 %vm596_vm1, %v2549_v0 }
0x14f6   : > { %3799 = vmatpush3.bf16.msra.mxu1 %v3914_v1  ;;  %3814 = vmatprep.mubr.msk.bf16.mxu1 %vm4025_vm0, %v4024_v8 }
0x14f7   : > { %3800 = vmatprep.subr.bf16.mxu1 %v4024_v8 }
0x14fa   : > { %3801 = vmatpush3.bf16.msra.mxu1 %v3915_v34 }
0x14fb   : > { %3802 = vmatprep.subr.bf16.mxu1 %v4024_v8 }
0x14fe   : > { %3803 = vmatpush3.bf16.msra.mxu1 %v3916_v15 }
0x14ff   : > { %3804 = vmatprep.subr.bf16.mxu1 %v4024_v8 }
0x1502   : > { %3805 = vmatpush3.bf16.msra.mxu1 %v3917_v2 }
0x1503   : > { %3806 = vmatprep.subr.bf16.mxu1 %v4024_v8 }
0x1506   : > { %3807 = vmatpush3.bf16.msra.mxu1 %v3918_v3 }
0x1507   : > { %3808 = vmatprep.subr.bf16.mxu1 %v4024_v8 }
0x150a   : > { %3809 = vmatpush3.bf16.msra.mxu1 %v3919_v16 }
0x150b   : > { %3810 = vmatprep.subr.bf16.mxu1 %v4024_v8 }
0x150e   : > { %3811 = vmatpush3.bf16.msra.mxu1 %v3920_v4 }
0x150f   : > { %3812 = vmatprep.subr.bf16.mxu1 %v4024_v8 }
0x1512   : > { %3813 = vmatpush3.bf16.msra.mxu1 %v3921_v5 }
0x1513   : > { %3844 = vmatprep.subr.bf16.mxu1 %v4024_v8 }
0x1515   : > { %3815 = vmatmul.mubr.bf16.vlgmr.msra.gmra.mrb[88].mxu1 %v2952_v7 }
0x1516   : > { %3845 = vmatpush3.bf16.msra.mxu1 %v3922_v25  ;;  %3846 = vmatprep.mubr.msk.bf16.mxu1 %vm4025_vm0, %v4024_v8 }
0x15c8   : > { %v2587_v27 = vpop.f32.mrb[84].mxu1 }
0x15c9   : > { %v2588_v28 = vadd.f32 %v4594_v55, %v2587_v27  ;;  %v3796_v29 = vpop.f32.mrb[85].mxu1 }
0x15ca   : > { %v2590_v30 = vpop.f32.mrb[86].mxu1 }
0x15cb   : > { %v2593_v31 = vmax.f32 %v2588_v28, 0.0  ;;  %v3797_v32 = vpop.f32.mrb[87].mxu1 }
0x15cd   : > { %v2594_v33 = vmax.f32 %v2505_v10, %v2593_v31 }
0x15e8   : > { %v2631_v35 = vpop.f32.mrb[88].mxu1 }
0x15e9   : > { %v2632_v37 = vadd.f32 %v3923_v36, %v2631_v35  ;;  %v3816_v38 = vpop.f32.mrb[89].mxu1 }
0x15ea   : > { %v2634_v48 = vpop.f32.mrb[90].mxu1 }
0x15eb   : > { %v2637_v39 = vmax.f32 %v2632_v37, 0.0  ;;  %v3817_v40 = vpop.f32.mrb[91].mxu1 }
0x15ed   : > { %v2638_v41 = vpack.c.bf16 %v2637_v39, %v2637_v39 }
0x15ef   : > { %3821 = vmatmul.mubr.msk.bf16.vlgmr.msra.gmra.mrb[88].mxu0 %vm596_vm1, %v2638_v41 }
0x15f0   : > { %3825 = vmatpush3.bf16.msra.mxu0 %v3914_v1  ;;  %3840 = vmatprep.mubr.msk.bf16.mxu0 %vm4025_vm0, %v4024_v8 }
0x15f1   : > { %3826 = vmatprep.subr.bf16.mxu0 %v4024_v8 }
0x15f4   : > { %3827 = vmatpush3.bf16.msra.mxu0 %v3915_v34 }
0x15f5   : > { %3828 = vmatprep.subr.bf16.mxu0 %v4024_v8 }
0x15f8   : > { %3829 = vmatpush3.bf16.msra.mxu0 %v3916_v15 }
0x15f9   : > { %3830 = vmatprep.subr.bf16.mxu0 %v4024_v8 }
0x15fc   : > { %3831 = vmatpush3.bf16.msra.mxu0 %v3917_v2 }
0x15fd   : > { %3832 = vmatprep.subr.bf16.mxu0 %v4024_v8 }
0x1600   : > { %3833 = vmatpush3.bf16.msra.mxu0 %v3918_v3 }
0x1601   : > { %3834 = vmatprep.subr.bf16.mxu0 %v4024_v8 }
0x1604   : > { %3835 = vmatpush3.bf16.msra.mxu0 %v3919_v16 }
0x1605   : > { %3836 = vmatprep.subr.bf16.mxu0 %v4024_v8 }
0x1608   : > { %3837 = vmatpush3.bf16.msra.mxu0 %v3920_v4 }
0x1609   : > { %3838 = vmatprep.subr.bf16.mxu0 %v4024_v8 }
0x160c   : > { %3839 = vmatpush3.bf16.msra.mxu0 %v3921_v5 }
0x160f   : > { %3841 = vmatmul.mubr.bf16.vlgmr.msra.gmra.mrb[92].mxu0 %v2954_v42 }
0x16c2   : > { %v2676_v43 = vpop.f32.mrb[88].mxu0 }
0x16c3   : > { %v2677_v44 = vadd.f32 %v4594_v55, %v2676_v43  ;;  %v3822_v45 = vpop.f32.mrb[89].mxu0 }
0x16c4   : > { %v2679_v46 = vpop.f32.mrb[90].mxu0 }
0x16c5   : > { %v2682_v47 = vmax.f32 %v2677_v44, 0.0  ;;  %v3823_v49 = vpop.f32.mrb[91].mxu0 }
0x16c7   : > { %v2683_v50 = vmax.f32 %v2594_v33, %v2682_v47 }
0x16e2   : > { %v2720_v51 = vpop.f32.mrb[92].mxu0 }
0x16e3   : > { %v2721_v52 = vadd.f32 %v3923_v36, %v2720_v51  ;;  %v3842_v53 = vpop.f32.mrb[93].mxu0 }
0x16e4   : > { %v2723_v54 = vpop.f32.mrb[94].mxu0 }
0x16e5   : > { %v2726_v56 = vmax.f32 %v2721_v52, 0.0  ;;  %v3843_v8 = vpop.f32.mrb[95].mxu0 }
0x16e7   : > { %v2727_v57 = vpack.c.bf16 %v2726_v56, %v2726_v56 }
0x16e9   : > { %3847 = vmatmul.mubr.msk.bf16.vlgmr.msra.gmra.mrb[92].mxu1 %vm596_vm1, %v2727_v57 }
0x17bc   : > { %v2765_v58 = vpop.f32.mrb[92].mxu1 }
0x17bd   : > { %v2766_v59 = vadd.f32 %v4594_v55, %v2765_v58  ;;  %v3848_v60 = vpop.f32.mrb[93].mxu1 }
0x17be   : > { %v2768_v61 = vpop.f32.mrb[94].mxu1 }
0x17bf   : > { %v2771_v62 = vmax.f32 %v2766_v59, 0.0  ;;  %v3849_v18 = vpop.f32.mrb[95].mxu1 }
0x17c1   : > { %v2772_v63 = vmax.f32 %v2683_v50, %v2771_v62 }
0x17c3   : > { %2773 = vst [vmem:[%s4533_s11 + $0x8] sm:$0xff] %v2772_v63 }
0x17c4   : > { %3965 = shalt.err (!%p3962_p12)
}
0x17c5   : > { %s3966_s28 = scalar_lea.hbm %s4949_s12, 256  ;;  %s3970_s21 = scalar_lea.hbm %s5003_s10, 1024 }
0x17c6   : > { %p3967_p13 = scmp.ne.s32.totalorder %s4949_s12, %s3966_s28  ;;  %p3971_p0 = scmp.lt.u32.totalorder %s4949_s12, %s5003_s10 }
0x17c7   : > { %p3972_p3 = scmp.lt.u32.totalorder %s3970_s21, %s3966_s28  ;;  %p3974_p5 = scmp.lt.u32.totalorder %s3966_s28, %s4949_s12 }
0x17c8   : > { %p3968_p1 = pnand %p3967_p13, %p5014_p6 }
0x17c9   : > { %p3973_p4 = por %p3972_p3, %p3971_p0 }
0x17ca   : > { %p3969_p2 = pneg %p3968_p1 }
0x17cb   : > { %p3975_p9 = por %p3974_p5, %p3973_p4 }
0x17cd   : > { %p3976_p10 = pnand %p3975_p9, %p3969_p2 }
0x17cf   : > { %3979 = shalt.err (!%p3976_p10)
}
0x17d0   : > { %3852 = dma.vmem_to_hbm [thread:$0]  (%p5014_p6), %s4951_s20, 256, %s4949_s12, %s2775_s18  }
0x17d1 PF: > { %p3858_p7 = scmp.ge.s32.totalorder %s4018_s16, 2  ;;  %s2801_s23 = sand.u32 1, %s4006_s13  }
0x17d2   : > { %p5015_p8 = scmp.ne.s32.totalorder %s5012_s26, 0  ;;  %s2802_s15 = scalar_lea.sflag [#allocation5], %s2801_s23 }
0x17d4   : > { %p3855_p11 = pnand %p3858_p7, %p5015_p8 }
0x17d6   : > { %4001 = dma.done.wait (!%p3855_p11), %s2802_s15, 256  }
0x17d7   : > { %4003 = vsyncadd (!%p3855_p11), %s2802_s15, 4294967040  ;;  %s5016_s24 = sld [smem:[#allocation9_spill]]  ;;  %s5017_s15 = sld [smem:[#allocation10_spill]] }
0x17d8   : > { %p23_p12 = scmp.ge.s32.totalorder %s4107_s19, 6   ;;  %s5018_s13 = smov %s4010_s14 }
0x17d9   : > { %s5020_s16 = smov %s4107_s19 }
0x17da   :  { %25 = sbr.rel (!%p23_p12) target bundleno = 7 (0x7), region = 176 }
0x17dd   : > { %s5019_s14 = smov %s5016_s24 }
0x17e1   :  { %2807 = vsyncpa [#allocation4], 1 }
0x17e2   :  { %2809 = vsyncpa [#allocation4 + $0x1], 1 }
0x17e3   :  { %2810 = vsyncpa [#allocation5], 1 }
0x17e4   :  { %2812 = vsyncpa [#allocation5 + $0x1], 1 }

// kernel: tpu_custom_call.1
= control target key start
LH: loop header
LB: loop body
LE: loop exit
PB: predicated region body
PF: predicated region fallthrough
CT: control target
= control target key end

     0   :  { %s4993_s0 = inlined_call_operand.vmem [shape: bf16[8,32,128], index: 0, kind: input, shape index: {}]   ;;  %s4994_s1 = inlined_call_operand.vmem [shape: bf16[128,16], index: 1, kind: input, shape index: {}]   ;;  %s4995_s2 = inlined_call_operand.vmem [shape: f32[1,16], index: 2, kind: input, shape index: {}]   ;;  %s4996_s3 = inlined_call_operand.vmem [shape: bf16[16,128], index: 3, kind: input, shape index: {}]   ;;  %s4997_s4 = inlined_call_operand.vmem [shape: f32[1,128], index: 4, kind: input, shape index: {}]   ;;  %s4998_s5 = inlined_call_operand.hbm [shape: bf16[16,32,128], index: 5, kind: input, shape index: {}]   ;;  %s4999_s6 = inlined_call_operand.vmem [shape: bf16[128,16], index: 6, kind: input, shape index: {}]   ;;  %s5000_s7 = inlined_call_operand.vmem [shape: f32[1,16], index: 7, kind: input, shape index: {}]   ;;  %s5001_s8 = inlined_call_operand.vmem [shape: bf16[16,128], index: 8, kind: input, shape index: {}]   ;;  %s5002_s9 = inlined_call_operand.vmem [shape: f32[1,128], index: 9, kind: input, shape index: {}]   ;;  %s5003_s10 = inlined_call_operand.hbm [shape: f32[32,256], index: 10, kind: output, shape index: {}]  }
   0x1   :  { %5006 = sst [smem:[#allocation11_spill]] %s4993_s0 }
   0x2   :  { %15 = vsyncpa [#allocation4], 0 }
   0x3   :  { %17 = vsyncpa [#allocation4 + $0x1], 0 }
   0x4   :  { %18 = vsyncpa [#allocation5], 0 }
   0x5   :  { %20 = vsyncpa [#allocation5 + $0x1], 0  ;;  %s4082_s13 = smov 0   ;;  %s4084_s14 = smov 0  }
   0x6   :  { %s4086_s15 = smov 0   ;;  %s4088_s16 = smov 0  }
   0x7 LB: > { %5007 = sst [smem:[#allocation9_spill]] %s4014_s15  ;;  %s4103_s17 = sadd.s32 4294967295, %s4018_s16   ;;  %s4018_s16 = sphi %s4088_s16, %s5020_s16   ;;  %s4014_s15 = sphi %s4086_s15, %s5017_s15   ;;  %s4010_s14 = sphi %s4084_s14, %s5019_s14   ;;  %s4006_s13 = sphi %s4082_s13, %s5018_s13  }
   0x8   : > { %s2877_s18 = sadd.s32 4294967294, %s4018_s16   ;;  %s4107_s19 = sadd.s32 1, %s4018_s16  }
   0x9   : > { %s33_s20 = sadd.s32 1, %s4014_s15  ;;  %s30_s21 = ssub.s32 %s4018_s16, %s4107_s19 }
   0xa   : > { %p40_p0 = scmp.ne.s32.totalorder %s4014_s15, %s4010_s14  ;;  %p31_p1 = scmp.eq.s32.totalorder %s30_s21, 0 }
   0xb   : > { %p41_p2 = scmp.eq.s32.totalorder %s4018_s16, 0  ;;  %p156_p3 = scmp.ne.s32.totalorder %s4010_s14, %s4006_s13 }
   0xc   : > { %p157_p4 = scmp.eq.s32.totalorder %s4103_s17, 0  ;;  %p264_p7 = scmp.eq.s32.totalorder %s4103_s17, 3 }
   0xd   : > { %s4119_s22 = scalar_select %p31_p1, %s4014_s15, %s33_s20  }
   0xe   : > { %p4121_p5 = por %p41_p2, %p40_p0  ;;  %p4125_p6 = por %p157_p4, %p156_p3 }
   0xf   : > { %5008 = sst [smem:[#allocation10_spill]] %s4119_s22  ;;  %p270_p8 = scmp.eq.s32.totalorder %s2877_s18, 3 }
  0x10   : > { %p4130_p9 = por %p264_p7, %p40_p0  ;;  %p2879_p11 = scmp.ge.s32.totalorder %s4018_s16, 4 }
  0x11   : > { %p4134_p10 = por %p270_p8, %p156_p3 }
  0x12   : > { %s5011_s25 = scalar_select %p4130_p9, 1, 0 }
  0x13   : > { %s5012_s26 = scalar_select %p4134_p10, 1, 0 }
  0x14   : > { %310 = sbr.rel (%p2879_p11) target bundleno = 69 (0x45), region = 48 }
  0x1b   : > { %313 = sbr.rel (!%p4121_p5) target bundleno = 42 (0x2a), region = 52  ;;  %s315_s27 = sand.u32 (%p4121_p5), 1, %s4014_s15  }
  0x1c   : > { %s2881_s28 = sshll.u32 (%p4121_p5), %s4018_s16, 2  ;;  %s2880_s29 = sshll.u32 (%p4121_p5), %s315_s27, 5 }
  0x1d   : > { %s5013_s0 = sld [smem:[#allocation11_spill]] (%p4121_p5)  ;;  %s317_s18 = scalar_lea.vmem (%p4121_p5), [#allocation2], %s2880_s29 }
  0x23   : > { %s319_s12 = scalar_lea.vmem %s5013_s0, %s2881_s28 }
  0x24   : > { %v335_v0 = vld [vmem:[%s319_s12] sm:$0xf]  ;;  %v337_v1 = vld [vmem:[%s319_s12 + $0x10] sm:$0xf] }
  0x25   : > { %336 = vst [vmem:[%s317_s18] sm:$0xf] %v335_v0  ;;  %338 = vst [vmem:[%s317_s18 + $0x4] sm:$0xf] %v337_v1  ;;  %v339_v2 = vld [vmem:[%s319_s12 + $0x20] sm:$0xf] }
  0x26   : > { %v341_v3 = vld [vmem:[%s319_s12 + $0x30] sm:$0xf]  ;;  %v343_v4 = vld [vmem:[%s319_s12 + $0x40] sm:$0xf]  ;;  %340 = vst [vmem:[%s317_s18 + $0x8] sm:$0xf] %v339_v2 }
  0x27   : > { %342 = vst [vmem:[%s317_s18 + $0xc] sm:$0xf] %v341_v3  ;;  %344 = vst [vmem:[%s317_s18 + $0x10] sm:$0xf] %v343_v4  ;;  %v345_v5 = vld [vmem:[%s319_s12 + $0x50] sm:$0xf] }
  0x28   : > { %v347_v6 = vld [vmem:[%s319_s12 + $0x60] sm:$0xf]  ;;  %v349_v7 = vld [vmem:[%s319_s12 + $0x70] sm:$0xf]  ;;  %346 = vst [vmem:[%s317_s18 + $0x14] sm:$0xf] %v345_v5 }
  0x29   : > { %348 = vst [vmem:[%s317_s18 + $0x18] sm:$0xf] %v347_v6  ;;  %350 = vst [vmem:[%s317_s18 + $0x1c] sm:$0xf] %v349_v7 }
  0x2a PF: > { %s390_s20 = sand.u32 1, %s4014_s15   ;;  %s2883_s21 = sshll.u32 %s4018_s16, 6 }
  0x2b   : > { %s2882_s27 = sshll.u32 %s390_s20, 6  ;;  %s4151_s30 = scalar_lea.hbm %s4998_s5, %s2883_s21 }
  0x2c   : > { %s394_s11 = scalar_lea.vmem [#allocation3], %s2882_s27  ;;  %s4155_s18 = scalar_lea.sflag [#allocation4], %s390_s20 }
  0x2d   : > { %s400_s12 = sshll.u32 %s394_s11, 4  ;;  %s3924_s0 = scalar_lea.hbm %s4151_s30, 1024  ;;  %s4153_s12 = int_to_ptr.vmem [resolvable:$true] %s400_s12 }
  0x2e   : > { %p3925_p12 = scmp.ne.s32.totalorder %s4151_s30, %s3924_s0  ;;  %s3928_s21 = scalar_lea.hbm %s4998_s5, 4096 }
  0x2f   : > { %p3929_p1 = scmp.lt.u32.totalorder %s4151_s30, %s4998_s5  ;;  %p3930_p2 = scmp.lt.u32.totalorder %s3928_s21, %s3924_s0 }
  0x30   : > { %p3926_p13 = pnand %p3925_p12, %p4121_p5  ;;  %p3932_p4 = scmp.lt.u32.totalorder %s3924_s0, %s4151_s30 }
  0x31   : > { %p3931_p3 = por %p3930_p2, %p3929_p1 }
  0x32   : > { %p3927_p0 = pneg %p3926_p13 }
  0x33   : > { %p3933_p7 = por %p3932_p4, %p3931_p3 }
  0x35   : > { %p3934_p8 = pnand %p3933_p7, %p3927_p0 }
  0x37   : > { %3937 = shalt.err (!%p3934_p8)
}
  0x38   : > { %s3938_s20 = scalar_lea.vmem %s4153_s12, 1024  ;;  %s4020_s15 = smov [#allocation3]  }
  0x39   : > { %p3939_p11 = scmp.ne.s32.totalorder %s4153_s12, %s3938_s20  ;;  %s3942_s22 = sshll.u32 %s4020_s15, 4  ;;  %s3943_s22 = int_to_ptr.vmem [resolvable:$false] %s3942_s22 }
  0x3a   : > { %s3944_s27 = scalar_lea.vmem %s3943_s22, 2048  ;;  %p3945_p10 = scmp.lt.s32.totalorder %s4153_s12, %s3943_s22 }
  0x3b   : > { %p3940_p12 = pnand %p3939_p11, %p4121_p5  ;;  %p3946_p9 = scmp.lt.s32.totalorder %s3944_s27, %s3938_s20 }
  0x3d   : > { %p3941_p13 = pneg %p3940_p12  ;;  %p3947_p1 = por %p3946_p9, %p3945_p10 }
  0x3f   : > { %p3948_p2 = pnand %p3947_p1, %p3941_p13 }
  0x41   : > { %3951 = shalt.err (!%p3948_p2)
}
  0x42   : > { %s4021_s0 = smov 256   ;;  %s4022_s11 = smov 64  }
  0x43   : > { %s4023_s21 = smov 4  }
  0x44   : > { %3850 = dma.hbm_to_vmem [thread:$0]  (%p4121_p5), %s4151_s30, 1024, %s4153_s12, %s4155_s18, %s4021_s0, %s4022_s11, %s4023_s21  }
  0x45 PF: > { %p2884_p0 = scmp.ge.s32.totalorder %s4018_s16, 1  ;;  %p408_p3 = scmp.lt.s32.totalorder %s4018_s16, 5 }
  0x47   : > { %p409_p4 = pnand %p2884_p0, %p408_p3 }
  0x48   : > { %s4182_s28 = sand.u32 (!%p409_p4), 1, %s4010_s14  }
  0x49   : > { %412 = sbr.rel (%p409_p4) target bundleno = 6097 (0x17d1), region = 97  ;;  %s2885_s29 = sshll.u32 (!%p409_p4), %s4182_s28, 5 }
  0x4a   : > { %s2886_s20 = sshll.u32 (!%p409_p4), %s4182_s28, 6  ;;  %s4186_s15 = scalar_lea.vmem (!%p409_p4), [#allocation2], %s2885_s29 }
  0x4b   : > { %s422_s23 = scalar_lea.sflag (!%p409_p4), [#allocation4], %s4182_s28  ;;  %s4189_s30 = scalar_lea.vmem (!%p409_p4), [#allocation3], %s2886_s20 }
  0x50   : > { %3997 = dma.done.wait (%p4125_p6), %s422_s23, 1024  }
  0x51   : > { %3999 = vsyncadd (%p4125_p6), %s422_s23, 4294966272  ;;  %v4024_v8 = vmov 0.0   ;;  %vm4025_vm0 = vmmov 0   ;;  %v4204_v9 = vld [vmem:[%s4994_s1] sm:$0xff]   ;;  %v4210_v10 = vld [vmem:[%s4994_s1 + $0x8] sm:$0xff]   ;;  %vm596_vm1 = vcmask 130048  }
  0x52   : > { %3226 = vmatprep.subr.bf16.mxu0 %v4024_v8  ;;  %3242 = vmatprep.mubr.msk.bf16.mxu0 %vm4025_vm0, %v4024_v8  ;;  %v4217_v11 = vld [vmem:[%s4994_s1 + $0x10] sm:$0xff]   ;;  %v4223_v12 = vld [vmem:[%s4994_s1 + $0x18] sm:$0xff]   ;;  %v4230_v13 = vld [vmem:[%s4994_s1 + $0x20] sm:$0xff]   ;;  %s2887_s0 = sshll.u32 %s4182_s28, 4  ;;  %s2775_s18 = scalar_lea.sflag [#allocation5], %s4182_s28 }
  0x53   : > { %3246 = vmatprep.subr.bf16.mxu1 %v4024_v8  ;;  %3248 = vmatprep.mubr.msk.bf16.mxu1 %vm4025_vm0, %v4024_v8  ;;  %v4238_v14 = vld [vmem:[%s4994_s1 + $0x28] sm:$0xff]   ;;  %v4245_v15 = vld [vmem:[%s4994_s1 + $0x30] sm:$0xff]   ;;  %v4252_v16 = vld [vmem:[%s4994_s1 + $0x38] sm:$0xff]   ;;  %s4533_s11 = scalar_lea.vmem [#allocation6], %s2887_s0  ;;  %p5014_p6 = scmp.ne.s32.totalorder %s5011_s25, 0 }
  0x54   : > { %3227 = vmatpush3.bf16.msra.mxu0 %v4204_v9  ;;  %v487_v17 = vld [vmem:[%s4186_s15] sm:$0xf]  ;;  %v2900_v27 = vld [vmem:[%s4186_s15 + $0x4] sm:$0xf]  ;;  %v2902_v28 = vld [vmem:[%s4186_s15 + $0x8] sm:$0xf] }
  0x55   : > { %3228 = vmatprep.subr.bf16.mxu0 %v4024_v8  ;;  %v4263_v18 = vld [vmem:[%s4996_s3] sm:$0xff]   ;;  %v2904_v47 = vld [vmem:[%s4186_s15 + $0xc] sm:$0xf]  ;;  %s2789_s20 = sshll.u32 %s4533_s11, 4  ;;  %s4951_s20 = int_to_ptr.vmem [resolvable:$true] %s2789_s20 }
  0x56   : > { %3247 = vmatpush3.bf16.msra.mxu1 %v4263_v18  ;;  %v4272_v19 = vld [vmem:[%s4995_s2] ss:$0 sm:$0xff]  ;;  %s3952_s24 = scalar_lea.vmem %s4951_s20, 256 }
  0x57   : > { %3252 = vmatprep.subr.bf16.mxu1 %v4024_v8  ;;  %v4352_v48 = vld [vmem:[%s4997_s4] ss:$0 sm:$0xff]  ;;  %p3953_p5 = scmp.ne.s32.totalorder %s4951_s20, %s3952_s24 }
  0x58   : > { %3229 = vmatpush3.bf16.msra.mxu0 %v4210_v10 }
  0x59   : > { %3230 = vmatprep.subr.bf16.mxu0 %v4024_v8  ;;  %p3954_p9 = pnand %p3953_p5, %p5014_p6 }
  0x5b   : > { %p3955_p10 = pneg %p3954_p9 }
  0x5c   : > { %3231 = vmatpush3.bf16.msra.mxu0 %v4217_v11 }
  0x5d   : > { %3232 = vmatprep.subr.bf16.mxu0 %v4024_v8 }
  0x60   : > { %3233 = vmatpush3.bf16.msra.mxu0 %v4223_v12 }
  0x61   : > { %3234 = vmatprep.subr.bf16.mxu0 %v4024_v8 }
  0x64   : > { %3235 = vmatpush3.bf16.msra.mxu0 %v4230_v13 }
  0x65   : > { %3236 = vmatprep.subr.bf16.mxu0 %v4024_v8 }
  0x68   : > { %3237 = vmatpush3.bf16.msra.mxu0 %v4238_v14 }
  0x69   : > { %3238 = vmatprep.subr.bf16.mxu0 %v4024_v8 }
  0x6c   : > { %3239 = vmatpush3.bf16.msra.mxu0 %v4245_v15 }
  0x6d   : > { %3240 = vmatprep.subr.bf16.mxu0 %v4024_v8 }
  0x70   : > { %3241 = vmatpush3.bf16.msra.mxu0 %v4252_v16 }
  0x71   : > { %3272 = vmatprep.subr.bf16.mxu0 %v4024_v8 }
  0x73   : > { %3243 = vmatmul.mubr.bf16.vlgmr.msra.gmra.mrb[0].mxu0 %v487_v17  ;;  %v2906_v17 = vld [vmem:[%s4186_s15 + $0x10] sm:$0xf] }
  0x74   : > { %3274 = vmatprep.mubr.msk.bf16.mxu0 %vm4025_vm0, %v4024_v8  ;;  %3273 = vmatpush3.bf16.msra.mxu0 %v4263_v18 }
  0x75   : > { %3298 = vmatprep.subr.bf16.mxu0 %v4024_v8 }
 0x146   : > { %v576_v20 = vpop.f32.mrb[0].mxu0 }
 0x147   : > { %v577_v21 = vadd.f32 %v4272_v19, %v576_v20  ;;  %v3244_v22 = vpop.f32.mrb[1].mxu0 }
 0x148   : > { %v579_v23 = vpop.f32.mrb[2].mxu0 }
 0x149   : > { %v582_v24 = vmax.f32 %v577_v21, 0.0  ;;  %v3245_v25 = vpop.f32.mrb[3].mxu0 }
 0x14b   : > { %v583_v26 = vpack.c.bf16 %v582_v24, %v582_v24 }
 0x14d   : > { %3249 = vmatmul.mubr.msk.bf16.vlgmr.msra.gmra.mrb[0].mxu1 %vm596_vm1, %v583_v26 }
 0x14e   : > { %3253 = vmatpush3.bf16.msra.mxu1 %v4204_v9  ;;  %3268 = vmatprep.mubr.msk.bf16.mxu1 %vm4025_vm0, %v4024_v8 }
 0x14f   : > { %3254 = vmatprep.subr.bf16.mxu1 %v4024_v8 }
 0x152   : > { %3255 = vmatpush3.bf16.msra.mxu1 %v4210_v10 }
 0x153   : > { %3256 = vmatprep.subr.bf16.mxu1 %v4024_v8 }
 0x156   : > { %3257 = vmatpush3.bf16.msra.mxu1 %v4217_v11 }
 0x157   : > { %3258 = vmatprep.subr.bf16.mxu1 %v4024_v8 }
 0x15a   : > { %3259 = vmatpush3.bf16.msra.mxu1 %v4223_v12 }
 0x15b   : > { %3260 = vmatprep.subr.bf16.mxu1 %v4024_v8 }
 0x15e   : > { %3261 = vmatpush3.bf16.msra.mxu1 %v4230_v13 }
 0x15f   : > { %3262 = vmatprep.subr.bf16.mxu1 %v4024_v8 }
 0x162   : > { %3263 = vmatpush3.bf16.msra.mxu1 %v4238_v14 }
 0x163   : > { %3264 = vmatprep.subr.bf16.mxu1 %v4024_v8 }
 0x166   : > { %3265 = vmatpush3.bf16.msra.mxu1 %v4245_v15 }
 0x167   : > { %3266 = vmatprep.subr.bf16.mxu1 %v4024_v8 }
 0x16a   : > { %3267 = vmatpush3.bf16.msra.mxu1 %v4252_v16 }
 0x16b   : > { %3278 = vmatprep.subr.bf16.mxu1 %v4024_v8 }
 0x16d   : > { %3269 = vmatmul.mubr.bf16.vlgmr.msra.gmra.mrb[4].mxu1 %v2900_v27 }
 0x16e   : > { %3279 = vmatpush3.bf16.msra.mxu1 %v4204_v9  ;;  %3294 = vmatprep.mubr.msk.bf16.mxu1 %vm4025_vm0, %v4024_v8 }
 0x16f   : > { %3280 = vmatprep.subr.bf16.mxu1 %v4024_v8 }
 0x172   : > { %3281 = vmatpush3.bf16.msra.mxu1 %v4210_v10 }
 0x173   : > { %3282 = vmatprep.subr.bf16.mxu1 %v4024_v8 }
 0x176   : > { %3283 = vmatpush3.bf16.msra.mxu1 %v4217_v11 }
 0x177   : > { %3284 = vmatprep.subr.bf16.mxu1 %v4024_v8 }
 0x17a   : > { %3285 = vmatpush3.bf16.msra.mxu1 %v4223_v12 }
 0x17b   : > { %3286 = vmatprep.subr.bf16.mxu1 %v4024_v8 }
 0x17e   : > { %3287 = vmatpush3.bf16.msra.mxu1 %v4230_v13 }
 0x17f   : > { %3288 = vmatprep.subr.bf16.mxu1 %v4024_v8 }
 0x182   : > { %3289 = vmatpush3.bf16.msra.mxu1 %v4238_v14 }
 0x183   : > { %3290 = vmatprep.subr.bf16.mxu1 %v4024_v8 }
 0x186   : > { %3291 = vmatpush3.bf16.msra.mxu1 %v4245_v15 }
 0x187   : > { %3292 = vmatprep.subr.bf16.mxu1 %v4024_v8 }
 0x18a   : > { %3293 = vmatpush3.bf16.msra.mxu1 %v4252_v16 }
 0x18b   : > { %3324 = vmatprep.subr.bf16.mxu1 %v4024_v8 }
 0x18d   : > { %3295 = vmatmul.mubr.bf16.vlgmr.msra.gmra.mrb[8].mxu1 %v2902_v28 }
 0x18e   : > { %3325 = vmatpush3.bf16.msra.mxu1 %v4263_v18  ;;  %3326 = vmatprep.mubr.msk.bf16.mxu1 %vm4025_vm0, %v4024_v8 }
 0x18f   : > { %3330 = vmatprep.subr.bf16.mxu1 %v4024_v8 }
 0x220   : > { %v634_v29 = vpop.f32.mrb[0].mxu1 }
 0x221   : > { %v3250_v30 = vpop.f32.mrb[1].mxu1  ;;  %v635_v49 = vadd.f32 %v4352_v48, %v634_v29 }
 0x222   : > { %v637_v31 = vpop.f32.mrb[2].mxu1 }
 0x223   : > { %v3251_v32 = vpop.f32.mrb[3].mxu1  ;;  %v640_v54 = vmax.f32 %v635_v49, 0.0 }
 0x240   : > { %v677_v33 = vpop.f32.mrb[4].mxu1 }
 0x241   : > { %v678_v34 = vadd.f32 %v4272_v19, %v677_v33  ;;  %v3270_v35 = vpop.f32.mrb[5].mxu1 }
 0x242   : > { %v680_v36 = vpop.f32.mrb[6].mxu1 }
 0x243   : > { %v683_v37 = vmax.f32 %v678_v34, 0.0  ;;  %v3271_v38 = vpop.f32.mrb[7].mxu1  ;;  %v2908_v34 = vld [vmem:[%s4186_s15 + $0x14] sm:$0xf] }
 0x245   : > { %v684_v39 = vpack.c.bf16 %v683_v37, %v683_v37 }
 0x247   : > { %3275 = vmatmul.mubr.msk.bf16.vlgmr.msra.gmra.mrb[4].mxu0 %vm596_vm1, %v684_v39 }
 0x248   : > { %3299 = vmatpush3.bf16.msra.mxu0 %v4263_v18  ;;  %3300 = vmatprep.mubr.msk.bf16.mxu0 %vm4025_vm0, %v4024_v8 }
 0x249   : > { %3304 = vmatprep.subr.bf16.mxu0 %v4024_v8 }
 0x260   : > { %v766_v40 = vpop.f32.mrb[8].mxu1 }
 0x261   : > { %v767_v41 = vadd.f32 %v4272_v19, %v766_v40  ;;  %v3296_v42 = vpop.f32.mrb[9].mxu1 }
 0x262   : > { %v769_v43 = vpop.f32.mrb[10].mxu1 }
 0x263   : > { %v772_v44 = vmax.f32 %v767_v41, 0.0  ;;  %v3297_v45 = vpop.f32.mrb[11].mxu1 }
 0x265   : > { %v773_v46 = vpack.c.bf16 %v772_v44, %v772_v44 }
 0x267   : > { %3301 = vmatmul.mubr.msk.bf16.vlgmr.msra.gmra.mrb[8].mxu0 %vm596_vm1, %v773_v46 }
 0x268   : > { %3305 = vmatpush3.bf16.msra.mxu0 %v4204_v9  ;;  %3320 = vmatprep.mubr.msk.bf16.mxu0 %vm4025_vm0, %v4024_v8 }
 0x269   : > { %3306 = vmatprep.subr.bf16.mxu0 %v4024_v8 }
 0x26c   : > { %3307 = vmatpush3.bf16.msra.mxu0 %v4210_v10 }
 0x26d   : > { %3308 = vmatprep.subr.bf16.mxu0 %v4024_v8 }
 0x270   : > { %3309 = vmatpush3.bf16.msra.mxu0 %v4217_v11 }
 0x271   : > { %3310 = vmatprep.subr.bf16.mxu0 %v4024_v8 }
 0x274   : > { %3311 = vmatpush3.bf16.msra.mxu0 %v4223_v12 }
 0x275   : > { %3312 = vmatprep.subr.bf16.mxu0 %v4024_v8 }
 0x278   : > { %3313 = vmatpush3.bf16.msra.mxu0 %v4230_v13 }
 0x279   : > { %3314 = vmatprep.subr.bf16.mxu0 %v4024_v8 }
 0x27c   : > { %3315 = vmatpush3.bf16.msra.mxu0 %v4238_v14 }
 0x27d   : > { %3316 = vmatprep.subr.bf16.mxu0 %v4024_v8 }
 0x280   : > { %3317 = vmatpush3.bf16.msra.mxu0 %v4245_v15 }
 0x281   : > { %3318 = vmatprep.subr.bf16.mxu0 %v4024_v8 }
 0x284   : > { %3319 = vmatpush3.bf16.msra.mxu0 %v4252_v16 }
 0x285   : > { %3350 = vmatprep.subr.bf16.mxu0 %v4024_v8 }
 0x287   : > { %3321 = vmatmul.mubr.bf16.vlgmr.msra.gmra.mrb[12].mxu0 %v2904_v47 }
 0x288   : > { %3351 = vmatpush3.bf16.msra.mxu0 %v4263_v18  ;;  %3352 = vmatprep.mubr.msk.bf16.mxu0 %vm4025_vm0, %v4024_v8 }
 0x289   : > { %3356 = vmatprep.subr.bf16.mxu0 %v4024_v8 }
 0x31a   : > { %v722_v50 = vpop.f32.mrb[4].mxu0 }
 0x31b   : > { %v723_v51 = vadd.f32 %v4352_v48, %v722_v50  ;;  %v3276_v52 = vpop.f32.mrb[5].mxu0  ;;  %v2910_v50 = vld [vmem:[%s4186_s15 + $0x18] sm:$0xf] }
 0x31c   : > { %v725_v53 = vpop.f32.mrb[6].mxu0 }
 0x31d   : > { %v728_v55 = vmax.f32 %v723_v51, 0.0  ;;  %v3277_v56 = vpop.f32.mrb[7].mxu0 }
 0x31f   : > { %v729_v57 = vmax.f32 %v640_v54, %v728_v55 }
 0x33a   : > { %v811_v58 = vpop.f32.mrb[8].mxu0 }
 0x33b   : > { %v812_v59 = vadd.f32 %v4352_v48, %v811_v58  ;;  %v3302_v60 = vpop.f32.mrb[9].mxu0 }
 0x33c   : > { %v814_v61 = vpop.f32.mrb[10].mxu0 }
 0x33d   : > { %v817_v62 = vmax.f32 %v812_v59, 0.0  ;;  %v3303_v63 = vpop.f32.mrb[11].mxu0 }
 0x33f   : > { %v818_v0 = vmax.f32 %v729_v57, %v817_v62 }
 0x35a   : > { %v855_v1 = vpop.f32.mrb[12].mxu0 }
 0x35b   : > { %v856_v2 = vadd.f32 %v4272_v19, %v855_v1  ;;  %v3322_v3 = vpop.f32.mrb[13].mxu0 }
 0x35c   : > { %v858_v4 = vpop.f32.mrb[14].mxu0 }
 0x35d   : > { %v861_v5 = vmax.f32 %v856_v2, 0.0  ;;  %v3323_v6 = vpop.f32.mrb[15].mxu0 }
 0x35e   : > { %v4463_v6 = vld [vmem:[%s4999_s6] sm:$0xff]  }
 0x35f   : > { %v862_v7 = vpack.c.bf16 %v861_v5, %v861_v5 }
 0x361   : > { %3327 = vmatmul.mubr.msk.bf16.vlgmr.msra.gmra.mrb[12].mxu1 %vm596_vm1, %v862_v7 }
 0x362   : > { %3331 = vmatpush3.bf16.msra.mxu1 %v4204_v9  ;;  %3346 = vmatprep.mubr.msk.bf16.mxu1 %vm4025_vm0, %v4024_v8 }
 0x363   : > { %3332 = vmatprep.subr.bf16.mxu1 %v4024_v8 }
 0x366   : > { %3333 = vmatpush3.bf16.msra.mxu1 %v4210_v10 }
 0x367   : > { %3334 = vmatprep.subr.bf16.mxu1 %v4024_v8 }
 0x36a   : > { %3335 = vmatpush3.bf16.msra.mxu1 %v4217_v11 }
 0x36b   : > { %3336 = vmatprep.subr.bf16.mxu1 %v4024_v8 }
 0x36e   : > { %3337 = vmatpush3.bf16.msra.mxu1 %v4223_v12 }
 0x36f   : > { %3338 = vmatprep.subr.bf16.mxu1 %v4024_v8 }
 0x372   : > { %3339 = vmatpush3.bf16.msra.mxu1 %v4230_v13 }
 0x373   : > { %3340 = vmatprep.subr.bf16.mxu1 %v4024_v8 }
 0x376   : > { %3341 = vmatpush3.bf16.msra.mxu1 %v4238_v14 }
 0x377   : > { %3342 = vmatprep.subr.bf16.mxu1 %v4024_v8 }
 0x37a   : > { %3343 = vmatpush3.bf16.msra.mxu1 %v4245_v15 }
 0x37b   : > { %3344 = vmatprep.subr.bf16.mxu1 %v4024_v8 }
 0x37e   : > { %3345 = vmatpush3.bf16.msra.mxu1 %v4252_v16 }
 0x37f   : > { %3376 = vmatprep.subr.bf16.mxu1 %v4024_v8 }
 0x381   : > { %3347 = vmatmul.mubr.bf16.vlgmr.msra.gmra.mrb[16].mxu1 %v2906_v17  ;;  %v4470_v17 = vld [vmem:[%s4999_s6 + $0x8] sm:$0xff]  }
 0x382   : > { %3377 = vmatpush3.bf16.msra.mxu1 %v4263_v18  ;;  %3378 = vmatprep.mubr.msk.bf16.mxu1 %vm4025_vm0, %v4024_v8 }
 0x383   : > { %3382 = vmatprep.subr.bf16.mxu1 %v4024_v8 }
 0x434   : > { %v900_v20 = vpop.f32.mrb[12].mxu1 }
 0x435   : > { %v901_v21 = vadd.f32 %v4352_v48, %v900_v20  ;;  %v3328_v22 = vpop.f32.mrb[13].mxu1  ;;  %v4486_v20 = vld [vmem:[%s4999_s6 + $0x18] sm:$0xff]  }
 0x436   : > { %v903_v23 = vpop.f32.mrb[14].mxu1  ;;  %v4500_v22 = vld [vmem:[%s4999_s6 + $0x28] sm:$0xff]  }
 0x437   : > { %v906_v24 = vmax.f32 %v901_v21, 0.0  ;;  %v3329_v25 = vpop.f32.mrb[15].mxu1  ;;  %v4493_v21 = vld [vmem:[%s4999_s6 + $0x20] sm:$0xff]   ;;  %v4507_v23 = vld [vmem:[%s4999_s6 + $0x30] sm:$0xff]  }
 0x438   : > { %v1285_v25 = vld [vmem:[%s4189_s30] sm:$0xf] }
 0x439   : > { %v907_v26 = vmax.f32 %v818_v0, %v906_v24  ;;  %v4514_v24 = vld [vmem:[%s4999_s6 + $0x38] sm:$0xff]  }
 0x454   : > { %v944_v27 = vpop.f32.mrb[16].mxu1 }
 0x455   : > { %v945_v28 = vadd.f32 %v4272_v19, %v944_v27  ;;  %v3348_v29 = vpop.f32.mrb[17].mxu1 }
 0x456   : > { %v947_v30 = vpop.f32.mrb[18].mxu1 }
 0x457   : > { %v950_v31 = vmax.f32 %v945_v28, 0.0  ;;  %v3349_v32 = vpop.f32.mrb[19].mxu1 }
 0x459   : > { %v951_v33 = vpack.c.bf16 %v950_v31, %v950_v31 }
 0x45b   : > { %3353 = vmatmul.mubr.msk.bf16.vlgmr.msra.gmra.mrb[16].mxu0 %vm596_vm1, %v951_v33 }
 0x45c   : > { %3357 = vmatpush3.bf16.msra.mxu0 %v4204_v9  ;;  %3372 = vmatprep.mubr.msk.bf16.mxu0 %vm4025_vm0, %v4024_v8 }
 0x45d   : > { %3358 = vmatprep.subr.bf16.mxu0 %v4024_v8 }
 0x460   : > { %3359 = vmatpush3.bf16.msra.mxu0 %v4210_v10 }
 0x461   : > { %3360 = vmatprep.subr.bf16.mxu0 %v4024_v8 }
 0x464   : > { %3361 = vmatpush3.bf16.msra.mxu0 %v4217_v11 }
 0x465   : > { %3362 = vmatprep.subr.bf16.mxu0 %v4024_v8 }
 0x468   : > { %3363 = vmatpush3.bf16.msra.mxu0 %v4223_v12 }
 0x469   : > { %3364 = vmatprep.subr.bf16.mxu0 %v4024_v8 }
 0x46c   : > { %3365 = vmatpush3.bf16.msra.mxu0 %v4230_v13 }
 0x46d   : > { %3366 = vmatprep.subr.bf16.mxu0 %v4024_v8 }
 0x470   : > { %3367 = vmatpush3.bf16.msra.mxu0 %v4238_v14 }
 0x471   : > { %3368 = vmatprep.subr.bf16.mxu0 %v4024_v8 }
 0x474   : > { %3369 = vmatpush3.bf16.msra.mxu0 %v4245_v15 }
 0x475   : > { %3370 = vmatprep.subr.bf16.mxu0 %v4024_v8 }
 0x478   : > { %3371 = vmatpush3.bf16.msra.mxu0 %v4252_v16 }
 0x479   : > { %3402 = vmatprep.subr.bf16.mxu0 %v4024_v8 }
 0x47b   : > { %3373 = vmatmul.mubr.bf16.vlgmr.msra.gmra.mrb[20].mxu0 %v2908_v34  ;;  %v4539_v34 = vld [vmem:[%s5000_s7] ss:$0 sm:$0xff] }
 0x47c   : > { %3403 = vmatpush3.bf16.msra.mxu0 %v4263_v18  ;;  %3404 = vmatprep.mubr.msk.bf16.mxu0 %vm4025_vm0, %v4024_v8 }
 0x47d   : > { %3408 = vmatprep.subr.bf16.mxu0 %v4024_v8 }
 0x52e   : > { %v989_v35 = vpop.f32.mrb[16].mxu0 }
 0x52f   : > { %v990_v36 = vadd.f32 %v4352_v48, %v989_v35  ;;  %v3354_v37 = vpop.f32.mrb[17].mxu0 }
 0x530   : > { %v992_v38 = vpop.f32.mrb[18].mxu0 }
 0x531   : > { %v995_v39 = vmax.f32 %v990_v36, 0.0  ;;  %v3355_v40 = vpop.f32.mrb[19].mxu0 }
 0x533   : > { %v996_v41 = vmax.f32 %v907_v26, %v995_v39  ;;  %v4525_v26 = vld [vmem:[%s5001_s8] sm:$0xff]  }
 0x54e   : > { %v1033_v42 = vpop.f32.mrb[20].mxu0 }
 0x54f   : > { %v1034_v43 = vadd.f32 %v4272_v19, %v1033_v42  ;;  %v3374_v44 = vpop.f32.mrb[21].mxu0 }
 0x550   : > { %v1036_v45 = vpop.f32.mrb[22].mxu0 }
 0x551   : > { %v1039_v46 = vmax.f32 %v1034_v43, 0.0  ;;  %v3375_v47 = vpop.f32.mrb[23].mxu0 }
 0x553   : > { %v1040_v49 = vpack.c.bf16 %v1039_v46, %v1039_v46 }
 0x555   : > { %3379 = vmatmul.mubr.msk.bf16.vlgmr.msra.gmra.mrb[20].mxu1 %vm596_vm1, %v1040_v49 }
 0x556   : > { %3383 = vmatpush3.bf16.msra.mxu1 %v4204_v9  ;;  %3398 = vmatprep.mubr.msk.bf16.mxu1 %vm4025_vm0, %v4024_v8 }
 0x557   : > { %3384 = vmatprep.subr.bf16.mxu1 %v4024_v8 }
 0x55a   : > { %3385 = vmatpush3.bf16.msra.mxu1 %v4210_v10 }
 0x55b   : > { %3386 = vmatprep.subr.bf16.mxu1 %v4024_v8 }
 0x55e   : > { %3387 = vmatpush3.bf16.msra.mxu1 %v4217_v11 }
 0x55f   : > { %3388 = vmatprep.subr.bf16.mxu1 %v4024_v8 }
 0x562   : > { %3389 = vmatpush3.bf16.msra.mxu1 %v4223_v12 }
 0x563   : > { %3390 = vmatprep.subr.bf16.mxu1 %v4024_v8 }
 0x566   : > { %3391 = vmatpush3.bf16.msra.mxu1 %v4230_v13 }
 0x567   : > { %3392 = vmatprep.subr.bf16.mxu1 %v4024_v8 }
 0x56a   : > { %3393 = vmatpush3.bf16.msra.mxu1 %v4238_v14 }
 0x56b   : > { %3394 = vmatprep.subr.bf16.mxu1 %v4024_v8 }
 0x56e   : > { %3395 = vmatpush3.bf16.msra.mxu1 %v4245_v15 }
 0x56f   : > { %3396 = vmatprep.subr.bf16.mxu1 %v4024_v8 }
 0x572   : > { %3397 = vmatpush3.bf16.msra.mxu1 %v4252_v16 }
 0x573   : > { %3428 = vmatprep.subr.bf16.mxu1 %v4024_v8 }
 0x575   : > { %3399 = vmatmul.mubr.bf16.vlgmr.msra.gmra.mrb[24].mxu1 %v2910_v50 }
 0x576   : > { %3429 = vmatpush3.bf16.msra.mxu1 %v4263_v18  ;;  %3430 = vmatprep.mubr.msk.bf16.mxu1 %vm4025_vm0, %v4024_v8 }
 0x577   : > { %3434 = vmatprep.subr.bf16.mxu1 %v4024_v8 }
 0x628   : > { %v1078_v51 = vpop.f32.mrb[20].mxu1 }
 0x629   : > { %v1079_v52 = vadd.f32 %v4352_v48, %v1078_v51  ;;  %v3380_v53 = vpop.f32.mrb[21].mxu1 }
 0x62a   : > { %v1081_v54 = vpop.f32.mrb[22].mxu1 }
 0x62b   : > { %v1084_v55 = vmax.f32 %v1079_v52, 0.0  ;;  %v3381_v56 = vpop.f32.mrb[23].mxu1  ;;  %v2928_v54 = vld [vmem:[%s4189_s30 + $0x8] sm:$0xf] }
 0x62d   : > { %v1085_v57 = vmax.f32 %v996_v41, %v1084_v55  ;;  %v2926_v41 = vld [vmem:[%s4189_s30 + $0x4] sm:$0xf]  ;;  %v4594_v55 = vld [vmem:[%s5002_s9] ss:$0 sm:$0xff] }
 0x648   : > { %v1122_v58 = vpop.f32.mrb[24].mxu1 }
 0x649   : > { %v1123_v59 = vadd.f32 %v4272_v19, %v1122_v58  ;;  %v3400_v60 = vpop.f32.mrb[25].mxu1 }
 0x64a   : > { %v1125_v61 = vpop.f32.mrb[26].mxu1 }
 0x64b   : > { %v1128_v62 = vmax.f32 %v1123_v59, 0.0  ;;  %v3401_v18 = vpop.f32.mrb[27].mxu1 }
 0x64d   : > { %v1129_v63 = vpack.c.bf16 %v1128_v62, %v1128_v62 }
 0x64f   : > { %3405 = vmatmul.mubr.msk.bf16.vlgmr.msra.gmra.mrb[24].mxu0 %vm596_vm1, %v1129_v63 }
 0x650   : > { %3409 = vmatpush3.bf16.msra.mxu0 %v4204_v9  ;;  %3424 = vmatprep.mubr.msk.bf16.mxu0 %vm4025_vm0, %v4024_v8  ;;  %v2912_v9 = vld [vmem:[%s4186_s15 + $0x1c] sm:$0xf] }
 0x651   : > { %3410 = vmatprep.subr.bf16.mxu0 %v4024_v8 }
 0x654   : > { %3411 = vmatpush3.bf16.msra.mxu0 %v4210_v10 }
 0x655   : > { %3412 = vmatprep.subr.bf16.mxu0 %v4024_v8 }
 0x658   : > { %3413 = vmatpush3.bf16.msra.mxu0 %v4217_v11 }
 0x659   : > { %3414 = vmatprep.subr.bf16.mxu0 %v4024_v8 }
 0x65c   : > { %3415 = vmatpush3.bf16.msra.mxu0 %v4223_v12 }
 0x65d   : > { %3416 = vmatprep.subr.bf16.mxu0 %v4024_v8 }
 0x660   : > { %3417 = vmatpush3.bf16.msra.mxu0 %v4230_v13 }
 0x661   : > { %3418 = vmatprep.subr.bf16.mxu0 %v4024_v8 }
 0x664   : > { %3419 = vmatpush3.bf16.msra.mxu0 %v4238_v14 }
 0x665   : > { %3420 = vmatprep.subr.bf16.mxu0 %v4024_v8 }
 0x668   : > { %3421 = vmatpush3.bf16.msra.mxu0 %v4245_v15 }
 0x669   : > { %3422 = vmatprep.subr.bf16.mxu0 %v4024_v8 }
 0x66c   : > { %3423 = vmatpush3.bf16.msra.mxu0 %v4252_v16 }
 0x66d   : > { %3454 = vmatprep.subr.bf16.mxu0 %v4024_v8 }
 0x66f   : > { %3425 = vmatmul.mubr.bf16.vlgmr.msra.gmra.mrb[28].mxu0 %v2912_v9 }
 0x670   : > { %3456 = vmatprep.mubr.msk.bf16.mxu0 %vm4025_vm0, %v4024_v8  ;;  %3455 = vmatpush3.bf16.msra.mxu0 %v4525_v26 }
 0x671   : > { %3460 = vmatprep.subr.bf16.mxu0 %v4024_v8 }
 0x722   : > { %v1167_v10 = vpop.f32.mrb[24].mxu0 }
 0x723   : > { %v1168_v11 = vadd.f32 %v4352_v48, %v1167_v10  ;;  %v3406_v12 = vpop.f32.mrb[25].mxu0 }
 0x724   : > { %v1170_v13 = vpop.f32.mrb[26].mxu0 }
 0x725   : > { %v1173_v14 = vmax.f32 %v1168_v11, 0.0  ;;  %v3407_v0 = vpop.f32.mrb[27].mxu0 }
 0x727   : > { %v1174_v1 = vmax.f32 %v1085_v57, %v1173_v14 }
 0x742   : > { %v1211_v15 = vpop.f32.mrb[28].mxu0 }
 0x743   : > { %v1212_v2 = vadd.f32 %v4272_v19, %v1211_v15  ;;  %v3426_v3 = vpop.f32.mrb[29].mxu0  ;;  %v4479_v19 = vld [vmem:[%s4999_s6 + $0x10] sm:$0xff]  }
 0x744   : > { %v1214_v16 = vpop.f32.mrb[30].mxu0 }
 0x745   : > { %v1217_v4 = vmax.f32 %v1212_v2, 0.0  ;;  %v3427_v5 = vpop.f32.mrb[31].mxu0 }
 0x747   : > { %v1218_v7 = vpack.c.bf16 %v1217_v4, %v1217_v4 }
 0x749   : > { %3431 = vmatmul.mubr.msk.bf16.vlgmr.msra.gmra.mrb[28].mxu1 %vm596_vm1, %v1218_v7 }
 0x74a   : > { %3435 = vmatpush3.bf16.msra.mxu1 %v4463_v6  ;;  %3450 = vmatprep.mubr.msk.bf16.mxu1 %vm4025_vm0, %v4024_v8 }
 0x74b   : > { %3436 = vmatprep.subr.bf16.mxu1 %v4024_v8 }
 0x74e   : > { %3437 = vmatpush3.bf16.msra.mxu1 %v4470_v17 }
 0x74f   : > { %3438 = vmatprep.subr.bf16.mxu1 %v4024_v8 }
 0x752   : > { %3439 = vmatpush3.bf16.msra.mxu1 %v4479_v19 }
 0x753   : > { %3440 = vmatprep.subr.bf16.mxu1 %v4024_v8 }
 0x756   : > { %3441 = vmatpush3.bf16.msra.mxu1 %v4486_v20 }
 0x757   : > { %3442 = vmatprep.subr.bf16.mxu1 %v4024_v8 }
 0x75a   : > { %3443 = vmatpush3.bf16.msra.mxu1 %v4493_v21 }
 0x75b   : > { %3444 = vmatprep.subr.bf16.mxu1 %v4024_v8 }
 0x75e   : > { %3445 = vmatpush3.bf16.msra.mxu1 %v4500_v22 }
 0x75f   : > { %3446 = vmatprep.subr.bf16.mxu1 %v4024_v8 }
 0x762   : > { %3447 = vmatpush3.bf16.msra.mxu1 %v4507_v23 }
 0x763   : > { %3448 = vmatprep.subr.bf16.mxu1 %v4024_v8 }
 0x766   : > { %3449 = vmatpush3.bf16.msra.mxu1 %v4514_v24 }
 0x767   : > { %3480 = vmatprep.subr.bf16.mxu1 %v4024_v8 }
 0x769   : > { %3451 = vmatmul.mubr.bf16.vlgmr.msra.gmra.mrb[32].mxu1 %v1285_v25 }
 0x76a   : > { %3482 = vmatprep.mubr.msk.bf16.mxu1 %vm4025_vm0, %v4024_v8  ;;  %3481 = vmatpush3.bf16.msra.mxu1 %v4525_v26 }
 0x76b   : > { %3486 = vmatprep.subr.bf16.mxu1 %v4024_v8 }
 0x81c   : > { %v1256_v27 = vpop.f32.mrb[28].mxu1 }
 0x81d   : > { %v1257_v28 = vadd.f32 %v4352_v48, %v1256_v27  ;;  %v3432_v29 = vpop.f32.mrb[29].mxu1 }
 0x81e   : > { %v1259_v30 = vpop.f32.mrb[30].mxu1 }
 0x81f   : > { %v1262_v31 = vmax.f32 %v1257_v28, 0.0  ;;  %v3433_v32 = vpop.f32.mrb[31].mxu1 }
 0x821   : > { %v1263_v33 = vmax.f32 %v1174_v1, %v1262_v31  ;;  %v2930_v1 = vld [vmem:[%s4189_s30 + $0xc] sm:$0xf] }
 0x823   : > { %1264 = vst [vmem:[%s4533_s11] sm:$0xff] %v1263_v33  ;;  %v2932_v33 = vld [vmem:[%s4189_s30 + $0x10] sm:$0xf] }
 0x83c   : > { %v1374_v35 = vpop.f32.mrb[32].mxu1 }
 0x83d   : > { %v1375_v36 = vadd.f32 %v4539_v34, %v1374_v35  ;;  %v3452_v37 = vpop.f32.mrb[33].mxu1 }
 0x83e   : > { %v1377_v38 = vpop.f32.mrb[34].mxu1 }
 0x83f   : > { %v1380_v48 = vmax.f32 %v1375_v36, 0.0  ;;  %v3453_v39 = vpop.f32.mrb[35].mxu1 }
 0x841   : > { %v1381_v40 = vpack.c.bf16 %v1380_v48, %v1380_v48 }
 0x843   : > { %3457 = vmatmul.mubr.msk.bf16.vlgmr.msra.gmra.mrb[32].mxu0 %vm596_vm1, %v1381_v40 }
 0x844   : > { %3461 = vmatpush3.bf16.msra.mxu0 %v4463_v6  ;;  %3476 = vmatprep.mubr.msk.bf16.mxu0 %vm4025_vm0, %v4024_v8 }
 0x845   : > { %3462 = vmatprep.subr.bf16.mxu0 %v4024_v8 }
 0x848   : > { %3463 = vmatpush3.bf16.msra.mxu0 %v4470_v17 }
 0x849   : > { %3464 = vmatprep.subr.bf16.mxu0 %v4024_v8 }
 0x84c   : > { %3465 = vmatpush3.bf16.msra.mxu0 %v4479_v19 }
 0x84d   : > { %3466 = vmatprep.subr.bf16.mxu0 %v4024_v8 }
 0x850   : > { %3467 = vmatpush3.bf16.msra.mxu0 %v4486_v20 }
 0x851   : > { %3468 = vmatprep.subr.bf16.mxu0 %v4024_v8 }
 0x854   : > { %3469 = vmatpush3.bf16.msra.mxu0 %v4493_v21 }
 0x855   : > { %3470 = vmatprep.subr.bf16.mxu0 %v4024_v8 }
 0x858   : > { %3471 = vmatpush3.bf16.msra.mxu0 %v4500_v22 }
 0x859   : > { %3472 = vmatprep.subr.bf16.mxu0 %v4024_v8 }
 0x85c   : > { %3473 = vmatpush3.bf16.msra.mxu0 %v4507_v23 }
 0x85d   : > { %3474 = vmatprep.subr.bf16.mxu0 %v4024_v8 }
 0x860   : > { %3475 = vmatpush3.bf16.msra.mxu0 %v4514_v24 }
 0x861   : > { %3506 = vmatprep.subr.bf16.mxu0 %v4024_v8 }
 0x863   : > { %3477 = vmatmul.mubr.bf16.vlgmr.msra.gmra.mrb[36].mxu0 %v2926_v41 }
 0x864   : > { %3507 = vmatpush3.bf16.msra.mxu0 %v4525_v26  ;;  %3508 = vmatprep.mubr.msk.bf16.mxu0 %vm4025_vm0, %v4024_v8 }
 0x865   : > { %3512 = vmatprep.subr.bf16.mxu0 %v4024_v8 }
 0x916   : > { %v1431_v42 = vpop.f32.mrb[32].mxu0 }
 0x917   : > { %v3458_v43 = vpop.f32.mrb[33].mxu0  ;;  %v1432_v56 = vadd.f32 %v4594_v55, %v1431_v42 }
 0x918   : > { %v1434_v44 = vpop.f32.mrb[34].mxu0 }
 0x919   : > { %v3459_v45 = vpop.f32.mrb[35].mxu0  ;;  %v1437_v61 = vmax.f32 %v1432_v56, 0.0 }
 0x936   : > { %v1474_v46 = vpop.f32.mrb[36].mxu0 }
 0x937   : > { %v1475_v47 = vadd.f32 %v4539_v34, %v1474_v46  ;;  %v3478_v49 = vpop.f32.mrb[37].mxu0 }
 0x938   : > { %v1477_v50 = vpop.f32.mrb[38].mxu0  ;;  %v2934_v49 = vld [vmem:[%s4189_s30 + $0x14] sm:$0xf] }
 0x939   : > { %v1480_v51 = vmax.f32 %v1475_v47, 0.0  ;;  %v3479_v52 = vpop.f32.mrb[39].mxu0 }
 0x93b   : > { %v1481_v53 = vpack.c.bf16 %v1480_v51, %v1480_v51 }
 0x93d   : > { %3483 = vmatmul.mubr.msk.bf16.vlgmr.msra.gmra.mrb[36].mxu1 %vm596_vm1, %v1481_v53 }
 0x93e   : > { %3487 = vmatpush3.bf16.msra.mxu1 %v4463_v6  ;;  %3502 = vmatprep.mubr.msk.bf16.mxu1 %vm4025_vm0, %v4024_v8 }
 0x93f   : > { %3488 = vmatprep.subr.bf16.mxu1 %v4024_v8 }
 0x942   : > { %3489 = vmatpush3.bf16.msra.mxu1 %v4470_v17 }
 0x943   : > { %3490 = vmatprep.subr.bf16.mxu1 %v4024_v8 }
 0x946   : > { %3491 = vmatpush3.bf16.msra.mxu1 %v4479_v19 }
 0x947   : > { %3492 = vmatprep.subr.bf16.mxu1 %v4024_v8 }
 0x94a   : > { %3493 = vmatpush3.bf16.msra.mxu1 %v4486_v20 }
 0x94b   : > { %3494 = vmatprep.subr.bf16.mxu1 %v4024_v8 }
 0x94e   : > { %3495 = vmatpush3.bf16.msra.mxu1 %v4493_v21 }
 0x94f   : > { %3496 = vmatprep.subr.bf16.mxu1 %v4024_v8 }
 0x952   : > { %3497 = vmatpush3.bf16.msra.mxu1 %v4500_v22 }
 0x953   : > { %3498 = vmatprep.subr.bf16.mxu1 %v4024_v8 }
 0x956   : > { %3499 = vmatpush3.bf16.msra.mxu1 %v4507_v23 }
 0x957   : > { %3500 = vmatprep.subr.bf16.mxu1 %v4024_v8 }
 0x95a   : > { %3501 = vmatpush3.bf16.msra.mxu1 %v4514_v24 }
 0x95b   : > { %3532 = vmatprep.subr.bf16.mxu1 %v4024_v8 }
 0x95d   : > { %3503 = vmatmul.mubr.bf16.vlgmr.msra.gmra.mrb[40].mxu1 %v2928_v54 }
 0x95e   : > { %3533 = vmatpush3.bf16.msra.mxu1 %v4525_v26  ;;  %3534 = vmatprep.mubr.msk.bf16.mxu1 %vm4025_vm0, %v4024_v8 }
 0x95f   : > { %3538 = vmatprep.subr.bf16.mxu1 %v4024_v8 }
 0xa10   : > { %v1519_v57 = vpop.f32.mrb[36].mxu1 }
 0xa11   : > { %v1520_v58 = vadd.f32 %v4594_v55, %v1519_v57  ;;  %v3484_v59 = vpop.f32.mrb[37].mxu1 }
 0xa12   : > { %v1522_v60 = vpop.f32.mrb[38].mxu1 }
 0xa13   : > { %v1525_v62 = vmax.f32 %v1520_v58, 0.0  ;;  %v3485_v18 = vpop.f32.mrb[39].mxu1 }
 0xa15   : > { %v1526_v63 = vmax.f32 %v1437_v61, %v1525_v62 }
 0xa30   : > { %v1563_v9 = vpop.f32.mrb[40].mxu1 }
 0xa31   : > { %v1564_v10 = vadd.f32 %v4539_v34, %v1563_v9  ;;  %v3504_v11 = vpop.f32.mrb[41].mxu1  ;;  %v2936_v9 = vld [vmem:[%s4189_s30 + $0x18] sm:$0xf] }
 0xa32   : > { %v1566_v12 = vpop.f32.mrb[42].mxu1 }
 0xa33   : > { %v1569_v13 = vmax.f32 %v1564_v10, 0.0  ;;  %v3505_v14 = vpop.f32.mrb[43].mxu1 }
 0xa35   : > { %v1570_v0 = vpack.c.bf16 %v1569_v13, %v1569_v13 }
 0xa37   : > { %3509 = vmatmul.mubr.msk.bf16.vlgmr.msra.gmra.mrb[40].mxu0 %vm596_vm1, %v1570_v0 }
 0xa38   : > { %3513 = vmatpush3.bf16.msra.mxu0 %v4463_v6  ;;  %3528 = vmatprep.mubr.msk.bf16.mxu0 %vm4025_vm0, %v4024_v8 }
 0xa39   : > { %3514 = vmatprep.subr.bf16.mxu0 %v4024_v8 }
 0xa3c   : > { %3515 = vmatpush3.bf16.msra.mxu0 %v4470_v17 }
 0xa3d   : > { %3516 = vmatprep.subr.bf16.mxu0 %v4024_v8 }
 0xa40   : > { %3517 = vmatpush3.bf16.msra.mxu0 %v4479_v19 }
 0xa41   : > { %3518 = vmatprep.subr.bf16.mxu0 %v4024_v8 }
 0xa44   : > { %3519 = vmatpush3.bf16.msra.mxu0 %v4486_v20 }
 0xa45   : > { %3520 = vmatprep.subr.bf16.mxu0 %v4024_v8 }
 0xa48   : > { %3521 = vmatpush3.bf16.msra.mxu0 %v4493_v21 }
 0xa49   : > { %3522 = vmatprep.subr.bf16.mxu0 %v4024_v8 }
 0xa4c   : > { %3523 = vmatpush3.bf16.msra.mxu0 %v4500_v22 }
 0xa4d   : > { %3524 = vmatprep.subr.bf16.mxu0 %v4024_v8 }
 0xa50   : > { %3525 = vmatpush3.bf16.msra.mxu0 %v4507_v23 }
 0xa51   : > { %3526 = vmatprep.subr.bf16.mxu0 %v4024_v8 }
 0xa54   : > { %3527 = vmatpush3.bf16.msra.mxu0 %v4514_v24 }
 0xa55   : > { %3558 = vmatprep.subr.bf16.mxu0 %v4024_v8 }
 0xa57   : > { %3529 = vmatmul.mubr.bf16.vlgmr.msra.gmra.mrb[44].mxu0 %v2930_v1 }
 0xa58   : > { %3559 = vmatpush3.bf16.msra.mxu0 %v4525_v26  ;;  %3560 = vmatprep.mubr.msk.bf16.mxu0 %vm4025_vm0, %v4024_v8 }
 0xa59   : > { %3564 = vmatprep.subr.bf16.mxu0 %v4024_v8 }
 0xb0a   : > { %v1608_v15 = vpop.f32.mrb[40].mxu0 }
 0xb0b   : > { %v1609_v2 = vadd.f32 %v4594_v55, %v1608_v15  ;;  %v3510_v3 = vpop.f32.mrb[41].mxu0 }
 0xb0c   : > { %v1611_v16 = vpop.f32.mrb[42].mxu0 }
 0xb0d   : > { %v1614_v4 = vmax.f32 %v1609_v2, 0.0  ;;  %v3511_v5 = vpop.f32.mrb[43].mxu0 }
 0xb0f   : > { %v1615_v7 = vmax.f32 %v1526_v63, %v1614_v4 }
 0xb2a   : > { %v1652_v25 = vpop.f32.mrb[44].mxu0 }
 0xb2b   : > { %v1653_v27 = vadd.f32 %v4539_v34, %v1652_v25  ;;  %v3530_v28 = vpop.f32.mrb[45].mxu0  ;;  %v2938_v25 = vld [vmem:[%s4189_s30 + $0x1c] sm:$0xf] }
 0xb2c   : > { %v1655_v29 = vpop.f32.mrb[46].mxu0 }
 0xb2d   : > { %v1658_v30 = vmax.f32 %v1653_v27, 0.0  ;;  %v3531_v31 = vpop.f32.mrb[47].mxu0 }
 0xb2f   : > { %v1659_v32 = vpack.c.bf16 %v1658_v30, %v1658_v30 }
 0xb31   : > { %3535 = vmatmul.mubr.msk.bf16.vlgmr.msra.gmra.mrb[44].mxu1 %vm596_vm1, %v1659_v32 }
 0xb32   : > { %3539 = vmatpush3.bf16.msra.mxu1 %v4463_v6  ;;  %3554 = vmatprep.mubr.msk.bf16.mxu1 %vm4025_vm0, %v4024_v8 }
 0xb33   : > { %3540 = vmatprep.subr.bf16.mxu1 %v4024_v8 }
 0xb36   : > { %3541 = vmatpush3.bf16.msra.mxu1 %v4470_v17 }
 0xb37   : > { %3542 = vmatprep.subr.bf16.mxu1 %v4024_v8 }
 0xb3a   : > { %3543 = vmatpush3.bf16.msra.mxu1 %v4479_v19 }
 0xb3b   : > { %3544 = vmatprep.subr.bf16.mxu1 %v4024_v8 }
 0xb3e   : > { %3545 = vmatpush3.bf16.msra.mxu1 %v4486_v20 }
 0xb3f   : > { %3546 = vmatprep.subr.bf16.mxu1 %v4024_v8 }
 0xb42   : > { %3547 = vmatpush3.bf16.msra.mxu1 %v4493_v21 }
 0xb43   : > { %3548 = vmatprep.subr.bf16.mxu1 %v4024_v8 }
 0xb46   : > { %3549 = vmatpush3.bf16.msra.mxu1 %v4500_v22 }
 0xb47   : > { %3550 = vmatprep.subr.bf16.mxu1 %v4024_v8 }
 0xb4a   : > { %3551 = vmatpush3.bf16.msra.mxu1 %v4507_v23 }
 0xb4b   : > { %3552 = vmatprep.subr.bf16.mxu1 %v4024_v8 }
 0xb4e   : > { %3553 = vmatpush3.bf16.msra.mxu1 %v4514_v24 }
 0xb4f   : > { %3584 = vmatprep.subr.bf16.mxu1 %v4024_v8 }
 0xb51   : > { %3555 = vmatmul.mubr.bf16.vlgmr.msra.gmra.mrb[48].mxu1 %v2932_v33 }
 0xb52   : > { %3585 = vmatpush3.bf16.msra.mxu1 %v4525_v26  ;;  %3586 = vmatprep.mubr.msk.bf16.mxu1 %vm4025_vm0, %v4024_v8 }
 0xb53   : > { %3590 = vmatprep.subr.bf16.mxu1 %v4024_v8 }
 0xc04   : > { %v1697_v35 = vpop.f32.mrb[44].mxu1 }
 0xc05   : > { %v1698_v36 = vadd.f32 %v4594_v55, %v1697_v35  ;;  %v3536_v37 = vpop.f32.mrb[45].mxu1 }
 0xc06   : > { %v1700_v38 = vpop.f32.mrb[46].mxu1 }
 0xc07   : > { %v1703_v48 = vmax.f32 %v1698_v36, 0.0  ;;  %v3537_v39 = vpop.f32.mrb[47].mxu1 }
 0xc09   : > { %v1704_v40 = vmax.f32 %v1615_v7, %v1703_v48 }
 0xc24   : > { %v1741_v41 = vpop.f32.mrb[48].mxu1 }
 0xc25   : > { %v1742_v42 = vadd.f32 %v4539_v34, %v1741_v41  ;;  %v3556_v43 = vpop.f32.mrb[49].mxu1  ;;  %v2940_v41 = vld [vmem:[%s4189_s30 + $0x20] sm:$0xf] }
 0xc26   : > { %v1744_v44 = vpop.f32.mrb[50].mxu1 }
 0xc27   : > { %v1747_v45 = vmax.f32 %v1742_v42, 0.0  ;;  %v3557_v46 = vpop.f32.mrb[51].mxu1 }
 0xc29   : > { %v1748_v47 = vpack.c.bf16 %v1747_v45, %v1747_v45 }
 0xc2b   : > { %3561 = vmatmul.mubr.msk.bf16.vlgmr.msra.gmra.mrb[48].mxu0 %vm596_vm1, %v1748_v47 }
 0xc2c   : > { %3565 = vmatpush3.bf16.msra.mxu0 %v4463_v6  ;;  %3580 = vmatprep.mubr.msk.bf16.mxu0 %vm4025_vm0, %v4024_v8 }
 0xc2d   : > { %3566 = vmatprep.subr.bf16.mxu0 %v4024_v8 }
 0xc30   : > { %3567 = vmatpush3.bf16.msra.mxu0 %v4470_v17 }
 0xc31   : > { %3568 = vmatprep.subr.bf16.mxu0 %v4024_v8 }
 0xc34   : > { %3569 = vmatpush3.bf16.msra.mxu0 %v4479_v19 }
 0xc35   : > { %3570 = vmatprep.subr.bf16.mxu0 %v4024_v8 }
 0xc38   : > { %3571 = vmatpush3.bf16.msra.mxu0 %v4486_v20 }
 0xc39   : > { %3572 = vmatprep.subr.bf16.mxu0 %v4024_v8 }
 0xc3c   : > { %3573 = vmatpush3.bf16.msra.mxu0 %v4493_v21 }
 0xc3d   : > { %3574 = vmatprep.subr.bf16.mxu0 %v4024_v8 }
 0xc40   : > { %3575 = vmatpush3.bf16.msra.mxu0 %v4500_v22 }
 0xc41   : > { %3576 = vmatprep.subr.bf16.mxu0 %v4024_v8 }
 0xc44   : > { %3577 = vmatpush3.bf16.msra.mxu0 %v4507_v23 }
 0xc45   : > { %3578 = vmatprep.subr.bf16.mxu0 %v4024_v8 }
 0xc48   : > { %3579 = vmatpush3.bf16.msra.mxu0 %v4514_v24 }
 0xc49   : > { %3610 = vmatprep.subr.bf16.mxu0 %v4024_v8 }
 0xc4b   : > { %3581 = vmatmul.mubr.bf16.vlgmr.msra.gmra.mrb[52].mxu0 %v2934_v49 }
 0xc4c   : > { %3611 = vmatpush3.bf16.msra.mxu0 %v4525_v26  ;;  %3612 = vmatprep.mubr.msk.bf16.mxu0 %vm4025_vm0, %v4024_v8 }
 0xc4d   : > { %3616 = vmatprep.subr.bf16.mxu0 %v4024_v8 }
 0xcfe   : > { %v1786_v50 = vpop.f32.mrb[48].mxu0 }
 0xcff   : > { %v1787_v51 = vadd.f32 %v4594_v55, %v1786_v50  ;;  %v3562_v52 = vpop.f32.mrb[49].mxu0 }
 0xd00   : > { %v1789_v53 = vpop.f32.mrb[50].mxu0 }
 0xd01   : > { %v1792_v54 = vmax.f32 %v1787_v51, 0.0  ;;  %v3563_v56 = vpop.f32.mrb[51].mxu0 }
 0xd03   : > { %v1793_v57 = vmax.f32 %v1704_v40, %v1792_v54 }
 0xd1e   : > { %v1830_v58 = vpop.f32.mrb[52].mxu0 }
 0xd1f   : > { %v1831_v59 = vadd.f32 %v4539_v34, %v1830_v58  ;;  %v3582_v60 = vpop.f32.mrb[53].mxu0  ;;  %v2942_v58 = vld [vmem:[%s4189_s30 + $0x24] sm:$0xf] }
 0xd20   : > { %v1833_v61 = vpop.f32.mrb[54].mxu0 }
 0xd21   : > { %v1836_v62 = vmax.f32 %v1831_v59, 0.0  ;;  %v3583_v18 = vpop.f32.mrb[55].mxu0 }
 0xd23   : > { %v1837_v63 = vpack.c.bf16 %v1836_v62, %v1836_v62 }
 0xd25   : > { %3587 = vmatmul.mubr.msk.bf16.vlgmr.msra.gmra.mrb[52].mxu1 %vm596_vm1, %v1837_v63 }
 0xd26   : > { %3591 = vmatpush3.bf16.msra.mxu1 %v4463_v6  ;;  %3606 = vmatprep.mubr.msk.bf16.mxu1 %vm4025_vm0, %v4024_v8 }
 0xd27   : > { %3592 = vmatprep.subr.bf16.mxu1 %v4024_v8 }
 0xd2a   : > { %3593 = vmatpush3.bf16.msra.mxu1 %v4470_v17 }
 0xd2b   : > { %3594 = vmatprep.subr.bf16.mxu1 %v4024_v8 }
 0xd2e   : > { %3595 = vmatpush3.bf16.msra.mxu1 %v4479_v19 }
 0xd2f   : > { %3596 = vmatprep.subr.bf16.mxu1 %v4024_v8 }
 0xd32   : > { %3597 = vmatpush3.bf16.msra.mxu1 %v4486_v20 }
 0xd33   : > { %3598 = vmatprep.subr.bf16.mxu1 %v4024_v8 }
 0xd36   : > { %3599 = vmatpush3.bf16.msra.mxu1 %v4493_v21 }
 0xd37   : > { %3600 = vmatprep.subr.bf16.mxu1 %v4024_v8 }
 0xd3a   : > { %3601 = vmatpush3.bf16.msra.mxu1 %v4500_v22 }
 0xd3b   : > { %3602 = vmatprep.subr.bf16.mxu1 %v4024_v8 }
 0xd3e   : > { %3603 = vmatpush3.bf16.msra.mxu1 %v4507_v23 }
 0xd3f   : > { %3604 = vmatprep.subr.bf16.mxu1 %v4024_v8 }
 0xd42   : > { %3605 = vmatpush3.bf16.msra.mxu1 %v4514_v24 }
 0xd43   : > { %3636 = vmatprep.subr.bf16.mxu1 %v4024_v8 }
 0xd45   : > { %3607 = vmatmul.mubr.bf16.vlgmr.msra.gmra.mrb[56].mxu1 %v2936_v9 }
 0xd46   : > { %3637 = vmatpush3.bf16.msra.mxu1 %v4525_v26  ;;  %3638 = vmatprep.mubr.msk.bf16.mxu1 %vm4025_vm0, %v4024_v8 }
 0xd47   : > { %3642 = vmatprep.subr.bf16.mxu1 %v4024_v8 }
 0xdf8   : > { %v1875_v10 = vpop.f32.mrb[52].mxu1 }
 0xdf9   : > { %v1876_v11 = vadd.f32 %v4594_v55, %v1875_v10  ;;  %v3588_v12 = vpop.f32.mrb[53].mxu1 }
 0xdfa   : > { %v1878_v13 = vpop.f32.mrb[54].mxu1 }
 0xdfb   : > { %v1881_v14 = vmax.f32 %v1876_v11, 0.0  ;;  %v3589_v0 = vpop.f32.mrb[55].mxu1 }
 0xdfd   : > { %v1882_v1 = vmax.f32 %v1793_v57, %v1881_v14 }
 0xe18   : > { %v1919_v15 = vpop.f32.mrb[56].mxu1 }
 0xe19   : > { %v1920_v2 = vadd.f32 %v4539_v34, %v1919_v15  ;;  %v3608_v3 = vpop.f32.mrb[57].mxu1  ;;  %v2944_v15 = vld [vmem:[%s4189_s30 + $0x28] sm:$0xf] }
 0xe1a   : > { %v1922_v16 = vpop.f32.mrb[58].mxu1 }
 0xe1b   : > { %v1925_v4 = vmax.f32 %v1920_v2, 0.0  ;;  %v3609_v5 = vpop.f32.mrb[59].mxu1 }
 0xe1d   : > { %v1926_v7 = vpack.c.bf16 %v1925_v4, %v1925_v4 }
 0xe1f   : > { %3613 = vmatmul.mubr.msk.bf16.vlgmr.msra.gmra.mrb[56].mxu0 %vm596_vm1, %v1926_v7 }
 0xe20   : > { %3617 = vmatpush3.bf16.msra.mxu0 %v4463_v6  ;;  %3632 = vmatprep.mubr.msk.bf16.mxu0 %vm4025_vm0, %v4024_v8 }
 0xe21   : > { %3618 = vmatprep.subr.bf16.mxu0 %v4024_v8 }
 0xe24   : > { %3619 = vmatpush3.bf16.msra.mxu0 %v4470_v17 }
 0xe25   : > { %3620 = vmatprep.subr.bf16.mxu0 %v4024_v8 }
 0xe28   : > { %3621 = vmatpush3.bf16.msra.mxu0 %v4479_v19 }
 0xe29   : > { %3622 = vmatprep.subr.bf16.mxu0 %v4024_v8 }
 0xe2c   : > { %3623 = vmatpush3.bf16.msra.mxu0 %v4486_v20 }
 0xe2d   : > { %3624 = vmatprep.subr.bf16.mxu0 %v4024_v8 }
 0xe30   : > { %3625 = vmatpush3.bf16.msra.mxu0 %v4493_v21 }
 0xe31   : > { %3626 = vmatprep.subr.bf16.mxu0 %v4024_v8 }
 0xe34   : > { %3627 = vmatpush3.bf16.msra.mxu0 %v4500_v22 }
 0xe35   : > { %3628 = vmatprep.subr.bf16.mxu0 %v4024_v8 }
 0xe38   : > { %3629 = vmatpush3.bf16.msra.mxu0 %v4507_v23 }
 0xe39   : > { %3630 = vmatprep.subr.bf16.mxu0 %v4024_v8 }
 0xe3c   : > { %3631 = vmatpush3.bf16.msra.mxu0 %v4514_v24 }
 0xe3d   : > { %3662 = vmatprep.subr.bf16.mxu0 %v4024_v8 }
 0xe3f   : > { %3633 = vmatmul.mubr.bf16.vlgmr.msra.gmra.mrb[60].mxu0 %v2938_v25 }
 0xe40   : > { %3663 = vmatpush3.bf16.msra.mxu0 %v4525_v26  ;;  %3664 = vmatprep.mubr.msk.bf16.mxu0 %vm4025_vm0, %v4024_v8 }
 0xe41   : > { %3668 = vmatprep.subr.bf16.mxu0 %v4024_v8 }
 0xef2   : > { %v1964_v27 = vpop.f32.mrb[56].mxu0 }
 0xef3   : > { %v1965_v28 = vadd.f32 %v4594_v55, %v1964_v27  ;;  %v3614_v29 = vpop.f32.mrb[57].mxu0 }
 0xef4   : > { %v1967_v30 = vpop.f32.mrb[58].mxu0 }
 0xef5   : > { %v1970_v31 = vmax.f32 %v1965_v28, 0.0  ;;  %v3615_v32 = vpop.f32.mrb[59].mxu0 }
 0xef7   : > { %v1971_v33 = vmax.f32 %v1882_v1, %v1970_v31 }
 0xf12   : > { %v2008_v35 = vpop.f32.mrb[60].mxu0 }
 0xf13   : > { %v2009_v36 = vadd.f32 %v4539_v34, %v2008_v35  ;;  %v3634_v37 = vpop.f32.mrb[61].mxu0  ;;  %v2946_v35 = vld [vmem:[%s4189_s30 + $0x2c] sm:$0xf] }
 0xf14   : > { %v2011_v38 = vpop.f32.mrb[62].mxu0 }
 0xf15   : > { %v2014_v48 = vmax.f32 %v2009_v36, 0.0  ;;  %v3635_v39 = vpop.f32.mrb[63].mxu0 }
 0xf17   : > { %v2015_v40 = vpack.c.bf16 %v2014_v48, %v2014_v48 }
 0xf19   : > { %3639 = vmatmul.mubr.msk.bf16.vlgmr.msra.gmra.mrb[60].mxu1 %vm596_vm1, %v2015_v40 }
 0xf1a   : > { %3643 = vmatpush3.bf16.msra.mxu1 %v4463_v6  ;;  %3658 = vmatprep.mubr.msk.bf16.mxu1 %vm4025_vm0, %v4024_v8 }
 0xf1b   : > { %3644 = vmatprep.subr.bf16.mxu1 %v4024_v8 }
 0xf1e   : > { %3645 = vmatpush3.bf16.msra.mxu1 %v4470_v17 }
 0xf1f   : > { %3646 = vmatprep.subr.bf16.mxu1 %v4024_v8 }
 0xf22   : > { %3647 = vmatpush3.bf16.msra.mxu1 %v4479_v19 }
 0xf23   : > { %3648 = vmatprep.subr.bf16.mxu1 %v4024_v8 }
 0xf26   : > { %3649 = vmatpush3.bf16.msra.mxu1 %v4486_v20 }
 0xf27   : > { %3650 = vmatprep.subr.bf16.mxu1 %v4024_v8 }
 0xf2a   : > { %3651 = vmatpush3.bf16.msra.mxu1 %v4493_v21 }
 0xf2b   : > { %3652 = vmatprep.subr.bf16.mxu1 %v4024_v8 }
 0xf2e   : > { %3653 = vmatpush3.bf16.msra.mxu1 %v4500_v22 }
 0xf2f   : > { %3654 = vmatprep.subr.bf16.mxu1 %v4024_v8 }
 0xf32   : > { %3655 = vmatpush3.bf16.msra.mxu1 %v4507_v23 }
 0xf33   : > { %3656 = vmatprep.subr.bf16.mxu1 %v4024_v8 }
 0xf36   : > { %3657 = vmatpush3.bf16.msra.mxu1 %v4514_v24 }
 0xf37   : > { %3688 = vmatprep.subr.bf16.mxu1 %v4024_v8 }
 0xf39   : > { %3659 = vmatmul.mubr.bf16.vlgmr.msra.gmra.mrb[64].mxu1 %v2940_v41 }
 0xf3a   : > { %3689 = vmatpush3.bf16.msra.mxu1 %v4525_v26  ;;  %3690 = vmatprep.mubr.msk.bf16.mxu1 %vm4025_vm0, %v4024_v8 }
 0xf3b   : > { %3694 = vmatprep.subr.bf16.mxu1 %v4024_v8 }
 0xfec   : > { %v2053_v42 = vpop.f32.mrb[60].mxu1 }
 0xfed   : > { %v2054_v43 = vadd.f32 %v4594_v55, %v2053_v42  ;;  %v3640_v44 = vpop.f32.mrb[61].mxu1 }
 0xfee   : > { %v2056_v45 = vpop.f32.mrb[62].mxu1 }
 0xfef   : > { %v2059_v46 = vmax.f32 %v2054_v43, 0.0  ;;  %v3641_v47 = vpop.f32.mrb[63].mxu1 }
 0xff1   : > { %v2060_v49 = vmax.f32 %v1971_v33, %v2059_v46 }
0x100c   : > { %v2097_v50 = vpop.f32.mrb[64].mxu1 }
0x100d   : > { %v2098_v51 = vadd.f32 %v4539_v34, %v2097_v50  ;;  %v3660_v52 = vpop.f32.mrb[65].mxu1  ;;  %v2948_v50 = vld [vmem:[%s4189_s30 + $0x30] sm:$0xf] }
0x100e   : > { %v2100_v53 = vpop.f32.mrb[66].mxu1 }
0x100f   : > { %v2103_v54 = vmax.f32 %v2098_v51, 0.0  ;;  %v3661_v56 = vpop.f32.mrb[67].mxu1 }
0x1011   : > { %v2104_v57 = vpack.c.bf16 %v2103_v54, %v2103_v54 }
0x1013   : > { %3665 = vmatmul.mubr.msk.bf16.vlgmr.msra.gmra.mrb[64].mxu0 %vm596_vm1, %v2104_v57 }
0x1014   : > { %3669 = vmatpush3.bf16.msra.mxu0 %v4463_v6  ;;  %3684 = vmatprep.mubr.msk.bf16.mxu0 %vm4025_vm0, %v4024_v8 }
0x1015   : > { %3670 = vmatprep.subr.bf16.mxu0 %v4024_v8 }
0x1018   : > { %3671 = vmatpush3.bf16.msra.mxu0 %v4470_v17 }
0x1019   : > { %3672 = vmatprep.subr.bf16.mxu0 %v4024_v8 }
0x101c   : > { %3673 = vmatpush3.bf16.msra.mxu0 %v4479_v19 }
0x101d   : > { %3674 = vmatprep.subr.bf16.mxu0 %v4024_v8 }
0x1020   : > { %3675 = vmatpush3.bf16.msra.mxu0 %v4486_v20 }
0x1021   : > { %3676 = vmatprep.subr.bf16.mxu0 %v4024_v8 }
0x1024   : > { %3677 = vmatpush3.bf16.msra.mxu0 %v4493_v21 }
0x1025   : > { %3678 = vmatprep.subr.bf16.mxu0 %v4024_v8 }
0x1028   : > { %3679 = vmatpush3.bf16.msra.mxu0 %v4500_v22 }
0x1029   : > { %3680 = vmatprep.subr.bf16.mxu0 %v4024_v8 }
0x102c   : > { %3681 = vmatpush3.bf16.msra.mxu0 %v4507_v23 }
0x102d   : > { %3682 = vmatprep.subr.bf16.mxu0 %v4024_v8 }
0x1030   : > { %3683 = vmatpush3.bf16.msra.mxu0 %v4514_v24 }
0x1031   : > { %3714 = vmatprep.subr.bf16.mxu0 %v4024_v8 }
0x1033   : > { %3685 = vmatmul.mubr.bf16.vlgmr.msra.gmra.mrb[68].mxu0 %v2942_v58 }
0x1034   : > { %3715 = vmatpush3.bf16.msra.mxu0 %v4525_v26  ;;  %3716 = vmatprep.mubr.msk.bf16.mxu0 %vm4025_vm0, %v4024_v8 }
0x1035   : > { %3720 = vmatprep.subr.bf16.mxu0 %v4024_v8 }
0x10e6   : > { %v2142_v59 = vpop.f32.mrb[64].mxu0 }
0x10e7   : > { %v2143_v60 = vadd.f32 %v4594_v55, %v2142_v59  ;;  %v3666_v61 = vpop.f32.mrb[65].mxu0 }
0x10e8   : > { %v2145_v62 = vpop.f32.mrb[66].mxu0 }
0x10e9   : > { %v2148_v18 = vmax.f32 %v2143_v60, 0.0  ;;  %v3667_v63 = vpop.f32.mrb[67].mxu0 }
0x10eb   : > { %v2149_v9 = vmax.f32 %v2060_v49, %v2148_v18 }
0x1106   : > { %v2186_v10 = vpop.f32.mrb[68].mxu0 }
0x1107   : > { %v2187_v11 = vadd.f32 %v4539_v34, %v2186_v10  ;;  %v3686_v12 = vpop.f32.mrb[69].mxu0 }
0x1108   : > { %v2189_v13 = vpop.f32.mrb[70].mxu0 }
0x1109   : > { %v2192_v14 = vmax.f32 %v2187_v11, 0.0  ;;  %v3687_v0 = vpop.f32.mrb[71].mxu0 }
0x110b   : > { %v2193_v1 = vpack.c.bf16 %v2192_v14, %v2192_v14 }
0x110d   : > { %3691 = vmatmul.mubr.msk.bf16.vlgmr.msra.gmra.mrb[68].mxu1 %vm596_vm1, %v2193_v1  ;;  %v3914_v1 = vld [vmem:[%s4999_s6] sm:$0xff]  }
0x110e   : > { %3695 = vmatpush3.bf16.msra.mxu1 %v4463_v6  ;;  %3710 = vmatprep.mubr.msk.bf16.mxu1 %vm4025_vm0, %v4024_v8 }
0x110f   : > { %3696 = vmatprep.subr.bf16.mxu1 %v4024_v8 }
0x1112   : > { %3697 = vmatpush3.bf16.msra.mxu1 %v4470_v17 }
0x1113   : > { %3698 = vmatprep.subr.bf16.mxu1 %v4024_v8 }
0x1116   : > { %3699 = vmatpush3.bf16.msra.mxu1 %v4479_v19 }
0x1117   : > { %3700 = vmatprep.subr.bf16.mxu1 %v4024_v8 }
0x111a   : > { %3701 = vmatpush3.bf16.msra.mxu1 %v4486_v20 }
0x111b   : > { %3702 = vmatprep.subr.bf16.mxu1 %v4024_v8 }
0x111e   : > { %3703 = vmatpush3.bf16.msra.mxu1 %v4493_v21 }
0x111f   : > { %3704 = vmatprep.subr.bf16.mxu1 %v4024_v8 }
0x1122   : > { %3705 = vmatpush3.bf16.msra.mxu1 %v4500_v22 }
0x1123   : > { %3706 = vmatprep.subr.bf16.mxu1 %v4024_v8 }
0x1126   : > { %3707 = vmatpush3.bf16.msra.mxu1 %v4507_v23 }
0x1127   : > { %3708 = vmatprep.subr.bf16.mxu1 %v4024_v8 }
0x112a   : > { %3709 = vmatpush3.bf16.msra.mxu1 %v4514_v24 }
0x112b   : > { %3740 = vmatprep.subr.bf16.mxu1 %v4024_v8 }
0x112d   : > { %3711 = vmatmul.mubr.bf16.vlgmr.msra.gmra.mrb[72].mxu1 %v2944_v15  ;;  %v3916_v15 = vld [vmem:[%s4999_s6 + $0x10] sm:$0xff]  }
0x112e   : > { %3741 = vmatpush3.bf16.msra.mxu1 %v4525_v26  ;;  %3742 = vmatprep.mubr.msk.bf16.mxu1 %vm4025_vm0, %v4024_v8 }
0x112f   : > { %3746 = vmatprep.subr.bf16.mxu1 %v4024_v8 }
0x11e0   : > { %v2231_v2 = vpop.f32.mrb[68].mxu1 }
0x11e1   : > { %v2232_v3 = vadd.f32 %v4594_v55, %v2231_v2  ;;  %v3692_v16 = vpop.f32.mrb[69].mxu1  ;;  %v3917_v2 = vld [vmem:[%s4999_s6 + $0x18] sm:$0xff]  }
0x11e2   : > { %v2234_v4 = vpop.f32.mrb[70].mxu1  ;;  %v3919_v16 = vld [vmem:[%s4999_s6 + $0x28] sm:$0xff]  }
0x11e3   : > { %v2237_v5 = vmax.f32 %v2232_v3, 0.0  ;;  %v3693_v7 = vpop.f32.mrb[71].mxu1  ;;  %v3918_v3 = vld [vmem:[%s4999_s6 + $0x20] sm:$0xff]   ;;  %v3920_v4 = vld [vmem:[%s4999_s6 + $0x30] sm:$0xff]  }
0x11e4   : > { %v2952_v7 = vld [vmem:[%s4189_s30 + $0x38] sm:$0xf] }
0x11e5   : > { %v2238_v25 = vmax.f32 %v2149_v9, %v2237_v5  ;;  %v3921_v5 = vld [vmem:[%s4999_s6 + $0x38] sm:$0xff]  }
0x1200   : > { %v2275_v27 = vpop.f32.mrb[72].mxu1 }
0x1201   : > { %v2276_v28 = vadd.f32 %v4539_v34, %v2275_v27  ;;  %v3712_v29 = vpop.f32.mrb[73].mxu1 }
0x1202   : > { %v2278_v30 = vpop.f32.mrb[74].mxu1 }
0x1203   : > { %v2281_v31 = vmax.f32 %v2276_v28, 0.0  ;;  %v3713_v32 = vpop.f32.mrb[75].mxu1 }
0x1205   : > { %v2282_v33 = vpack.c.bf16 %v2281_v31, %v2281_v31 }
0x1207   : > { %3717 = vmatmul.mubr.msk.bf16.vlgmr.msra.gmra.mrb[72].mxu0 %vm596_vm1, %v2282_v33 }
0x1208   : > { %3721 = vmatpush3.bf16.msra.mxu0 %v4463_v6  ;;  %3736 = vmatprep.mubr.msk.bf16.mxu0 %vm4025_vm0, %v4024_v8 }
0x1209   : > { %3722 = vmatprep.subr.bf16.mxu0 %v4024_v8 }
0x120c   : > { %3723 = vmatpush3.bf16.msra.mxu0 %v4470_v17 }
0x120d   : > { %3724 = vmatprep.subr.bf16.mxu0 %v4024_v8 }
0x1210   : > { %3725 = vmatpush3.bf16.msra.mxu0 %v4479_v19 }
0x1211   : > { %3726 = vmatprep.subr.bf16.mxu0 %v4024_v8 }
0x1214   : > { %3727 = vmatpush3.bf16.msra.mxu0 %v4486_v20 }
0x1215   : > { %3728 = vmatprep.subr.bf16.mxu0 %v4024_v8 }
0x1218   : > { %3729 = vmatpush3.bf16.msra.mxu0 %v4493_v21 }
0x1219   : > { %3730 = vmatprep.subr.bf16.mxu0 %v4024_v8 }
0x121c   : > { %3731 = vmatpush3.bf16.msra.mxu0 %v4500_v22 }
0x121d   : > { %3732 = vmatprep.subr.bf16.mxu0 %v4024_v8 }
0x1220   : > { %3733 = vmatpush3.bf16.msra.mxu0 %v4507_v23 }
0x1221   : > { %3734 = vmatprep.subr.bf16.mxu0 %v4024_v8 }
0x1224   : > { %3735 = vmatpush3.bf16.msra.mxu0 %v4514_v24 }
0x1225   : > { %3766 = vmatprep.subr.bf16.mxu0 %v4024_v8 }
0x1227   : > { %3737 = vmatmul.mubr.bf16.vlgmr.msra.gmra.mrb[76].mxu0 %v2946_v35 }
0x1228   : > { %3767 = vmatpush3.bf16.msra.mxu0 %v4525_v26  ;;  %3768 = vmatprep.mubr.msk.bf16.mxu0 %vm4025_vm0, %v4024_v8 }
0x1229   : > { %3772 = vmatprep.subr.bf16.mxu0 %v4024_v8 }
0x12da   : > { %v2320_v36 = vpop.f32.mrb[72].mxu0 }
0x12db   : > { %v2321_v37 = vadd.f32 %v4594_v55, %v2320_v36  ;;  %v3718_v38 = vpop.f32.mrb[73].mxu0  ;;  %v3923_v36 = vld [vmem:[%s5000_s7] ss:$0 sm:$0xff] }
0x12dc   : > { %v2323_v48 = vpop.f32.mrb[74].mxu0 }
0x12dd   : > { %v2326_v39 = vmax.f32 %v2321_v37, 0.0  ;;  %v3719_v40 = vpop.f32.mrb[75].mxu0 }
0x12df   : > { %v2327_v41 = vmax.f32 %v2238_v25, %v2326_v39  ;;  %v3922_v25 = vld [vmem:[%s5001_s8] sm:$0xff]  }
0x12fa   : > { %v2364_v42 = vpop.f32.mrb[76].mxu0 }
0x12fb   : > { %v2365_v43 = vadd.f32 %v4539_v34, %v2364_v42  ;;  %v3738_v44 = vpop.f32.mrb[77].mxu0  ;;  %v2954_v42 = vld [vmem:[%s4189_s30 + $0x3c] sm:$0xf] }
0x12fc   : > { %v2367_v45 = vpop.f32.mrb[78].mxu0 }
0x12fd   : > { %v2370_v46 = vmax.f32 %v2365_v43, 0.0  ;;  %v3739_v47 = vpop.f32.mrb[79].mxu0 }
0x12ff   : > { %v2371_v49 = vpack.c.bf16 %v2370_v46, %v2370_v46 }
0x1301   : > { %3743 = vmatmul.mubr.msk.bf16.vlgmr.msra.gmra.mrb[76].mxu1 %vm596_vm1, %v2371_v49 }
0x1302   : > { %3747 = vmatpush3.bf16.msra.mxu1 %v4463_v6  ;;  %3762 = vmatprep.mubr.msk.bf16.mxu1 %vm4025_vm0, %v4024_v8 }
0x1303   : > { %3748 = vmatprep.subr.bf16.mxu1 %v4024_v8 }
0x1306   : > { %3749 = vmatpush3.bf16.msra.mxu1 %v4470_v17 }
0x1307   : > { %3750 = vmatprep.subr.bf16.mxu1 %v4024_v8 }
0x130a   : > { %3751 = vmatpush3.bf16.msra.mxu1 %v4479_v19 }
0x130b   : > { %3752 = vmatprep.subr.bf16.mxu1 %v4024_v8 }
0x130e   : > { %3753 = vmatpush3.bf16.msra.mxu1 %v4486_v20 }
0x130f   : > { %3754 = vmatprep.subr.bf16.mxu1 %v4024_v8 }
0x1312   : > { %3755 = vmatpush3.bf16.msra.mxu1 %v4493_v21 }
0x1313   : > { %3756 = vmatprep.subr.bf16.mxu1 %v4024_v8 }
0x1316   : > { %3757 = vmatpush3.bf16.msra.mxu1 %v4500_v22 }
0x1317   : > { %3758 = vmatprep.subr.bf16.mxu1 %v4024_v8 }
0x131a   : > { %3759 = vmatpush3.bf16.msra.mxu1 %v4507_v23 }
0x131b   : > { %3760 = vmatprep.subr.bf16.mxu1 %v4024_v8 }
0x131e   : > { %3761 = vmatpush3.bf16.msra.mxu1 %v4514_v24 }
0x131f   : > { %3792 = vmatprep.subr.bf16.mxu1 %v4024_v8 }
0x1321   : > { %3763 = vmatmul.mubr.bf16.vlgmr.msra.gmra.mrb[80].mxu1 %v2948_v50 }
0x1322   : > { %3793 = vmatpush3.bf16.msra.mxu1 %v4525_v26  ;;  %3794 = vmatprep.mubr.msk.bf16.mxu1 %vm4025_vm0, %v4024_v8 }
0x1323   : > { %3798 = vmatprep.subr.bf16.mxu1 %v4024_v8 }
0x13d4   : > { %v2409_v51 = vpop.f32.mrb[76].mxu1 }
0x13d5   : > { %v2410_v52 = vadd.f32 %v4594_v55, %v2409_v51  ;;  %v3744_v53 = vpop.f32.mrb[77].mxu1 }
0x13d6   : > { %v2412_v54 = vpop.f32.mrb[78].mxu1 }
0x13d7   : > { %v2415_v56 = vmax.f32 %v2410_v52, 0.0  ;;  %v3745_v57 = vpop.f32.mrb[79].mxu1 }
0x13d9   : > { %v2416_v58 = vmax.f32 %v2327_v41, %v2415_v56 }
0x13f4   : > { %v2453_v59 = vpop.f32.mrb[80].mxu1 }
0x13f5   : > { %v2454_v60 = vadd.f32 %v4539_v34, %v2453_v59  ;;  %v3764_v61 = vpop.f32.mrb[81].mxu1 }
0x13f6   : > { %v2456_v62 = vpop.f32.mrb[82].mxu1 }
0x13f7   : > { %v2459_v18 = vmax.f32 %v2454_v60, 0.0  ;;  %v3765_v63 = vpop.f32.mrb[83].mxu1 }
0x13f9   : > { %v2460_v9 = vpack.c.bf16 %v2459_v18, %v2459_v18 }
0x13fb   : > { %3769 = vmatmul.mubr.msk.bf16.vlgmr.msra.gmra.mrb[80].mxu0 %vm596_vm1, %v2460_v9 }
0x13fc   : > { %3773 = vmatpush3.bf16.msra.mxu0 %v4463_v6  ;;  %3788 = vmatprep.mubr.msk.bf16.mxu0 %vm4025_vm0, %v4024_v8  ;;  %v2950_v6 = vld [vmem:[%s4189_s30 + $0x34] sm:$0xf]  ;;  %s2961_s30 = sshll.u32 %s4103_s17, 8  ;;  %s4026_s17 = smov [#allocation6]  }
0x13fd   : > { %3774 = vmatprep.subr.bf16.mxu0 %v4024_v8  ;;  %s4949_s12 = scalar_lea.hbm %s5003_s10, %s2961_s30  ;;  %s3956_s22 = sshll.u32 %s4026_s17, 4  ;;  %s3957_s22 = int_to_ptr.vmem [resolvable:$false] %s3956_s22 }
0x13fe   : > { %s3958_s27 = scalar_lea.vmem %s3957_s22, 512  ;;  %p3959_p7 = scmp.lt.s32.totalorder %s4951_s20, %s3957_s22 }
0x13ff   : > { %p3960_p8 = scmp.lt.s32.totalorder %s3958_s27, %s3952_s24 }
0x1400   : > { %3775 = vmatpush3.bf16.msra.mxu0 %v4470_v17 }
0x1401   : > { %3776 = vmatprep.subr.bf16.mxu0 %v4024_v8  ;;  %p3961_p11 = por %p3960_p8, %p3959_p7 }
0x1403   : > { %p3962_p12 = pnand %p3961_p11, %p3955_p10 }
0x1404   : > { %3777 = vmatpush3.bf16.msra.mxu0 %v4479_v19 }
0x1405   : > { %3778 = vmatprep.subr.bf16.mxu0 %v4024_v8 }
0x1408   : > { %3779 = vmatpush3.bf16.msra.mxu0 %v4486_v20 }
0x1409   : > { %3780 = vmatprep.subr.bf16.mxu0 %v4024_v8 }
0x140c   : > { %3781 = vmatpush3.bf16.msra.mxu0 %v4493_v21 }
0x140d   : > { %3782 = vmatprep.subr.bf16.mxu0 %v4024_v8 }
0x1410   : > { %3783 = vmatpush3.bf16.msra.mxu0 %v4500_v22 }
0x1411   : > { %3784 = vmatprep.subr.bf16.mxu0 %v4024_v8 }
0x1414   : > { %3785 = vmatpush3.bf16.msra.mxu0 %v4507_v23 }
0x1415   : > { %3786 = vmatprep.subr.bf16.mxu0 %v4024_v8 }
0x1418   : > { %3787 = vmatpush3.bf16.msra.mxu0 %v4514_v24 }
0x1419   : > { %3818 = vmatprep.subr.bf16.mxu0 %v4024_v8 }
0x141b   : > { %3789 = vmatmul.mubr.bf16.vlgmr.msra.gmra.mrb[84].mxu0 %v2950_v6 }
0x141c   : > { %3819 = vmatpush3.bf16.msra.mxu0 %v4525_v26  ;;  %3820 = vmatprep.mubr.msk.bf16.mxu0 %vm4025_vm0, %v4024_v8 }
0x141d   : > { %3824 = vmatprep.subr.bf16.mxu0 %v4024_v8 }
0x14ce   : > { %v2498_v17 = vpop.f32.mrb[80].mxu0 }
0x14cf   : > { %v2499_v19 = vadd.f32 %v4594_v55, %v2498_v17  ;;  %v3770_v20 = vpop.f32.mrb[81].mxu0 }
0x14d0   : > { %v2501_v21 = vpop.f32.mrb[82].mxu0 }
0x14d1   : > { %v2504_v22 = vmax.f32 %v2499_v19, 0.0  ;;  %v3771_v23 = vpop.f32.mrb[83].mxu0 }
0x14d3   : > { %v2505_v10 = vmax.f32 %v2416_v58, %v2504_v22 }
0x14ee   : > { %v2542_v24 = vpop.f32.mrb[84].mxu0 }
0x14ef   : > { %v2543_v11 = vadd.f32 %v4539_v34, %v2542_v24  ;;  %v3790_v12 = vpop.f32.mrb[85].mxu0  ;;  %v3915_v34 = vld [vmem:[%s4999_s6 + $0x8] sm:$0xff]  }
0x14f0   : > { %v2545_v13 = vpop.f32.mrb[86].mxu0 }
0x14f1   : > { %v2548_v14 = vmax.f32 %v2543_v11, 0.0  ;;  %v3791_v26 = vpop.f32.mrb[87].mxu0 }
0x14f3   : > { %v2549_v0 = vpack.c.bf16 %v2548_v14, %v2548_v14 }
0x14f5   : > { %3795 = vmatmul.mubr.msk.bf16.vlgmr.msra.gmra.mrb[84].mxu1 %vm596_vm1, %v2549_v0 }
0x14f6   : > { %3799 = vmatpush3.bf16.msra.mxu1 %v3914_v1  ;;  %3814 = vmatprep.mubr.msk.bf16.mxu1 %vm4025_vm0, %v4024_v8 }
0x14f7   : > { %3800 = vmatprep.subr.bf16.mxu1 %v4024_v8 }
0x14fa   : > { %3801 = vmatpush3.bf16.msra.mxu1 %v3915_v34 }
0x14fb   : > { %3802 = vmatprep.subr.bf16.mxu1 %v4024_v8 }
0x14fe   : > { %3803 = vmatpush3.bf16.msra.mxu1 %v3916_v15 }
0x14ff   : > { %3804 = vmatprep.subr.bf16.mxu1 %v4024_v8 }
0x1502   : > { %3805 = vmatpush3.bf16.msra.mxu1 %v3917_v2 }
0x1503   : > { %3806 = vmatprep.subr.bf16.mxu1 %v4024_v8 }
0x1506   : > { %3807 = vmatpush3.bf16.msra.mxu1 %v3918_v3 }
0x1507   : > { %3808 = vmatprep.subr.bf16.mxu1 %v4024_v8 }
0x150a   : > { %3809 = vmatpush3.bf16.msra.mxu1 %v3919_v16 }
0x150b   : > { %3810 = vmatprep.subr.bf16.mxu1 %v4024_v8 }
0x150e   : > { %3811 = vmatpush3.bf16.msra.mxu1 %v3920_v4 }
0x150f   : > { %3812 = vmatprep.subr.bf16.mxu1 %v4024_v8 }
0x1512   : > { %3813 = vmatpush3.bf16.msra.mxu1 %v3921_v5 }
0x1513   : > { %3844 = vmatprep.subr.bf16.mxu1 %v4024_v8 }
0x1515   : > { %3815 = vmatmul.mubr.bf16.vlgmr.msra.gmra.mrb[88].mxu1 %v2952_v7 }
0x1516   : > { %3845 = vmatpush3.bf16.msra.mxu1 %v3922_v25  ;;  %3846 = vmatprep.mubr.msk.bf16.mxu1 %vm4025_vm0, %v4024_v8 }
0x15c8   : > { %v2587_v27 = vpop.f32.mrb[84].mxu1 }
0x15c9   : > { %v2588_v28 = vadd.f32 %v4594_v55, %v2587_v27  ;;  %v3796_v29 = vpop.f32.mrb[85].mxu1 }
0x15ca   : > { %v2590_v30 = vpop.f32.mrb[86].mxu1 }
0x15cb   : > { %v2593_v31 = vmax.f32 %v2588_v28, 0.0  ;;  %v3797_v32 = vpop.f32.mrb[87].mxu1 }
0x15cd   : > { %v2594_v33 = vmax.f32 %v2505_v10, %v2593_v31 }
0x15e8   : > { %v2631_v35 = vpop.f32.mrb[88].mxu1 }
0x15e9   : > { %v2632_v37 = vadd.f32 %v3923_v36, %v2631_v35  ;;  %v3816_v38 = vpop.f32.mrb[89].mxu1 }
0x15ea   : > { %v2634_v48 = vpop.f32.mrb[90].mxu1 }
0x15eb   : > { %v2637_v39 = vmax.f32 %v2632_v37, 0.0  ;;  %v3817_v40 = vpop.f32.mrb[91].mxu1 }
0x15ed   : > { %v2638_v41 = vpack.c.bf16 %v2637_v39, %v2637_v39 }
0x15ef   : > { %3821 = vmatmul.mubr.msk.bf16.vlgmr.msra.gmra.mrb[88].mxu0 %vm596_vm1, %v2638_v41 }
0x15f0   : > { %3825 = vmatpush3.bf16.msra.mxu0 %v3914_v1  ;;  %3840 = vmatprep.mubr.msk.bf16.mxu0 %vm4025_vm0, %v4024_v8 }
0x15f1   : > { %3826 = vmatprep.subr.bf16.mxu0 %v4024_v8 }
0x15f4   : > { %3827 = vmatpush3.bf16.msra.mxu0 %v3915_v34 }
0x15f5   : > { %3828 = vmatprep.subr.bf16.mxu0 %v4024_v8 }
0x15f8   : > { %3829 = vmatpush3.bf16.msra.mxu0 %v3916_v15 }
0x15f9   : > { %3830 = vmatprep.subr.bf16.mxu0 %v4024_v8 }
0x15fc   : > { %3831 = vmatpush3.bf16.msra.mxu0 %v3917_v2 }
0x15fd   : > { %3832 = vmatprep.subr.bf16.mxu0 %v4024_v8 }
0x1600   : > { %3833 = vmatpush3.bf16.msra.mxu0 %v3918_v3 }
0x1601   : > { %3834 = vmatprep.subr.bf16.mxu0 %v4024_v8 }
0x1604   : > { %3835 = vmatpush3.bf16.msra.mxu0 %v3919_v16 }
0x1605   : > { %3836 = vmatprep.subr.bf16.mxu0 %v4024_v8 }
0x1608   : > { %3837 = vmatpush3.bf16.msra.mxu0 %v3920_v4 }
0x1609   : > { %3838 = vmatprep.subr.bf16.mxu0 %v4024_v8 }
0x160c   : > { %3839 = vmatpush3.bf16.msra.mxu0 %v3921_v5 }
0x160f   : > { %3841 = vmatmul.mubr.bf16.vlgmr.msra.gmra.mrb[92].mxu0 %v2954_v42 }
0x16c2   : > { %v2676_v43 = vpop.f32.mrb[88].mxu0 }
0x16c3   : > { %v2677_v44 = vadd.f32 %v4594_v55, %v2676_v43  ;;  %v3822_v45 = vpop.f32.mrb[89].mxu0 }
0x16c4   : > { %v2679_v46 = vpop.f32.mrb[90].mxu0 }
0x16c5   : > { %v2682_v47 = vmax.f32 %v2677_v44, 0.0  ;;  %v3823_v49 = vpop.f32.mrb[91].mxu0 }
0x16c7   : > { %v2683_v50 = vmax.f32 %v2594_v33, %v2682_v47 }
0x16e2   : > { %v2720_v51 = vpop.f32.mrb[92].mxu0 }
0x16e3   : > { %v2721_v52 = vadd.f32 %v3923_v36, %v2720_v51  ;;  %v3842_v53 = vpop.f32.mrb[93].mxu0 }
0x16e4   : > { %v2723_v54 = vpop.f32.mrb[94].mxu0 }
0x16e5   : > { %v2726_v56 = vmax.f32 %v2721_v52, 0.0  ;;  %v3843_v8 = vpop.f32.mrb[95].mxu0 }
0x16e7   : > { %v2727_v57 = vpack.c.bf16 %v2726_v56, %v2726_v56 }
0x16e9   : > { %3847 = vmatmul.mubr.msk.bf16.vlgmr.msra.gmra.mrb[92].mxu1 %vm596_vm1, %v2727_v57 }
0x17bc   : > { %v2765_v58 = vpop.f32.mrb[92].mxu1 }
0x17bd   : > { %v2766_v59 = vadd.f32 %v4594_v55, %v2765_v58  ;;  %v3848_v60 = vpop.f32.mrb[93].mxu1 }
0x17be   : > { %v2768_v61 = vpop.f32.mrb[94].mxu1 }
0x17bf   : > { %v2771_v62 = vmax.f32 %v2766_v59, 0.0  ;;  %v3849_v18 = vpop.f32.mrb[95].mxu1 }
0x17c1   : > { %v2772_v63 = vmax.f32 %v2683_v50, %v2771_v62 }
0x17c3   : > { %2773 = vst [vmem:[%s4533_s11 + $0x8] sm:$0xff] %v2772_v63 }
0x17c4   : > { %3965 = shalt.err (!%p3962_p12)
}
0x17c5   : > { %s3966_s28 = scalar_lea.hbm %s4949_s12, 256  ;;  %s3970_s21 = scalar_lea.hbm %s5003_s10, 1024 }
0x17c6   : > { %p3967_p13 = scmp.ne.s32.totalorder %s4949_s12, %s3966_s28  ;;  %p3971_p0 = scmp.lt.u32.totalorder %s4949_s12, %s5003_s10 }
0x17c7   : > { %p3972_p3 = scmp.lt.u32.totalorder %s3970_s21, %s3966_s28  ;;  %p3974_p5 = scmp.lt.u32.totalorder %s3966_s28, %s4949_s12 }
0x17c8   : > { %p3968_p1 = pnand %p3967_p13, %p5014_p6 }
0x17c9   : > { %p3973_p4 = por %p3972_p3, %p3971_p0 }
0x17ca   : > { %p3969_p2 = pneg %p3968_p1 }
0x17cb   : > { %p3975_p9 = por %p3974_p5, %p3973_p4 }
0x17cd   : > { %p3976_p10 = pnand %p3975_p9, %p3969_p2 }
0x17cf   : > { %3979 = shalt.err (!%p3976_p10)
}
0x17d0   : > { %3852 = dma.vmem_to_hbm [thread:$0]  (%p5014_p6), %s4951_s20, 256, %s4949_s12, %s2775_s18  }
0x17d1 PF: > { %p3858_p7 = scmp.ge.s32.totalorder %s4018_s16, 2  ;;  %s2801_s23 = sand.u32 1, %s4006_s13  }
0x17d2   : > { %p5015_p8 = scmp.ne.s32.totalorder %s5012_s26, 0  ;;  %s2802_s15 = scalar_lea.sflag [#allocation5], %s2801_s23 }
0x17d4   : > { %p3855_p11 = pnand %p3858_p7, %p5015_p8 }
0x17d6   : > { %4001 = dma.done.wait (!%p3855_p11), %s2802_s15, 256  }
0x17d7   : > { %4003 = vsyncadd (!%p3855_p11), %s2802_s15, 4294967040  ;;  %s5016_s24 = sld [smem:[#allocation9_spill]]  ;;  %s5017_s15 = sld [smem:[#allocation10_spill]] }
0x17d8   : > { %p23_p12 = scmp.ge.s32.totalorder %s4107_s19, 6   ;;  %s5018_s13 = smov %s4010_s14 }
0x17d9   : > { %s5020_s16 = smov %s4107_s19 }
0x17da   :  { %25 = sbr.rel (!%p23_p12) target bundleno = 7 (0x7), region = 176 }
0x17dd   : > { %s5019_s14 = smov %s5016_s24 }
0x17e1   :  { %2807 = vsyncpa [#allocation4], 1 }
0x17e2   :  { %2809 = vsyncpa [#allocation4 + $0x1], 1 }
0x17e3   :  { %2810 = vsyncpa [#allocation5], 1 }
0x17e4   :  { %2812 = vsyncpa [#allocation5 + $0x1], 1 }

</bundles_post_ra>
